<compile_context>
chip_gen: v7x
topology: tpu7x:2x2x1
jax: 0.10.0
libtpu: 0.0.40
codegen_flags: <defaults>
</compile_context>

<pallas_src>
import jax
import jax.numpy as jnp
from jax.experimental import pallas as pl
from jax.experimental.pallas import tpu as pltpu


def _esm_mlp_kernel(x_ref, w1_ref, b1_ref, w2_ref, b2_ref, r_ref, o_ref):
    # x_ref:  (TM, D_in)   per-atom ESM features (any float dtype; cast per tile)
    # w1_ref: (D_in, H)    compute dtype (bf16 by default), grid-invariant
    # b1_ref: (1, H)       f32
    # w2_ref: (H, D_out)   compute dtype, grid-invariant
    # b2_ref: (1, D_out)   f32
    # r_ref:  (TM, D_out)  f32 residual rows h0[idx_protein]
    # o_ref:  (TM, D_out)  output (HBM buffer aliased with r_ref)
    x = x_ref[...].astype(w1_ref.dtype)                       # per-tile cast (VPU)
    h = jnp.dot(x, w1_ref[...], preferred_element_type=jnp.float32)
    h = jnp.maximum(h + b1_ref[...], 0.0)                     # bias + ReLU in f32
    y = jnp.dot(h.astype(w2_ref.dtype), w2_ref[...],
                preferred_element_type=jnp.float32)
    o_ref[...] = (r_ref[...] + y + b2_ref[...]).astype(o_ref.dtype)


def prepare_mlp_params(w1, b1, w2, b2, compute_dtype=jnp.bfloat16):
    """One-time parameter prep (persist outside the per-call path).

    w1: (d_in, hid), b1: (hid,), w2: (hid, d_out), b2: (d_out,) — PyTorch
    nn.Linear weights pre-transposed to (in_features, out_features).
    Pass compute_dtype=jnp.float32 for full-precision MXU math.
    """
    return (w1.astype(compute_dtype),
            b1.reshape(1, -1).astype(jnp.float32),
            w2.astype(compute_dtype),
            b2.reshape(1, -1).astype(jnp.float32))


def _ceil_to(x, m):
    return -(-x // m) * m


def _tpu_kind():
    devs = jax.devices()
    return (getattr(devs[0], "device_kind", "") or "").lower() if devs else ""


def _choose_row_tile(p, n_cores):
    # >=1 tile per TensorCore when there is enough work, <=512 rows per tile,
    # sublane-aligned (8).  For p not a multiple of 8 the last tile is ragged
    # and Pallas masks the out-of-bounds rows.
    tiles = max(1, pl.cdiv(p, 512))
    if p >= 8 * n_cores:
        tiles = max(tiles, n_cores)
    return max(8, _ceil_to(pl.cdiv(p, tiles), 8))


def _esm_mlp_pallas(feature_box, w1c, b1_2d, w2c, b2_2d, h0_protein):
    """yp = h0_protein + relu(feature_box @ W1 + b1) @ W2 + b2, fused."""
    p, d_in = feature_box.shape
    d_in_w, hid = w1c.shape
    hid_w, d_out = w2c.shape
    assert d_in == d_in_w and hid == hid_w
    assert h0_protein.shape == (p, d_out)

    kind = _tpu_kind()
    n_cores = 2 if ("v4" in kind or "7" in kind) else 1        # 2 TCs: v4 / v7x
    tm = _choose_row_tile(p, n_cores)
    grid = (pl.cdiv(p, tm),)

    in_bpe = jnp.dtype(feature_box.dtype).itemsize
    w_bpe = jnp.dtype(w1c.dtype).itemsize
    footprint = (
        2 * tm * d_in * in_bpe                     # activation tiles (double buf)
        + 2 * (d_in * hid + hid * d_out) * w_bpe   # weights (fetched once)
        + 2 * (hid + d_out) * 4                    # biases
        + 4 * tm * d_out * 4                       # residual + output tiles
        + tm * (hid + d_out) * 4)                  # f32 intermediates
    vmem_cap = 48 * 2**20 if "7" in kind else 100 * 2**20
    vmem_limit = int(min(vmem_cap, max(32 * 2**20, int(1.25 * footprint))))

    cost = pl.CostEstimate(
        flops=2 * p * (d_in * hid + hid * d_out),
        transcendentals=0,
        bytes_accessed=int(p * d_in * in_bpe
                           + (d_in * hid + hid * d_out) * w_bpe
                           + (hid + d_out) * 4
                           + 2 * p * d_out * 4),
    )

    return pl.pallas_call(
        _esm_mlp_kernel,
        out_shape=jax.ShapeDtypeStruct((p, d_out), h0_protein.dtype),
        grid_spec=pltpu.PrefetchScalarGridSpec(
            num_scalar_prefetch=0,
            grid=grid,
            in_specs=[
                pl.BlockSpec((tm, d_in), lambda i: (i, 0)),     # activation tile
                pl.BlockSpec((d_in, hid), lambda i: (0, 0)),    # W1 (invariant)
                pl.BlockSpec((1, hid), lambda i: (0, 0)),       # b1
                pl.BlockSpec((hid, d_out), lambda i: (0, 0)),   # W2 (invariant)
                pl.BlockSpec((1, d_out), lambda i: (0, 0)),     # b2
                pl.BlockSpec((tm, d_out), lambda i: (i, 0)),    # residual rows
            ],
            out_specs=pl.BlockSpec((tm, d_out), lambda i: (i, 0)),
        ),
        compiler_params=pltpu.CompilerParams(
            dimension_semantics=("parallel",),
            vmem_limit_bytes=vmem_limit,
        ),
        cost_estimate=cost,
        input_output_aliases={5: 0},           # residual rows -> output, in-place
    )(feature_box, w1c, b1_2d, w2c, b2_2d, h0_protein)


def insert_esm_feature(h0, feature_box, idx_protein, w1c, b1_2d, w2c, b2_2d):
    """Returns h0 + Simple_MLP(scatter(feature_box, idx_protein)).

    h0:          (n_atoms, d_out) f32 residual stream (h_compose[0])
    feature_box: (n_protein, d_in) per-protein-atom ESM features
    idx_protein: (n_protein,) int32 protein-atom rows of h0
    w1c/w2c/b*_2d: outputs of prepare_mlp_params (cast once, reused per call)
    """
    # Contribution of an all-zero (ligand) input row: relu(b1) @ W2 + b2,
    # computed with the same dtype treatment as the kernel.
    c = jnp.dot(jnp.maximum(b1_2d, 0.0).astype(w2c.dtype), w2c,
                preferred_element_type=jnp.float32) + b2_2d          # (1, d_out)

    if feature_box.shape[0] == 0:
        return (h0 + c).astype(h0.dtype)

    # Fused (residual + MLP) on protein rows only; scatter the small result back.
    h0_protein = jnp.take(h0, idx_protein, axis=0)
    yp = _esm_mlp_pallas(feature_box, w1c, b1_2d, w2c, b2_2d, h0_protein)
    return (h0 + c).astype(h0.dtype).at[idx_protein].set(yp.astype(h0.dtype))


if __name__ == "__main__":
    # TODO(synk): load_esm_feature reads per-PDB .pt files from disk; host file
    # I/O has no Pallas equivalent, so the gathered feature_box is an input.
    input_dim, hidden_dim, output_dim = 2560, 512, 256   # Simple_MLP defaults
    n_atoms = 300                                        # protein + ligand atoms

    # Deterministic protein/ligand partition: every 3rd atom is a ligand atom.
    idx_protein = jnp.asarray(
        [i for i in range(n_atoms) if i % 3 != 0], dtype=jnp.int32)
    n_protein = int(idx_protein.shape[0])

    key = jax.random.PRNGKey(0)
    kfb, kh, kw1, kb1, kw2, kb2 = jax.random.split(key, 6)

    feature_box = jax.random.normal(kfb, (n_protein, input_dim), jnp.float32)
    h0 = jax.random.normal(kh, (n_atoms, output_dim), jnp.float32)

    lim1 = 1.0 / (input_dim ** 0.5)
    lim2 = 1.0 / (hidden_dim ** 0.5)
    w1 = jax.random.uniform(kw1, (input_dim, hidden_dim), jnp.float32, -lim1, lim1)
    b1 = jax.random.uniform(kb1, (hidden_dim,), jnp.float32, -lim1, lim1)
    w2 = jax.random.uniform(kw2, (hidden_dim, output_dim), jnp.float32, -lim2, lim2)
    b2 = jax.random.uniform(kb2, (output_dim,), jnp.float32, -lim2, lim2)

    # One-time parameter cast (persisted outside the per-call hot path).
    w1c, b1_2d, w2c, b2_2d = prepare_mlp_params(w1, b1, w2, b2)

    fwd = jax.jit(insert_esm_feature)
    new_h0 = jax.block_until_ready(
        fwd(h0, feature_box, idx_protein, w1c, b1_2d, w2c, b2_2d))

    # Reference: the original dense-scatter path (ligand rows zero) with the
    # same bf16-on-MXU / f32-accumulate math as the kernel.
    esm_dense = jnp.zeros((n_atoms, input_dim), jnp.float32)
    esm_dense = esm_dense.at[idx_protein].set(feature_box)
    xb = esm_dense.astype(w1c.dtype)
    hh = jnp.maximum(
        jnp.dot(xb, w1c, preferred_element_type=jnp.float32) + b1, 0.0)
    ref = h0 + (jnp.dot(hh.astype(w2c.dtype), w2c,
                        preferred_element_type=jnp.float32) + b2)

    assert new_h0.shape == (n_atoms, output_dim)
    err = float(jnp.max(jnp.abs(new_h0 - ref)))
    assert jnp.allclose(new_h0, ref, atol=1e-2, rtol=1e-2), f"max abs err {err}"

    print("KERNEL_OK")
</pallas_src>

<mosaic_0001>
module attributes {stable_mosaic.version = 11 : i64} {
  func.func @_esm_mlp_kernel(%arg0: i32, %arg1: memref<200x2560xf32, #tpu.memory_space<vmem>>, %arg2: memref<2560x512xbf16, #tpu.memory_space<vmem>>, %arg3: memref<1x512xf32, #tpu.memory_space<vmem>>, %arg4: memref<512x256xbf16, #tpu.memory_space<vmem>>, %arg5: memref<1x256xf32, #tpu.memory_space<vmem>>, %arg6: memref<200x256xf32, #tpu.memory_space<vmem>>, %arg7: memref<200x256xf32, #tpu.memory_space<vmem>>) attributes {dimension_semantics = [#tpu.dimension_semantics<parallel>], iteration_bounds = array<i64: 1>, scalar_prefetch = 0 : i64, scratch_operands = 0 : i64, tpu.core_type = #tpu.core_type<tc>, window_params = [{transform_indices = @transform_0, window_bounds = array<i64: 200, 2560>}, {pipeline_mode = #tpu.pipeline_mode<synchronous>, transform_indices = @transform_1, window_bounds = array<i64: 2560, 512>}, {pipeline_mode = #tpu.pipeline_mode<synchronous>, transform_indices = @transform_2, window_bounds = array<i64: 1, 512>}, {pipeline_mode = #tpu.pipeline_mode<synchronous>, transform_indices = @transform_3, window_bounds = array<i64: 512, 256>}, {pipeline_mode = #tpu.pipeline_mode<synchronous>, transform_indices = @transform_4, window_bounds = array<i64: 1, 256>}, {transform_indices = @transform_5, window_bounds = array<i64: 200, 256>}, {transform_indices = @transform_6, window_bounds = array<i64: 200, 256>}]} {
    %c0 = arith.constant 0 : index
    %c0_0 = arith.constant 0 : index
    %0 = vector.load %arg1[%c0, %c0_0] : memref<200x2560xf32, #tpu.memory_space<vmem>>, vector<200x2560xf32>
    %1 = arith.truncf %0 : vector<200x2560xf32> to vector<200x2560xbf16>
    %c0_1 = arith.constant 0 : index
    %c0_2 = arith.constant 0 : index
    %2 = vector.load %arg2[%c0_1, %c0_2] : memref<2560x512xbf16, #tpu.memory_space<vmem>>, vector<2560x512xbf16>
    %cst = arith.constant dense<0.000000e+00> : vector<200x512xf32>
    %3 = tpu.matmul %1, %2, %cst {dimension_numbers = #tpu.dot_dimension_numbers<[1], [0], [0], [1], [0, 0, 1, 1], [], []>} : vector<200x2560xbf16>, vector<2560x512xbf16>, vector<200x512xf32> -> vector<200x512xf32>
    %c0_3 = arith.constant 0 : index
    %c0_4 = arith.constant 0 : index
    %4 = vector.load %arg3[%c0_3, %c0_4] : memref<1x512xf32, #tpu.memory_space<vmem>>, vector<1x512xf32>
    %5 = vector.broadcast %4 : vector<1x512xf32> to vector<200x512xf32>
    %6 = arith.addf %3, %5 : vector<200x512xf32>
    %cst_5 = arith.constant 0.000000e+00 : f32
    %7 = vector.broadcast %cst_5 : f32 to vector<200x512xf32>
    %8 = arith.maximumf %6, %7 : vector<200x512xf32>
    %9 = arith.truncf %8 : vector<200x512xf32> to vector<200x512xbf16>
    %c0_6 = arith.constant 0 : index
    %c0_7 = arith.constant 0 : index
    %10 = vector.load %arg4[%c0_6, %c0_7] : memref<512x256xbf16, #tpu.memory_space<vmem>>, vector<512x256xbf16>
    %cst_8 = arith.constant dense<0.000000e+00> : vector<200x256xf32>
    %11 = tpu.matmul %9, %10, %cst_8 {dimension_numbers = #tpu.dot_dimension_numbers<[1], [0], [0], [1], [0, 0, 1, 1], [], []>} : vector<200x512xbf16>, vector<512x256xbf16>, vector<200x256xf32> -> vector<200x256xf32>
    %c0_9 = arith.constant 0 : index
    %c0_10 = arith.constant 0 : index
    %12 = vector.load %arg6[%c0_9, %c0_10] : memref<200x256xf32, #tpu.memory_space<vmem>>, vector<200x256xf32>
    %13 = arith.addf %12, %11 : vector<200x256xf32>
    %c0_11 = arith.constant 0 : index
    %c0_12 = arith.constant 0 : index
    %14 = vector.load %arg5[%c0_11, %c0_12] : memref<1x256xf32, #tpu.memory_space<vmem>>, vector<1x256xf32>
    %15 = vector.broadcast %14 : vector<1x256xf32> to vector<200x256xf32>
    %16 = arith.addf %13, %15 : vector<200x256xf32>
    %c0_13 = arith.constant 0 : index
    %c0_14 = arith.constant 0 : index
    %17 = vector.load %arg7[%c0_13, %c0_14] : memref<200x256xf32, #tpu.memory_space<vmem>>, vector<200x256xf32>
    tpu.vector_store %arg7[%c0_13, %c0_14], %16 {strides = array<i32>} : memref<200x256xf32, #tpu.memory_space<vmem>>, vector<200x256xf32>,
    return
  }
  func.func @transform_0(%arg0: i32) -> (i32, i32) {
    %c0_i32 = arith.constant 0 : i32
    %c0_i32_0 = arith.constant 0 : i32
    return %arg0, %c0_i32 : i32, i32
  }
  func.func @transform_1(%arg0: i32) -> (i32, i32) {
    %c0_i32 = arith.constant 0 : i32
    %c0_i32_0 = arith.constant 0 : i32
    %c0_i32_1 = arith.constant 0 : i32
    return %c0_i32, %c0_i32_0 : i32, i32
  }
  func.func @transform_2(%arg0: i32) -> (i32, i32) {
    %c0_i32 = arith.constant 0 : i32
    %c0_i32_0 = arith.constant 0 : i32
    %c0_i32_1 = arith.constant 0 : i32
    return %c0_i32, %c0_i32_0 : i32, i32
  }
  func.func @transform_3(%arg0: i32) -> (i32, i32) {
    %c0_i32 = arith.constant 0 : i32
    %c0_i32_0 = arith.constant 0 : i32
    %c0_i32_1 = arith.constant 0 : i32
    return %c0_i32, %c0_i32_0 : i32, i32
  }
  func.func @transform_4(%arg0: i32) -> (i32, i32) {
    %c0_i32 = arith.constant 0 : i32
    %c0_i32_0 = arith.constant 0 : i32
    %c0_i32_1 = arith.constant 0 : i32
    return %c0_i32, %c0_i32_0 : i32, i32
  }
  func.func @transform_5(%arg0: i32) -> (i32, i32) {
    %c0_i32 = arith.constant 0 : i32
    %c0_i32_0 = arith.constant 0 : i32
    return %arg0, %c0_i32 : i32, i32
  }
  func.func @transform_6(%arg0: i32) -> (i32, i32) {
    %c0_i32 = arith.constant 0 : i32
    %c0_i32_0 = arith.constant 0 : i32
    return %arg0, %c0_i32 : i32, i32
  }
}

</mosaic_0001>

<bundles_post_ra>
// kernel: insert_esm_feature.1
= control target key start
LH: loop header
LB: loop body
LE: loop exit
PB: predicated region body
PF: predicated region fallthrough
CT: control target
= control target key end

     0   :  { %11 = vsyncpa [#allocation3], 0  ;;  %s15348_s0 = inlined_call_operand.vmem [shape: f32[200,2560], index: 0, kind: input, shape index: {}]   ;;  %s15349_s1 = inlined_call_operand.hbm [shape: bf16[2560,512], index: 1, kind: input, shape index: {}]   ;;  %s15350_s2 = inlined_call_operand.hbm [shape: f32[1,512], index: 2, kind: input, shape index: {}]   ;;  %s15351_s3 = inlined_call_operand.vmem [shape: bf16[512,256], index: 3, kind: input, shape index: {}]   ;;  %s15352_s4 = inlined_call_operand.hbm [shape: f32[1,256], index: 4, kind: input, shape index: {}]   ;;  %s15353_s5 = inlined_call_operand.vmem [shape: f32[200,256], index: 5, kind: input, shape index: {}, may-alias: {5,6}]   ;;  %s15354_s6 = inlined_call_operand.vmem [shape: f32[200,256], index: 6, kind: output, shape index: {}, may-alias: {5,6}]  }
   0x1   :  { %12 = vsyncpa [#allocation5], 0  ;;  %s11895_s21 = smov [#allocation4]   ;;  %s11896_s23 = smov [#allocation2]  }
   0x2   :  { %s33_s22 = sshll.u32 %s11895_s21, 4  ;;  %s20_s24 = sshll.u32 %s11896_s23, 4  ;;  %s34_s22 = int_to_ptr.vmem [resolvable:$true] %s33_s22  ;;  %s11935_s24 = int_to_ptr.vmem [resolvable:$true] %s20_s24 }
   0x3   :  { %s11825_s27 = scalar_lea.hbm %s15350_s2, 64 }
   0x4   :  { %p11826_p0 = scmp.ne.s32.totalorder %s15350_s2, %s11825_s27  ;;  %p11829_p1 = scmp.lt.u32.totalorder %s11825_s27, %s15350_s2 }
   0x6   :  { %p11831_p2 = pnand %p11829_p1, %p11826_p0 }
   0x8   :  { %11834 = shalt.err (!%p11831_p2)
}
   0x9   :  { %s11835_s8 = scalar_lea.vmem %s34_s22, 64  ;;  %p11840_p4 = scmp.lt.s32.totalorder %s34_s22, %s34_s22 }
   0xa   :  { %p11836_p3 = scmp.ne.s32.totalorder %s34_s22, %s11835_s8  ;;  %p11841_p5 = scmp.lt.s32.totalorder %s11835_s8, %s11835_s8 }
   0xc   :  { %p11842_p6 = por %p11841_p5, %p11840_p4 }
   0xe   :  { %p11843_p7 = pnand %p11842_p6, %p11836_p3 }
  0x10   :  { %11846 = shalt.err (!%p11843_p7)
}
  0x11   :  { %36 = dma.hbm_to_vmem [thread:$0]  %s15350_s2, 64, %s34_s22, [#allocation5]  }
  0x12   :  { %s11847_s13 = scalar_lea.hbm %s15349_s1, 81920 }
  0x13   :  { %p11848_p8 = scmp.ne.s32.totalorder %s15349_s1, %s11847_s13  ;;  %p11851_p9 = scmp.lt.u32.totalorder %s11847_s13, %s15349_s1 }
  0x15   :  { %p11853_p10 = pnand %p11851_p9, %p11848_p8 }
  0x17   :  { %11856 = shalt.err (!%p11853_p10)
}
  0x18   :  { %s11857_s18 = scalar_lea.vmem %s11935_s24, 81920  ;;  %p11862_p12 = scmp.lt.s32.totalorder %s11935_s24, %s11935_s24 }
  0x19   :  { %p11858_p11 = scmp.ne.s32.totalorder %s11935_s24, %s11857_s18  ;;  %p11863_p13 = scmp.lt.s32.totalorder %s11857_s18, %s11857_s18 }
  0x1b   :  { %p11864_p0 = por %p11863_p13, %p11862_p12 }
  0x1d   :  { %p11865_p1 = pnand %p11864_p0, %p11858_p11 }
  0x1f   :  { %11868 = shalt.err (!%p11865_p1)
}
  0x20   :  { %s11897_s2 = smov 256   ;;  %s11898_s19 = smov 16  }
  0x21   :  { %26 = dma.hbm_to_vmem [thread:$0]  %s15349_s1, 81920, %s11935_s24, [#allocation3], %s11897_s2, %s11897_s2, %s11898_s19  }
  0x22   :  { %s11899_s22 = smov [#allocation6]   ;;  %s11869_s27 = scalar_lea.hbm %s15352_s4, 32 }
  0x23   :  { %s45_s23 = sshll.u32 %s11899_s22, 4  ;;  %p11870_p2 = scmp.ne.s32.totalorder %s15352_s4, %s11869_s27  ;;  %s46_s23 = int_to_ptr.vmem [resolvable:$true] %s45_s23 }
  0x24   :  { %p11873_p3 = scmp.lt.u32.totalorder %s11869_s27, %s15352_s4 }
  0x26   :  { %p11875_p4 = pnand %p11873_p3, %p11870_p2 }
  0x28   :  { %11878 = shalt.err (!%p11875_p4)
}
  0x29   :  { %s11879_s8 = scalar_lea.vmem %s46_s23, 32  ;;  %p11884_p6 = scmp.lt.s32.totalorder %s46_s23, %s46_s23 }
  0x2a   :  { %p11880_p5 = scmp.ne.s32.totalorder %s46_s23, %s11879_s8  ;;  %p11885_p7 = scmp.lt.s32.totalorder %s11879_s8, %s11879_s8 }
  0x2c   :  { %p11886_p8 = por %p11885_p7, %p11884_p6 }
  0x2e   :  { %p11887_p9 = pnand %p11886_p8, %p11880_p5 }
  0x30   :  { %11890 = shalt.err (!%p11887_p9)
}
  0x31   :  { %48 = dma.hbm_to_vmem [thread:$0]  %s15352_s4, 32, %s46_s23, [#allocation5]  }
  0x32   :  { %11891 = dma.done.wait [#allocation3], 81920  }
  0x33   :  { %11892 = vsyncadd [#allocation3], 4294885376 }
  0x34   :  { %11893 = dma.done.wait [#allocation5], 96  }
  0x35   :  { %11894 = vsyncadd [#allocation5], 4294967200  ;;  %v10769_v0 = vld [vmem:[#allocation2 + $0x4] ss:$16 sps:$4 sm:$0xff]   ;;  %v10773_v2 = vld [vmem:[#allocation2] ss:$16 sps:$4 sm:$0xff]  }
  0x36   :  { %v10771_v1 = vld [vmem:[#allocation2 + $0x204] ss:$16 sps:$4 sm:$0xff]   ;;  %4682 = vmatprep.subr.bf16.mxu1 %v10769_v0  ;;  %v10774_v3 = vld [vmem:[#allocation2 + $0x200] ss:$16 sps:$4 sm:$0xff]   ;;  %v61_v46 = vld [vmem:[%s15348_s0 + $0x8] sm:$0xff] }
  0x37   :  { %4843 = vmatprep.subr.bf16.mxu0 %v10771_v1  ;;  %v10775_v4 = vld [vmem:[#allocation2 + $0x24] ss:$16 sps:$4 sm:$0xff]   ;;  %4683 = vmatpush1.bf16.msra.mxu1 %v10773_v2  ;;  %v10779_v6 = vld [vmem:[#allocation2 + $0x20] ss:$16 sps:$4 sm:$0xff]   ;;  %v81_v47 = vld [vmem:[%s15348_s0 + $0xa8] sm:$0xff] }
  0x38   :  { %4844 = vmatpush1.bf16.msra.mxu0 %v10774_v3  ;;  %v10777_v5 = vld [vmem:[#allocation2 + $0x224] ss:$16 sps:$4 sm:$0xff]   ;;  %4684 = vmatprep.subr.bf16.mxu1 %v10775_v4  ;;  %v10780_v7 = vld [vmem:[#allocation2 + $0x220] ss:$16 sps:$4 sm:$0xff]   ;;  %v63_v48 = vld [vmem:[%s15348_s0 + $0x18] sm:$0xff]  ;;  %v11990_v53 = vpack.c.bf16 %v81_v47, %v61_v46 }
  0x39   :  { %4845 = vmatprep.subr.bf16.mxu0 %v10777_v5  ;;  %v10781_v8 = vld [vmem:[#allocation2 + $0x44] ss:$16 sps:$4 sm:$0xff]   ;;  %v10785_v10 = vld [vmem:[#allocation2 + $0x40] ss:$16 sps:$4 sm:$0xff]   ;;  %v83_v49 = vld [vmem:[%s15348_s0 + $0xb8] sm:$0xff] }
  0x3a   :  { %v10783_v9 = vld [vmem:[#allocation2 + $0x244] ss:$16 sps:$4 sm:$0xff]   ;;  %v10786_v11 = vld [vmem:[#allocation2 + $0x240] ss:$16 sps:$4 sm:$0xff]   ;;  %v11992_v54 = vpack.c.bf16 %v83_v49, %v63_v48  ;;  %4714 = vmatprep.mubr.bf16.mxu1 %v11990_v53  ;;  %v181_v46 = vld [vmem:[%s15348_s0 + $0x3c8] sm:$0xff] }
  0x3b   :  { %4685 = vmatpush1.bf16.msra.mxu1 %v10779_v6  ;;  %v10787_v12 = vld [vmem:[#allocation2 + $0x64] ss:$16 sps:$4 sm:$0xff]   ;;  %v10791_v14 = vld [vmem:[#allocation2 + $0x60] ss:$16 sps:$4 sm:$0xff]   ;;  %v201_v47 = vld [vmem:[%s15348_s0 + $0x468] sm:$0xff] }
  0x3c   :  { %4846 = vmatpush1.bf16.msra.mxu0 %v10780_v7  ;;  %4686 = vmatprep.subr.bf16.mxu1 %v10781_v8  ;;  %v10789_v13 = vld [vmem:[#allocation2 + $0x264] ss:$16 sps:$4 sm:$0xff]   ;;  %v10792_v15 = vld [vmem:[#allocation2 + $0x260] ss:$16 sps:$4 sm:$0xff]   ;;  %v183_v48 = vld [vmem:[%s15348_s0 + $0x3d8] sm:$0xff] }
  0x3d   :  { %4847 = vmatprep.subr.bf16.mxu0 %v10783_v9  ;;  %v10793_v16 = vld [vmem:[#allocation2 + $0x84] ss:$16 sps:$4 sm:$0xff]   ;;  %v10797_v18 = vld [vmem:[#allocation2 + $0x80] ss:$16 sps:$4 sm:$0xff]   ;;  %4875 = vmatprep.mubr.bf16.mxu0 %v11992_v54 }
  0x3e   :  { %v10795_v17 = vld [vmem:[#allocation2 + $0x284] ss:$16 sps:$4 sm:$0xff]   ;;  %v10798_v19 = vld [vmem:[#allocation2 + $0x280] ss:$16 sps:$4 sm:$0xff]  }
  0x3f   :  { %4687 = vmatpush1.bf16.msra.mxu1 %v10785_v10  ;;  %v10799_v20 = vld [vmem:[#allocation2 + $0xa4] ss:$16 sps:$4 sm:$0xff]   ;;  %v10803_v22 = vld [vmem:[#allocation2 + $0xa0] ss:$16 sps:$4 sm:$0xff]   ;;  %v10867_v10 = vld [vmem:[#allocation2 + $0xc] ss:$16 sps:$4 sm:$0xff]  }
  0x40   :  { %4848 = vmatpush1.bf16.msra.mxu0 %v10786_v11  ;;  %4688 = vmatprep.subr.bf16.mxu1 %v10787_v12  ;;  %v10801_v21 = vld [vmem:[#allocation2 + $0x2a4] ss:$16 sps:$4 sm:$0xff]   ;;  %v10804_v23 = vld [vmem:[#allocation2 + $0x2a0] ss:$16 sps:$4 sm:$0xff]   ;;  %v101_v11 = vld [vmem:[%s15348_s0 + $0x148] sm:$0xff] }
  0x41   :  { %4849 = vmatprep.subr.bf16.mxu0 %v10789_v13  ;;  %v10805_v24 = vld [vmem:[#allocation2 + $0xc4] ss:$16 sps:$4 sm:$0xff]   ;;  %v10809_v26 = vld [vmem:[#allocation2 + $0xc0] ss:$16 sps:$4 sm:$0xff]   ;;  %v121_v12 = vld [vmem:[%s15348_s0 + $0x1e8] sm:$0xff] }
  0x42   :  { %v10807_v25 = vld [vmem:[#allocation2 + $0x2c4] ss:$16 sps:$4 sm:$0xff]   ;;  %v10810_v27 = vld [vmem:[#allocation2 + $0x2c0] ss:$16 sps:$4 sm:$0xff]   ;;  %v103_v13 = vld [vmem:[%s15348_s0 + $0x158] sm:$0xff] }
  0x43   :  { %4689 = vmatpush1.bf16.msra.mxu1 %v10791_v14  ;;  %v10811_v28 = vld [vmem:[#allocation2 + $0xe4] ss:$16 sps:$4 sm:$0xff]   ;;  %v10815_v30 = vld [vmem:[#allocation2 + $0xe0] ss:$16 sps:$4 sm:$0xff]   ;;  %v123_v14 = vld [vmem:[%s15348_s0 + $0x1f8] sm:$0xff] }
  0x44   :  { %4850 = vmatpush1.bf16.msra.mxu0 %v10792_v15  ;;  %4690 = vmatprep.subr.bf16.mxu1 %v10793_v16  ;;  %v10813_v29 = vld [vmem:[#allocation2 + $0x2e4] ss:$16 sps:$4 sm:$0xff]   ;;  %v10816_v31 = vld [vmem:[#allocation2 + $0x2e0] ss:$16 sps:$4 sm:$0xff]  }
  0x45   :  { %4851 = vmatprep.subr.bf16.mxu0 %v10795_v17  ;;  %v10817_v32 = vld [vmem:[#allocation2 + $0x104] ss:$16 sps:$4 sm:$0xff]   ;;  %v10821_v34 = vld [vmem:[#allocation2 + $0x100] ss:$16 sps:$4 sm:$0xff]   ;;  %v10865_v17 = vld [vmem:[#allocation2 + $0x8] ss:$16 sps:$4 sm:$0xff]  }
  0x46   :  { %v10819_v33 = vld [vmem:[#allocation2 + $0x304] ss:$16 sps:$4 sm:$0xff]   ;;  %v10822_v35 = vld [vmem:[#allocation2 + $0x300] ss:$16 sps:$4 sm:$0xff]  }
  0x47   :  { %4691 = vmatpush1.bf16.msra.mxu1 %v10797_v18  ;;  %v10823_v36 = vld [vmem:[#allocation2 + $0x124] ss:$16 sps:$4 sm:$0xff]   ;;  %v10827_v38 = vld [vmem:[#allocation2 + $0x120] ss:$16 sps:$4 sm:$0xff]   ;;  %v12024_v18 = vpack.c.bf16 %v121_v12, %v101_v11 }
  0x48   :  { %4852 = vmatpush1.bf16.msra.mxu0 %v10798_v19  ;;  %4692 = vmatprep.subr.bf16.mxu1 %v10799_v20  ;;  %v10825_v37 = vld [vmem:[#allocation2 + $0x324] ss:$16 sps:$4 sm:$0xff]   ;;  %v10828_v39 = vld [vmem:[#allocation2 + $0x320] ss:$16 sps:$4 sm:$0xff]   ;;  %v12026_v19 = vpack.c.bf16 %v123_v14, %v103_v13  ;;  %v10870_v20 = vld [vmem:[#allocation2 + $0x2c] ss:$16 sps:$4 sm:$0xff]  }
  0x49   :  { %4853 = vmatprep.subr.bf16.mxu0 %v10801_v21  ;;  %v10829_v40 = vld [vmem:[#allocation2 + $0x144] ss:$16 sps:$4 sm:$0xff]   ;;  %v10833_v42 = vld [vmem:[#allocation2 + $0x140] ss:$16 sps:$4 sm:$0xff]   ;;  %v10868_v21 = vld [vmem:[#allocation2 + $0x28] ss:$16 sps:$4 sm:$0xff]  }
  0x4a   :  { %v10831_v41 = vld [vmem:[#allocation2 + $0x344] ss:$16 sps:$4 sm:$0xff]   ;;  %v10834_v43 = vld [vmem:[#allocation2 + $0x340] ss:$16 sps:$4 sm:$0xff]  }
  0x4b   :  { %4693 = vmatpush1.bf16.msra.mxu1 %v10803_v22  ;;  %v10835_v44 = vld [vmem:[#allocation2 + $0x164] ss:$16 sps:$4 sm:$0xff]   ;;  %v10839_v50 = vld [vmem:[#allocation2 + $0x160] ss:$16 sps:$4 sm:$0xff]  }
  0x4c   :  { %4854 = vmatpush1.bf16.msra.mxu0 %v10804_v23  ;;  %4694 = vmatprep.subr.bf16.mxu1 %v10805_v24  ;;  %v10837_v45 = vld [vmem:[#allocation2 + $0x364] ss:$16 sps:$4 sm:$0xff]   ;;  %v10840_v51 = vld [vmem:[#allocation2 + $0x360] ss:$16 sps:$4 sm:$0xff]  }
  0x4d   :  { %4855 = vmatprep.subr.bf16.mxu0 %v10807_v25  ;;  %v10841_v52 = vld [vmem:[#allocation2 + $0x184] ss:$16 sps:$4 sm:$0xff]   ;;  %v10845_v56 = vld [vmem:[#allocation2 + $0x180] ss:$16 sps:$4 sm:$0xff]  }
  0x4e   :  { %v10843_v55 = vld [vmem:[#allocation2 + $0x384] ss:$16 sps:$4 sm:$0xff]   ;;  %v10846_v57 = vld [vmem:[#allocation2 + $0x380] ss:$16 sps:$4 sm:$0xff]  }
  0x4f   :  { %4695 = vmatpush1.bf16.msra.mxu1 %v10809_v26  ;;  %v10847_v58 = vld [vmem:[#allocation2 + $0x1a4] ss:$16 sps:$4 sm:$0xff]   ;;  %v10851_v60 = vld [vmem:[#allocation2 + $0x1a0] ss:$16 sps:$4 sm:$0xff]   ;;  %v10873_v26 = vld [vmem:[#allocation2 + $0x4c] ss:$16 sps:$4 sm:$0xff]  }
  0x50   :  { %4856 = vmatpush1.bf16.msra.mxu0 %v10810_v27  ;;  %4696 = vmatprep.subr.bf16.mxu1 %v10811_v28  ;;  %v10849_v59 = vld [vmem:[#allocation2 + $0x3a4] ss:$16 sps:$4 sm:$0xff]   ;;  %v10852_v61 = vld [vmem:[#allocation2 + $0x3a0] ss:$16 sps:$4 sm:$0xff]   ;;  %v141_v27 = vld [vmem:[%s15348_s0 + $0x288] sm:$0xff] }
  0x51   :  { %4857 = vmatprep.subr.bf16.mxu0 %v10813_v29  ;;  %v10853_v62 = vld [vmem:[#allocation2 + $0x1c4] ss:$16 sps:$4 sm:$0xff]   ;;  %v10857_v0 = vld [vmem:[#allocation2 + $0x1c0] ss:$16 sps:$4 sm:$0xff]   ;;  %v161_v28 = vld [vmem:[%s15348_s0 + $0x328] sm:$0xff] }
  0x52   :  { %v10855_v63 = vld [vmem:[#allocation2 + $0x3c4] ss:$16 sps:$4 sm:$0xff]   ;;  %v10858_v1 = vld [vmem:[#allocation2 + $0x3c0] ss:$16 sps:$4 sm:$0xff]   ;;  %v143_v29 = vld [vmem:[%s15348_s0 + $0x298] sm:$0xff] }
  0x53   :  { %4697 = vmatpush1.bf16.msra.mxu1 %v10815_v30  ;;  %v10859_v2 = vld [vmem:[#allocation2 + $0x1e4] ss:$16 sps:$4 sm:$0xff]   ;;  %v10863_v4 = vld [vmem:[#allocation2 + $0x1e0] ss:$16 sps:$4 sm:$0xff]  }
  0x54   :  { %4858 = vmatpush1.bf16.msra.mxu0 %v10816_v31  ;;  %4698 = vmatprep.subr.bf16.mxu1 %v10817_v32  ;;  %v10861_v3 = vld [vmem:[#allocation2 + $0x3e4] ss:$16 sps:$4 sm:$0xff]   ;;  %v10864_v5 = vld [vmem:[#allocation2 + $0x3e0] ss:$16 sps:$4 sm:$0xff]   ;;  %v163_v32 = vld [vmem:[%s15348_s0 + $0x338] sm:$0xff] }
  0x55   :  { %4859 = vmatprep.subr.bf16.mxu0 %v10819_v33  ;;  %v60_v6 = vld [vmem:[%s15348_s0] sm:$0xff]  ;;  %v62_v8 = vld [vmem:[%s15348_s0 + $0x10] sm:$0xff] }
  0x56   :  { %v80_v7 = vld [vmem:[%s15348_s0 + $0xa0] sm:$0xff]  ;;  %v82_v9 = vld [vmem:[%s15348_s0 + $0xb0] sm:$0xff] }
  0x57   :  { %4699 = vmatpush1.bf16.msra.mxu1 %v10821_v34  ;;  %v12020_v15 = vpack.c.bf16 %v80_v7, %v60_v6  ;;  %v12022_v16 = vpack.c.bf16 %v82_v9, %v62_v8  ;;  %v100_v22 = vld [vmem:[%s15348_s0 + $0x140] sm:$0xff]  ;;  %v102_v24 = vld [vmem:[%s15348_s0 + $0x150] sm:$0xff]  ;;  %v223_v6 = vld [vmem:[%s15348_s0 + $0x518] sm:$0xff] }
  0x58   :  { %4860 = vmatpush1.bf16.msra.mxu0 %v10822_v35  ;;  %4700 = vmatprep.subr.bf16.mxu1 %v10823_v36  ;;  %v120_v23 = vld [vmem:[%s15348_s0 + $0x1e0] sm:$0xff]  ;;  %v122_v25 = vld [vmem:[%s15348_s0 + $0x1f0] sm:$0xff]  ;;  %v10871_v36 = vld [vmem:[#allocation2 + $0x48] ss:$16 sps:$4 sm:$0xff]  }
  0x59   :  { %4861 = vmatprep.subr.bf16.mxu0 %v10825_v37  ;;  %v10886_v30 = vld [vmem:[#allocation2 + $0x400] ss:$16 sps:$4 sm:$0xff]   ;;  %v10888_v31 = vld [vmem:[#allocation2 + $0x404] ss:$16 sps:$4 sm:$0xff]   ;;  %v12056_v34 = vpack.c.bf16 %v120_v23, %v100_v22  ;;  %v12058_v35 = vpack.c.bf16 %v122_v25, %v102_v24  ;;  %v12060_v37 = vpack.c.bf16 %v161_v28, %v141_v27  ;;  %v243_v7 = vld [vmem:[%s15348_s0 + $0x5b8] sm:$0xff] }
  0x5a   :  { %v10891_v33 = vld [vmem:[#allocation2 + $0x424] ss:$16 sps:$4 sm:$0xff]   ;;  %v10880_v8 = vld [vmem:[#allocation2 + $0xa8] ss:$16 sps:$4 sm:$0xff]   ;;  %v10885_v9 = vld [vmem:[#allocation2 + $0xcc] ss:$16 sps:$4 sm:$0xff]   ;;  %v12134_v14 = vpack.c.bf16 %v243_v7, %v223_v6 }
  0x5b   :  { %4701 = vmatpush1.bf16.msra.mxu1 %v10827_v38  ;;  %v12062_v38 = vpack.c.bf16 %v163_v32, %v143_v29  ;;  %v10897_v49 = vld [vmem:[#allocation2 + $0x444] ss:$16 sps:$4 sm:$0xff]   ;;  %v10894_v23 = vld [vmem:[#allocation2 + $0xec] ss:$16 sps:$4 sm:$0xff]   ;;  %v10910_v24 = vld [vmem:[#allocation2 + $0x4a0] ss:$16 sps:$4 sm:$0xff]  }
  0x5c   :  { %4862 = vmatpush1.bf16.msra.mxu0 %v10828_v39  ;;  %4702 = vmatprep.subr.bf16.mxu1 %v10829_v40  ;;  %v10876_v39 = vld [vmem:[#allocation2 + $0x6c] ss:$16 sps:$4 sm:$0xff]   ;;  %v140_v40 = vld [vmem:[%s15348_s0 + $0x280] sm:$0xff]  ;;  %v222_v25 = vld [vmem:[%s15348_s0 + $0x510] sm:$0xff] }
  0x5d   :  { %4863 = vmatprep.subr.bf16.mxu0 %v10831_v41  ;;  %v160_v41 = vld [vmem:[%s15348_s0 + $0x320] sm:$0xff]  ;;  %v242_v27 = vld [vmem:[%s15348_s0 + $0x5b0] sm:$0xff]  ;;  %v261_v28 = vld [vmem:[%s15348_s0 + $0x648] sm:$0xff] }
  0x5e   :  { %v240_v22 = vld [vmem:[%s15348_s0 + $0x5a0] sm:$0xff]  ;;  %v281_v29 = vld [vmem:[%s15348_s0 + $0x6e8] sm:$0xff] }
  0x5f   :  { %4703 = vmatpush1.bf16.msra.mxu1 %v10833_v42  ;;  %v142_v42 = vld [vmem:[%s15348_s0 + $0x290] sm:$0xff]  ;;  %v10892_v32 = vld [vmem:[#allocation2 + $0xe8] ss:$16 sps:$4 sm:$0xff]   ;;  %v300_v7 = vld [vmem:[%s15348_s0 + $0x780] sm:$0xff] }
  0x60   :  { %4864 = vmatpush1.bf16.msra.mxu0 %v10834_v43  ;;  %4704 = vmatprep.subr.bf16.mxu1 %v10835_v44  ;;  %v162_v43 = vld [vmem:[%s15348_s0 + $0x330] sm:$0xff]  ;;  %v10874_v44 = vld [vmem:[#allocation2 + $0x68] ss:$16 sps:$4 sm:$0xff]  }
  0x61   :  { %4865 = vmatprep.subr.bf16.mxu0 %v10837_v45  ;;  %v10889_v45 = vld [vmem:[#allocation2 + $0x420] ss:$16 sps:$4 sm:$0xff]   ;;  %v10930_v6 = vld [vmem:[#allocation2 + $0x524] ss:$16 sps:$4 sm:$0xff]  }
  0x63   :  { %4705 = vmatpush1.bf16.msra.mxu1 %v10839_v50  ;;  %v203_v50 = vld [vmem:[%s15348_s0 + $0x478] sm:$0xff] }
  0x64   :  { %4866 = vmatpush1.bf16.msra.mxu0 %v10840_v51  ;;  %4706 = vmatprep.subr.bf16.mxu1 %v10841_v52  ;;  %v10879_v51 = vld [vmem:[#allocation2 + $0x8c] ss:$16 sps:$4 sm:$0xff]   ;;  %v10895_v52 = vld [vmem:[#allocation2 + $0x440] ss:$16 sps:$4 sm:$0xff]  }
  0x65   :  { %4867 = vmatprep.subr.bf16.mxu0 %v10843_v55  ;;  %v12092_v55 = vpack.c.bf16 %v160_v41, %v140_v40  ;;  %v12166_v40 = vpack.c.bf16 %v242_v27, %v222_v25  ;;  %v12168_v41 = vpack.c.bf16 %v281_v29, %v261_v28  ;;  %v363_v25 = vld [vmem:[%s15348_s0 + $0x978] sm:$0xff]  ;;  %v10934_v28 = vld [vmem:[#allocation2 + $0x540] ss:$16 sps:$4 sm:$0xff]  }
  0x66   :  { %v10933_v27 = vld [vmem:[#allocation2 + $0x18c] ss:$16 sps:$4 sm:$0xff]  }
  0x67   :  { %4707 = vmatpush1.bf16.msra.mxu1 %v10845_v56  ;;  %v12094_v56 = vpack.c.bf16 %v162_v43, %v142_v42  ;;  %v10901_v43 = vld [vmem:[#allocation2 + $0x108] ss:$16 sps:$4 sm:$0xff]  }
  0x68   :  { %4868 = vmatpush1.bf16.msra.mxu0 %v10846_v57  ;;  %4708 = vmatprep.subr.bf16.mxu1 %v10847_v58  ;;  %v12096_v57 = vpack.c.bf16 %v201_v47, %v181_v46  ;;  %v12098_v58 = vpack.c.bf16 %v203_v50, %v183_v48  ;;  %v280_v46 = vld [vmem:[%s15348_s0 + $0x6e0] sm:$0xff]  ;;  %v10909_v47 = vld [vmem:[#allocation2 + $0x12c] ss:$16 sps:$4 sm:$0xff]  }
  0x69   :  { %4869 = vmatprep.subr.bf16.mxu0 %v10849_v59  ;;  %v10877_v59 = vld [vmem:[#allocation2 + $0x88] ss:$16 sps:$4 sm:$0xff]   ;;  %v10919_v48 = vld [vmem:[#allocation2 + $0x4e0] ss:$16 sps:$4 sm:$0xff]   ;;  %v10924_v50 = vld [vmem:[#allocation2 + $0x504] ss:$16 sps:$4 sm:$0xff]  }
  0x6b   :  { %4709 = vmatpush1.bf16.msra.mxu1 %v10851_v60  ;;  %v10900_v60 = vld [vmem:[#allocation2 + $0x464] ss:$16 sps:$4 sm:$0xff]  }
  0x6c   :  { %4870 = vmatpush1.bf16.msra.mxu0 %v10852_v61  ;;  %4710 = vmatprep.subr.bf16.mxu1 %v10853_v62  ;;  %v180_v61 = vld [vmem:[%s15348_s0 + $0x3c0] sm:$0xff] }
  0x6d   :  { %4871 = vmatprep.subr.bf16.mxu0 %v10855_v63  ;;  %v200_v62 = vld [vmem:[%s15348_s0 + $0x460] sm:$0xff]  ;;  %v182_v63 = vld [vmem:[%s15348_s0 + $0x3d0] sm:$0xff] }
  0x6e   :  { %v12128_v11 = vpack.c.bf16 %v200_v62, %v180_v61  ;;  %v323_v61 = vld [vmem:[%s15348_s0 + $0x838] sm:$0xff] }
  0x6f   :  { %4711 = vmatpush1.bf16.msra.mxu1 %v10857_v0  ;;  %v202_v0 = vld [vmem:[%s15348_s0 + $0x470] sm:$0xff]  ;;  %v10907_v62 = vld [vmem:[#allocation2 + $0x128] ss:$16 sps:$4 sm:$0xff]  }
  0x70   :  { %4872 = vmatpush1.bf16.msra.mxu0 %v10858_v1  ;;  %4712 = vmatprep.subr.bf16.mxu1 %v10859_v2  ;;  %v10882_v1 = vld [vmem:[#allocation2 + $0xac] ss:$16 sps:$4 sm:$0xff]   ;;  %v10898_v2 = vld [vmem:[#allocation2 + $0x460] ss:$16 sps:$4 sm:$0xff]   ;;  %v12130_v12 = vpack.c.bf16 %v202_v0, %v182_v63 }
  0x71   :  { %4873 = vmatprep.subr.bf16.mxu0 %v10861_v3  ;;  %v221_v3 = vld [vmem:[%s15348_s0 + $0x508] sm:$0xff]  ;;  %v10922_v0 = vld [vmem:[#allocation2 + $0x500] ss:$16 sps:$4 sm:$0xff]  }
  0x72   :  { %v10918_v63 = vld [vmem:[#allocation2 + $0x14c] ss:$16 sps:$4 sm:$0xff]  }
  0x73   :  { %4713 = vmatpush1.bf16.msra.mxu1 %v10863_v4  ;;  %v10906_v4 = vld [vmem:[#allocation2 + $0x484] ss:$16 sps:$4 sm:$0xff]  }
  0x74   :  { %4874 = vmatpush1.bf16.msra.mxu0 %v10864_v5  ;;  %6292 = vmatprep.subr.bf16.mxu1 %v10867_v10  ;;  %v241_v5 = vld [vmem:[%s15348_s0 + $0x5a8] sm:$0xff]  ;;  %v10904_v10 = vld [vmem:[#allocation2 + $0x480] ss:$16 sps:$4 sm:$0xff]  }
  0x75   :  { %5004 = vmatprep.subr.bf16.mxu0 %v10888_v31  ;;  %v12132_v13 = vpack.c.bf16 %v241_v5, %v221_v3  ;;  %v283_v31 = vld [vmem:[%s15348_s0 + $0x6f8] sm:$0xff] }
  0x76   :  { %4715 = vmatmul.mubr.bf16.vlgmr.msra.gmra.mrb[0].mxu1 %v12020_v15  ;;  %v10916_v5 = vld [vmem:[#allocation2 + $0x148] ss:$16 sps:$4 sm:$0xff]  }
  0x77   :  { %4876 = vmatmul.mubr.bf16.vlgmr.msra.gmra.mrb[0].mxu0 %v12022_v16  ;;  %6293 = vmatpush1.bf16.msra.mxu1 %v10865_v17  ;;  %v10883_v17 = vld [vmem:[#allocation2 + $0xc8] ss:$16 sps:$4 sm:$0xff]  }
  0x78   :  { %4724 = vmatprep.mubr.bf16.mxu1 %v12024_v18  ;;  %4885 = vmatprep.mubr.bf16.mxu0 %v12026_v19 }
  0x79   :  { %6294 = vmatprep.subr.bf16.mxu1 %v10870_v20  ;;  %5005 = vmatpush1.bf16.msra.mxu0 %v10886_v30  ;;  %v10912_v20 = vld [vmem:[#allocation2 + $0x4a4] ss:$16 sps:$4 sm:$0xff]   ;;  %v263_v30 = vld [vmem:[%s15348_s0 + $0x658] sm:$0xff] }
  0x7a   :  { %5006 = vmatprep.subr.bf16.mxu0 %v10891_v33  ;;  %v10903_v33 = vld [vmem:[#allocation2 + $0x10c] ss:$16 sps:$4 sm:$0xff]   ;;  %v12170_v42 = vpack.c.bf16 %v283_v31, %v263_v30 }
  0x7b   :  { %6295 = vmatpush1.bf16.msra.mxu1 %v10868_v21  ;;  %v220_v21 = vld [vmem:[%s15348_s0 + $0x500] sm:$0xff] }
  0x7c   :  { %6296 = vmatprep.subr.bf16.mxu1 %v10873_v26  ;;  %v10915_v26 = vld [vmem:[#allocation2 + $0x4c4] ss:$16 sps:$4 sm:$0xff]  }
  0x7d   :  { %5007 = vmatpush1.bf16.msra.mxu0 %v10889_v45  ;;  %v260_v45 = vld [vmem:[%s15348_s0 + $0x640] sm:$0xff] }
  0x7e   :  { %4725 = vmatmul.mubr.bf16.gmra.mrb[4].mxu1 %v12056_v34  ;;  %5008 = vmatprep.subr.bf16.mxu0 %v10897_v49  ;;  %v262_v49 = vld [vmem:[%s15348_s0 + $0x650] sm:$0xff] }
  0x7f   :  { %4886 = vmatmul.mubr.bf16.gmra.mrb[4].mxu0 %v12058_v35  ;;  %6297 = vmatpush1.bf16.msra.mxu1 %v10871_v36  ;;  %v10913_v36 = vld [vmem:[#allocation2 + $0x4c0] ss:$16 sps:$4 sm:$0xff]  }
  0x80   :  { %4734 = vmatprep.mubr.bf16.mxu1 %v12060_v37  ;;  %4895 = vmatprep.mubr.bf16.mxu0 %v12062_v38 }
  0x81   :  { %6298 = vmatprep.subr.bf16.mxu1 %v10876_v39  ;;  %5009 = vmatpush1.bf16.msra.mxu0 %v10895_v52  ;;  %v12164_v39 = vpack.c.bf16 %v240_v22, %v220_v21  ;;  %v301_v52 = vld [vmem:[%s15348_s0 + $0x788] sm:$0xff]  ;;  %v10936_v22 = vld [vmem:[#allocation2 + $0x544] ss:$16 sps:$4 sm:$0xff]  }
  0x82   :  { %5010 = vmatprep.subr.bf16.mxu0 %v10900_v60  ;;  %v303_v60 = vld [vmem:[%s15348_s0 + $0x798] sm:$0xff]  ;;  %v341_v21 = vld [vmem:[%s15348_s0 + $0x8c8] sm:$0xff] }
  0x83   :  { %6299 = vmatpush1.bf16.msra.mxu1 %v10874_v44  ;;  %v10921_v44 = vld [vmem:[#allocation2 + $0x4e4] ss:$16 sps:$4 sm:$0xff]  }
  0x84   :  { %6300 = vmatprep.subr.bf16.mxu1 %v10879_v51  ;;  %v282_v51 = vld [vmem:[%s15348_s0 + $0x6f0] sm:$0xff] }
  0x85   :  { %5011 = vmatpush1.bf16.msra.mxu0 %v10898_v2  ;;  %v12202_v2 = vpack.c.bf16 %v282_v51, %v262_v49  ;;  %v381_v49 = vld [vmem:[%s15348_s0 + $0xa08] sm:$0xff]  ;;  %v383_v51 = vld [vmem:[%s15348_s0 + $0xa18] sm:$0xff] }
  0x86   :  { %4735 = vmatmul.mubr.bf16.gmra.mrb[8].mxu1 %v12092_v55  ;;  %5012 = vmatprep.subr.bf16.mxu0 %v10906_v4  ;;  %v12206_v4 = vpack.c.bf16 %v323_v61, %v303_v60  ;;  %v10940_v60 = vld [vmem:[#allocation2 + $0x1a8] ss:$16 sps:$4 sm:$0xff]   ;;  %v10943_v61 = vld [vmem:[#allocation2 + $0x580] ss:$16 sps:$4 sm:$0xff]  }
  0x87   :  { %4896 = vmatmul.mubr.bf16.gmra.mrb[8].mxu0 %v12094_v56  ;;  %4744 = vmatprep.mubr.bf16.mxu1 %v12096_v57 }
  0x88   :  { %4905 = vmatprep.mubr.bf16.mxu0 %v12098_v58  ;;  %6301 = vmatpush1.bf16.msra.mxu1 %v10877_v59  ;;  %v321_v59 = vld [vmem:[%s15348_s0 + $0x828] sm:$0xff] }
  0x89   :  { %6302 = vmatprep.subr.bf16.mxu1 %v10882_v1  ;;  %5013 = vmatpush1.bf16.msra.mxu0 %v10904_v10  ;;  %v12200_v1 = vpack.c.bf16 %v280_v46, %v260_v45  ;;  %v12204_v3 = vpack.c.bf16 %v321_v59, %v301_v52  ;;  %v10927_v10 = vld [vmem:[#allocation2 + $0x16c] ss:$16 sps:$4 sm:$0xff]   ;;  %v342_v45 = vld [vmem:[%s15348_s0 + $0x8d0] sm:$0xff] }
  0x8a   :  { %5014 = vmatprep.subr.bf16.mxu0 %v10912_v20  ;;  %v322_v20 = vld [vmem:[%s15348_s0 + $0x830] sm:$0xff]  ;;  %v403_v59 = vld [vmem:[%s15348_s0 + $0xab8] sm:$0xff] }
  0x8b   :  { %v362_v46 = vld [vmem:[%s15348_s0 + $0x970] sm:$0xff] }
  0x8c   :  { %6303 = vmatpush1.bf16.msra.mxu1 %v10880_v8  ;;  %v320_v8 = vld [vmem:[%s15348_s0 + $0x820] sm:$0xff] }
  0x8d   :  { %6304 = vmatprep.subr.bf16.mxu1 %v10885_v9  ;;  %5015 = vmatpush1.bf16.msra.mxu0 %v10910_v24  ;;  %v302_v9 = vld [vmem:[%s15348_s0 + $0x790] sm:$0xff]  ;;  %v343_v24 = vld [vmem:[%s15348_s0 + $0x8d8] sm:$0xff]  ;;  %v12236_v29 = vpack.c.bf16 %v320_v8, %v300_v7 }
  0x8e   :  { %4745 = vmatmul.mubr.bf16.gmra.mrb[12].mxu1 %v12128_v11  ;;  %5016 = vmatprep.subr.bf16.mxu0 %v10915_v26  ;;  %v10925_v26 = vld [vmem:[#allocation2 + $0x168] ss:$16 sps:$4 sm:$0xff]   ;;  %v12238_v30 = vpack.c.bf16 %v322_v20, %v302_v9  ;;  %v10945_v52 = vld [vmem:[#allocation2 + $0x584] ss:$16 sps:$4 sm:$0xff]   ;;  %v10949_v8 = vld [vmem:[#allocation2 + $0x5a0] ss:$16 sps:$4 sm:$0xff]  }
  0x8f   :  { %4906 = vmatmul.mubr.bf16.gmra.mrb[12].mxu0 %v12130_v12  ;;  %4754 = vmatprep.mubr.bf16.mxu1 %v12132_v13  ;;  %v10946_v7 = vld [vmem:[#allocation2 + $0x1c8] ss:$16 sps:$4 sm:$0xff]   ;;  %v10951_v9 = vld [vmem:[#allocation2 + $0x5a4] ss:$16 sps:$4 sm:$0xff]  }
  0x90   :  { %4915 = vmatprep.mubr.bf16.mxu0 %v12134_v14  ;;  %6305 = vmatpush1.bf16.msra.mxu1 %v10883_v17  ;;  %v10928_v17 = vld [vmem:[#allocation2 + $0x520] ss:$16 sps:$4 sm:$0xff]  }
  0x91   :  { %6306 = vmatprep.subr.bf16.mxu1 %v10894_v23  ;;  %5017 = vmatpush1.bf16.msra.mxu0 %v10913_v36  ;;  %v361_v23 = vld [vmem:[%s15348_s0 + $0x968] sm:$0xff]  ;;  %v10939_v36 = vld [vmem:[#allocation2 + $0x564] ss:$16 sps:$4 sm:$0xff]  }
  0x92   :  { %5018 = vmatprep.subr.bf16.mxu0 %v10921_v44  ;;  %v12240_v31 = vpack.c.bf16 %v361_v23, %v341_v21  ;;  %v360_v44 = vld [vmem:[%s15348_s0 + $0x960] sm:$0xff]  ;;  %v382_v20 = vld [vmem:[%s15348_s0 + $0xa10] sm:$0xff]  ;;  %v10957_v21 = vld [vmem:[#allocation2 + $0x1ec] ss:$16 sps:$4 sm:$0xff]  }
  0x93   :  { %v421_v23 = vld [vmem:[%s15348_s0 + $0xb48] sm:$0xff] }
  0x94   :  { %6307 = vmatpush1.bf16.msra.mxu1 %v10892_v32  ;;  %v12242_v32 = vpack.c.bf16 %v363_v25, %v343_v24  ;;  %v10954_v24 = vld [vmem:[#allocation2 + $0x5c4] ss:$16 sps:$4 sm:$0xff]   ;;  %v441_v25 = vld [vmem:[%s15348_s0 + $0xbe8] sm:$0xff] }
  0x95   :  { %6308 = vmatprep.subr.bf16.mxu1 %v10903_v33  ;;  %5019 = vmatpush1.bf16.msra.mxu0 %v10919_v48  ;;  %v10931_v33 = vld [vmem:[#allocation2 + $0x188] ss:$16 sps:$4 sm:$0xff]   ;;  %v10942_v48 = vld [vmem:[#allocation2 + $0x1ac] ss:$16 sps:$4 sm:$0xff]  }
  0x96   :  { %4755 = vmatmul.mubr.bf16.gmra.mrb[16].mxu1 %v12164_v39  ;;  %5020 = vmatprep.subr.bf16.mxu0 %v10924_v50  ;;  %v401_v50 = vld [vmem:[%s15348_s0 + $0xaa8] sm:$0xff] }
  0x97   :  { %4916 = vmatmul.mubr.bf16.gmra.mrb[16].mxu0 %v12166_v40  ;;  %4764 = vmatprep.mubr.bf16.mxu1 %v12168_v41 }
  0x98   :  { %4925 = vmatprep.mubr.bf16.mxu0 %v12170_v42  ;;  %6309 = vmatpush1.bf16.msra.mxu1 %v10901_v43  ;;  %v340_v43 = vld [vmem:[%s15348_s0 + $0x8c0] sm:$0xff] }
  0x99   :  { %6310 = vmatprep.subr.bf16.mxu1 %v10909_v47  ;;  %5021 = vmatpush1.bf16.msra.mxu0 %v10922_v0  ;;  %v10937_v47 = vld [vmem:[#allocation2 + $0x560] ss:$16 sps:$4 sm:$0xff]   ;;  %v12274_v0 = vpack.c.bf16 %v362_v46, %v342_v45  ;;  %v12312_v45 = vpack.c.bf16 %v441_v25, %v421_v23  ;;  %v521_v25 = vld [vmem:[%s15348_s0 + $0xe68] sm:$0xff] }
  0x9a   :  { %5022 = vmatprep.subr.bf16.mxu0 %v10930_v6  ;;  %v12278_v6 = vpack.c.bf16 %v403_v59, %v383_v51  ;;  %v422_v51 = vld [vmem:[%s15348_s0 + $0xb50] sm:$0xff]  ;;  %v461_v59 = vld [vmem:[%s15348_s0 + $0xc88] sm:$0xff] }
  0x9b   :  { %v482_v23 = vld [vmem:[%s15348_s0 + $0xd30] sm:$0xff] }
  0x9c   :  { %6311 = vmatpush1.bf16.msra.mxu1 %v10907_v62  ;;  %v10948_v62 = vld [vmem:[#allocation2 + $0x1cc] ss:$16 sps:$4 sm:$0xff]  }
  0x9d   :  { %6312 = vmatprep.subr.bf16.mxu1 %v10918_v63  ;;  %5023 = vmatpush1.bf16.msra.mxu0 %v10928_v17  ;;  %v12272_v63 = vpack.c.bf16 %v360_v44, %v340_v43  ;;  %v400_v17 = vld [vmem:[%s15348_s0 + $0xaa0] sm:$0xff] }
  0x9e   :  { %4765 = vmatmul.mubr.bf16.gmra.mrb[20].mxu1 %v12200_v1  ;;  %5024 = vmatprep.subr.bf16.mxu0 %v10936_v22  ;;  %v402_v22 = vld [vmem:[%s15348_s0 + $0xab0] sm:$0xff] }
  0x9f   :  { %4926 = vmatmul.mubr.bf16.gmra.mrb[20].mxu0 %v12202_v2  ;;  %4774 = vmatprep.mubr.bf16.mxu1 %v12204_v3  ;;  %v12310_v44 = vpack.c.bf16 %v402_v22, %v382_v20  ;;  %v460_v20 = vld [vmem:[%s15348_s0 + $0xc80] sm:$0xff]  ;;  %v462_v22 = vld [vmem:[%s15348_s0 + $0xc90] sm:$0xff] }
  0xa0   :  { %4935 = vmatprep.mubr.bf16.mxu0 %v12206_v4  ;;  %6313 = vmatpush1.bf16.msra.mxu1 %v10916_v5  ;;  %v12276_v5 = vpack.c.bf16 %v401_v50, %v381_v49  ;;  %v10958_v49 = vld [vmem:[#allocation2 + $0x5e0] ss:$16 sps:$4 sm:$0xff]  }
  0xa1   :  { %6314 = vmatprep.subr.bf16.mxu1 %v10927_v10  ;;  %5025 = vmatpush1.bf16.msra.mxu0 %v10934_v28  ;;  %v380_v10 = vld [vmem:[%s15348_s0 + $0xa00] sm:$0xff]  ;;  %v10955_v28 = vld [vmem:[#allocation2 + $0x1e8] ss:$16 sps:$4 sm:$0xff]  }
  0xa2   :  { %5026 = vmatprep.subr.bf16.mxu0 %v10939_v36  ;;  %v10963_v36 = vld [vmem:[#allocation2 + $0x20c] ss:$16 sps:$4 sm:$0xff]   ;;  %v12308_v43 = vpack.c.bf16 %v400_v17, %v380_v10  ;;  %v440_v50 = vld [vmem:[%s15348_s0 + $0xbe0] sm:$0xff] }
  0xa3   :  { %v10984_v17 = vld [vmem:[#allocation2 + $0x604] ss:$16 sps:$4 sm:$0xff]  }
  0xa4   :  { %6315 = vmatpush1.bf16.msra.mxu1 %v10925_v26  ;;  %v423_v26 = vld [vmem:[%s15348_s0 + $0xb58] sm:$0xff] }
  0xa5   :  { %6316 = vmatprep.subr.bf16.mxu1 %v10933_v27  ;;  %5027 = vmatpush1.bf16.msra.mxu0 %v10937_v47  ;;  %v443_v27 = vld [vmem:[%s15348_s0 + $0xbf8] sm:$0xff]  ;;  %v10960_v47 = vld [vmem:[#allocation2 + $0x5e4] ss:$16 sps:$4 sm:$0xff]  }
  0xa6   :  { %4775 = vmatmul.mubr.bf16.gmra.mrb[24].mxu1 %v12236_v29  ;;  %5028 = vmatprep.subr.bf16.mxu0 %v10945_v52  ;;  %v12314_v46 = vpack.c.bf16 %v443_v27, %v423_v26  ;;  %v442_v52 = vld [vmem:[%s15348_s0 + $0xbf0] sm:$0xff]  ;;  %v503_v26 = vld [vmem:[%s15348_s0 + $0xdd8] sm:$0xff] }
  0xa7   :  { %4936 = vmatmul.mubr.bf16.gmra.mrb[24].mxu0 %v12238_v30  ;;  %4784 = vmatprep.mubr.bf16.mxu1 %v12240_v31  ;;  %v523_v27 = vld [vmem:[%s15348_s0 + $0xe78] sm:$0xff] }
  0xa8   :  { %4945 = vmatprep.mubr.bf16.mxu0 %v12242_v32  ;;  %6317 = vmatpush1.bf16.msra.mxu1 %v10931_v33  ;;  %v10952_v33 = vld [vmem:[#allocation2 + $0x5c0] ss:$16 sps:$4 sm:$0xff]  }
  0xa9   :  { %6318 = vmatprep.subr.bf16.mxu1 %v10942_v48  ;;  %5029 = vmatpush1.bf16.msra.mxu0 %v10943_v61  ;;  %v420_v48 = vld [vmem:[%s15348_s0 + $0xb40] sm:$0xff]  ;;  %v463_v61 = vld [vmem:[%s15348_s0 + $0xc98] sm:$0xff] }
  0xaa   :  { %5030 = vmatprep.subr.bf16.mxu0 %v10951_v9 }
  0xac   :  { %6319 = vmatpush1.bf16.msra.mxu1 %v10940_v60  ;;  %v481_v60 = vld [vmem:[%s15348_s0 + $0xd28] sm:$0xff] }
  0xad   :  { %6320 = vmatprep.subr.bf16.mxu1 %v10948_v62  ;;  %5031 = vmatpush1.bf16.msra.mxu0 %v10949_v8  ;;  %v483_v62 = vld [vmem:[%s15348_s0 + $0xd38] sm:$0xff]  ;;  %v12346_v8 = vpack.c.bf16 %v442_v52, %v422_v51  ;;  %v12348_v9 = vpack.c.bf16 %v481_v60, %v461_v59  ;;  %v522_v51 = vld [vmem:[%s15348_s0 + $0xe70] sm:$0xff]  ;;  %v541_v52 = vld [vmem:[%s15348_s0 + $0xf08] sm:$0xff] }
  0xae   :  { %4785 = vmatmul.mubr.bf16.gmra.mrb[28].mxu1 %v12272_v63  ;;  %5032 = vmatprep.subr.bf16.mxu0 %v10954_v24  ;;  %v12350_v10 = vpack.c.bf16 %v483_v62, %v463_v61  ;;  %v501_v24 = vld [vmem:[%s15348_s0 + $0xdc8] sm:$0xff]  ;;  %v543_v59 = vld [vmem:[%s15348_s0 + $0xf18] sm:$0xff]  ;;  %v12414_v62 = vpack.c.bf16 %v541_v52, %v541_v52 }
  0xaf   :  { %4946 = vmatmul.mubr.bf16.gmra.mrb[28].mxu0 %v12274_v0  ;;  %4794 = vmatprep.mubr.bf16.mxu1 %v12276_v5  ;;  %v10961_v52 = vld [vmem:[#allocation2 + $0x208] ss:$16 sps:$4 sm:$0xff]  }
  0xb0   :  { %4955 = vmatprep.mubr.bf16.mxu0 %v12278_v6  ;;  %6321 = vmatpush1.bf16.msra.mxu1 %v10946_v7  ;;  %v12344_v7 = vpack.c.bf16 %v440_v50, %v420_v48  ;;  %v500_v48 = vld [vmem:[%s15348_s0 + $0xdc0] sm:$0xff]  ;;  %v502_v50 = vld [vmem:[%s15348_s0 + $0xdd0] sm:$0xff] }
  0xb1   :  { %6322 = vmatprep.subr.bf16.mxu1 %v10957_v21  ;;  %5033 = vmatpush1.bf16.msra.mxu0 %v10952_v33  ;;  %v480_v21 = vld [vmem:[%s15348_s0 + $0xd20] sm:$0xff]  ;;  %v12382_v33 = vpack.c.bf16 %v482_v23, %v462_v22  ;;  %v12412_v61 = vpack.c.bf16 %v522_v51, %v502_v50  ;;  %v65_v22 = vld [vmem:[%s15348_s0 + $0x28] sm:$0xff] }
  0xb2   :  { %5034 = vmatprep.subr.bf16.mxu0 %v10960_v47  ;;  %v12386_v47 = vpack.c.bf16 %v523_v27, %v503_v26  ;;  %v85_v23 = vld [vmem:[%s15348_s0 + $0xc8] sm:$0xff]  ;;  %v64_v27 = vld [vmem:[%s15348_s0 + $0x20] sm:$0xff] }
  0xb3   :  { %v12438_v26 = vpack.c.bf16 %v85_v23, %v65_v22  ;;  %v125_v50 = vld [vmem:[%s15348_s0 + $0x208] sm:$0xff]  ;;  %v10982_v22 = vld [vmem:[#allocation2 + $0x600] ss:$16 sps:$4 sm:$0xff]   ;;  %v10987_v23 = vld [vmem:[#allocation2 + $0x624] ss:$16 sps:$4 sm:$0xff]  }
  0xb4   :  { %6323 = vmatpush1.bf16.msra.mxu1 %v10955_v28  ;;  %v12380_v28 = vpack.c.bf16 %v480_v21, %v460_v20  ;;  %v540_v20 = vld [vmem:[%s15348_s0 + $0xf00] sm:$0xff]  ;;  %v542_v21 = vld [vmem:[%s15348_s0 + $0xf10] sm:$0xff] }
  0xb5   :  { %6453 = vmatprep.subr.bf16.mxu1 %v10963_v36  ;;  %5035 = vmatpush1.bf16.msra.mxu0 %v10958_v49  ;;  %v12384_v36 = vpack.c.bf16 %v521_v25, %v501_v24  ;;  %v520_v49 = vld [vmem:[%s15348_s0 + $0xe60] sm:$0xff]  ;;  %v12434_v24 = vpack.c.bf16 %v540_v20, %v540_v20  ;;  %v12436_v25 = vpack.c.bf16 %v542_v21, %v542_v21  ;;  %v10966_v20 = vld [vmem:[#allocation2 + $0x22c] ss:$16 sps:$4 sm:$0xff]   ;;  %v10964_v21 = vld [vmem:[#allocation2 + $0x228] ss:$16 sps:$4 sm:$0xff]  }
  0xb6   :  { %4795 = vmatmul.mubr.bf16.gmra.mrb[32].mxu1 %v12308_v43  ;;  %5165 = vmatprep.subr.bf16.mxu0 %v10984_v17  ;;  %v12410_v60 = vpack.c.bf16 %v520_v49, %v500_v48  ;;  %v12416_v17 = vpack.c.bf16 %v543_v59, %v543_v59  ;;  %15379 = vst [vmem:[#allocation9_spill] sm:$0xff] %v12438_v26  ;;  %v84_v48 = vld [vmem:[%s15348_s0 + $0xc0] sm:$0xff]  ;;  %v105_v49 = vld [vmem:[%s15348_s0 + $0x168] sm:$0xff] }
  0xb7   :  { %4956 = vmatmul.mubr.bf16.gmra.mrb[32].mxu0 %v12310_v44  ;;  %4804 = vmatprep.mubr.bf16.mxu1 %v12312_v45  ;;  %v12456_v51 = vpack.c.bf16 %v84_v48, %v64_v27  ;;  %v12458_v59 = vpack.c.bf16 %v125_v50, %v105_v49  ;;  %v124_v27 = vld [vmem:[%s15348_s0 + $0x200] sm:$0xff]  ;;  %v10969_v48 = vld [vmem:[#allocation2 + $0x24c] ss:$16 sps:$4 sm:$0xff]  }
  0xb8   :  { %4965 = vmatprep.mubr.bf16.mxu0 %v12314_v46  ;;  %v165_v49 = vld [vmem:[%s15348_s0 + $0x348] sm:$0xff]  ;;  %v10985_v50 = vld [vmem:[#allocation2 + $0x620] ss:$16 sps:$4 sm:$0xff]  }
  0xb9   :  { %15380 = vst [vmem:[#allocation10_spill] sm:$0xff] %v12456_v51  ;;  %15381 = vst [vmem:[#allocation11_spill] sm:$0xff] %v12458_v59 }
  0xbe   :  { %4805 = vmatmul.mubr.bf16.gmra.mrb[36].mxu1 %v12344_v7 }
  0xbf   :  { %4966 = vmatmul.mubr.bf16.gmra.mrb[36].mxu0 %v12346_v8  ;;  %4814 = vmatprep.mubr.bf16.mxu1 %v12348_v9 }
  0xc0   :  { %4975 = vmatprep.mubr.bf16.mxu0 %v12350_v10 }
  0xc6   :  { %4815 = vmatmul.mubr.bf16.gmra.mrb[40].mxu1 %v12380_v28 }
  0xc7   :  { %4976 = vmatmul.mubr.bf16.gmra.mrb[40].mxu0 %v12382_v33  ;;  %4824 = vmatprep.mubr.bf16.mxu1 %v12384_v36 }
  0xc8   :  { %4985 = vmatprep.mubr.bf16.mxu0 %v12386_v47 }
  0xce   :  { %4825 = vmatmul.mubr.bf16.gmra.mrb[44].mxu1 %v12410_v60 }
  0xcf   :  { %4986 = vmatmul.mubr.bf16.gmra.mrb[44].mxu0 %v12412_v61  ;;  %4834 = vmatprep.mubr.bf16.mxu1 %v12414_v62 }
  0xd0   :  { %4995 = vmatprep.mubr.bf16.mxu0 %v12416_v17 }
  0xd6   :  { %4835 = vmatmul.mubr.bf16.gmra.mrb[48].mxu1 %v12434_v24 }
  0xd7   :  { %4996 = vmatmul.mubr.bf16.gmra.mrb[48].mxu0 %v12436_v25  ;;  %6324 = vmatprep.mubr.bf16.mxu1 %v11990_v53  ;;  %v104_v53 = vld [vmem:[%s15348_s0 + $0x160] sm:$0xff] }
  0xd8   :  { %5036 = vmatprep.mubr.bf16.mxu0 %v12438_v26  ;;  %v164_v26 = vld [vmem:[%s15348_s0 + $0x340] sm:$0xff] }
  0xde   :  { %6325 = vmatmul.mubr.bf16.vlgmr.msra.gmra.mrb[52].mxu1 %v12020_v15  ;;  %v145_v15 = vld [vmem:[%s15348_s0 + $0x2a8] sm:$0xff] }
  0xdf   :  { %5037 = vmatmul.mubr.bf16.vlgmr.msra.gmra.mrb[0].mxu0 %v12456_v51  ;;  %6454 = vmatpush1.bf16.msra.mxu1 %v10961_v52  ;;  %v12476_v52 = vpack.c.bf16 %v124_v27, %v104_v53  ;;  %v12478_v51 = vpack.c.bf16 %v165_v49, %v145_v15  ;;  %v10970_v53 = vld [vmem:[#allocation2 + $0x268] ss:$16 sps:$4 sm:$0xff]   ;;  %v10996_v27 = vld [vmem:[#allocation2 + $0x664] ss:$16 sps:$4 sm:$0xff]   ;;  %v10975_v15 = vld [vmem:[#allocation2 + $0x28c] ss:$16 sps:$4 sm:$0xff]  }
  0xe0   :  { %5046 = vmatprep.mubr.bf16.mxu0 %v12458_v59  ;;  %6334 = vmatprep.mubr.bf16.mxu1 %v12024_v18  ;;  %v10967_v59 = vld [vmem:[#allocation2 + $0x248] ss:$16 sps:$4 sm:$0xff]   ;;  %v10972_v18 = vld [vmem:[#allocation2 + $0x26c] ss:$16 sps:$4 sm:$0xff]  }
  0xe1   :  { %6455 = vmatprep.subr.bf16.mxu1 %v10966_v20  ;;  %5166 = vmatpush1.bf16.msra.mxu0 %v10982_v22  ;;  %15382 = vst [vmem:[#allocation12_spill] sm:$0xff] %v12476_v52  ;;  %15383 = vst [vmem:[#allocation13_spill] sm:$0xff] %v12478_v51  ;;  %v144_v20 = vld [vmem:[%s15348_s0 + $0x2a0] sm:$0xff]  ;;  %v10973_v49 = vld [vmem:[#allocation2 + $0x288] ss:$16 sps:$4 sm:$0xff]  }
  0xe2   :  { %5167 = vmatprep.subr.bf16.mxu0 %v10987_v23  ;;  %v10993_v22 = vld [vmem:[#allocation2 + $0x644] ss:$16 sps:$4 sm:$0xff]   ;;  %v185_v23 = vld [vmem:[%s15348_s0 + $0x3e8] sm:$0xff] }
  0xe3   :  { %6456 = vmatpush1.bf16.msra.mxu1 %v10964_v21  ;;  %v10991_v21 = vld [vmem:[#allocation2 + $0x640] ss:$16 sps:$4 sm:$0xff]  }
  0xe4   :  { %6457 = vmatprep.subr.bf16.mxu1 %v10969_v48  ;;  %v205_v48 = vld [vmem:[%s15348_s0 + $0x488] sm:$0xff] }
  0xe5   :  { %5168 = vmatpush1.bf16.msra.mxu0 %v10985_v50  ;;  %v10978_v50 = vld [vmem:[#allocation2 + $0x2ac] ss:$16 sps:$4 sm:$0xff]  }
  0xe6   :  { %6335 = vmatmul.mubr.bf16.gmra.mrb[56].mxu1 %v12056_v34  ;;  %5169 = vmatprep.subr.bf16.mxu0 %v10993_v22  ;;  %v12496_v34 = vpack.c.bf16 %v164_v26, %v144_v20  ;;  %v204_v26 = vld [vmem:[%s15348_s0 + $0x480] sm:$0xff]  ;;  %v10976_v20 = vld [vmem:[#allocation2 + $0x2a8] ss:$16 sps:$4 sm:$0xff]  }
  0xe7   :  { %5047 = vmatmul.mubr.bf16.gmra.mrb[4].mxu0 %v12476_v52  ;;  %6458 = vmatpush1.bf16.msra.mxu1 %v10967_v59  ;;  %v12498_v59 = vpack.c.bf16 %v205_v48, %v185_v23  ;;  %v11002_v52 = vld [vmem:[#allocation2 + $0x684] ss:$16 sps:$4 sm:$0xff]   ;;  %v11000_v22 = vld [vmem:[#allocation2 + $0x680] ss:$16 sps:$4 sm:$0xff]  }
  0xe8   :  { %5056 = vmatprep.mubr.bf16.mxu0 %v12478_v51  ;;  %6344 = vmatprep.mubr.bf16.mxu1 %v12060_v37  ;;  %v10994_v51 = vld [vmem:[#allocation2 + $0x660] ss:$16 sps:$4 sm:$0xff]  }
  0xe9   :  { %6459 = vmatprep.subr.bf16.mxu1 %v10972_v18  ;;  %5170 = vmatpush1.bf16.msra.mxu0 %v10991_v21  ;;  %v184_v37 = vld [vmem:[%s15348_s0 + $0x3e0] sm:$0xff]  ;;  %v225_v18 = vld [vmem:[%s15348_s0 + $0x528] sm:$0xff] }
  0xea   :  { %5171 = vmatprep.subr.bf16.mxu0 %v10996_v27  ;;  %v10981_v21 = vld [vmem:[#allocation2 + $0x2cc] ss:$16 sps:$4 sm:$0xff]   ;;  %v12516_v23 = vpack.c.bf16 %v204_v26, %v184_v37  ;;  %v11006_v48 = vld [vmem:[#allocation2 + $0x6a0] ss:$16 sps:$4 sm:$0xff]   ;;  %v10988_v26 = vld [vmem:[#allocation2 + $0x2e8] ss:$16 sps:$4 sm:$0xff]  }
  0xeb   :  { %6460 = vmatpush1.bf16.msra.mxu1 %v10970_v53  ;;  %v11008_v53 = vld [vmem:[#allocation2 + $0x6a4] ss:$16 sps:$4 sm:$0xff]   ;;  %v285_v37 = vld [vmem:[%s15348_s0 + $0x708] sm:$0xff] }
  0xec   :  { %6461 = vmatprep.subr.bf16.mxu1 %v10975_v15  ;;  %15384 = vst [vmem:[#allocation14_spill] sm:$0xff] %v12516_v23  ;;  %v224_v15 = vld [vmem:[%s15348_s0 + $0x520] sm:$0xff] }
  0xed   :  { %5172 = vmatpush1.bf16.msra.mxu0 %v10994_v51  ;;  %v244_v51 = vld [vmem:[%s15348_s0 + $0x5c0] sm:$0xff] }
  0xee   :  { %6345 = vmatmul.mubr.bf16.gmra.mrb[60].mxu1 %v12092_v55  ;;  %v245_v55 = vld [vmem:[%s15348_s0 + $0x5c8] sm:$0xff]  ;;  %5173 = vmatprep.subr.bf16.mxu0 %v11002_v52  ;;  %v11011_v52 = vld [vmem:[#allocation2 + $0x6c4] ss:$16 sps:$4 sm:$0xff]  }
  0xef   :  { %5057 = vmatmul.mubr.bf16.gmra.mrb[8].mxu0 %v12496_v34  ;;  %6354 = vmatprep.mubr.bf16.mxu1 %v12096_v57  ;;  %v12518_v27 = vpack.c.bf16 %v245_v55, %v225_v18  ;;  %v10979_v57 = vld [vmem:[#allocation2 + $0x2c8] ss:$16 sps:$4 sm:$0xff]   ;;  %v10999_v18 = vld [vmem:[#allocation2 + $0x30c] ss:$16 sps:$4 sm:$0xff]   ;;  %v11009_v55 = vld [vmem:[#allocation2 + $0x6c0] ss:$16 sps:$4 sm:$0xff]  }
  0xf0   :  { %5066 = vmatprep.mubr.bf16.mxu0 %v12498_v59  ;;  %6462 = vmatpush1.bf16.msra.mxu1 %v10973_v49  ;;  %v10990_v49 = vld [vmem:[#allocation2 + $0x2ec] ss:$16 sps:$4 sm:$0xff]  }
  0xf1   :  { %6463 = vmatprep.subr.bf16.mxu1 %v10978_v50  ;;  %5174 = vmatpush1.bf16.msra.mxu0 %v11000_v22  ;;  %v265_v50 = vld [vmem:[%s15348_s0 + $0x668] sm:$0xff] }
  0xf2   :  { %5175 = vmatprep.subr.bf16.mxu0 %v11008_v53  ;;  %v12538_v22 = vpack.c.bf16 %v285_v37, %v265_v50  ;;  %v11005_v53 = vld [vmem:[#allocation2 + $0x32c] ss:$16 sps:$4 sm:$0xff]   ;;  %v11026_v50 = vld [vmem:[#allocation2 + $0x724] ss:$16 sps:$4 sm:$0xff]  }
  0xf4   :  { %6464 = vmatpush1.bf16.msra.mxu1 %v10976_v20  ;;  %v12536_v20 = vpack.c.bf16 %v244_v51, %v224_v15  ;;  %v305_v15 = vld [vmem:[%s15348_s0 + $0x7a8] sm:$0xff] }
  0xf5   :  { %6465 = vmatprep.subr.bf16.mxu1 %v10981_v21  ;;  %5176 = vmatpush1.bf16.msra.mxu0 %v11006_v48  ;;  %v10997_v21 = vld [vmem:[#allocation2 + $0x308] ss:$16 sps:$4 sm:$0xff]   ;;  %v284_v48 = vld [vmem:[%s15348_s0 + $0x700] sm:$0xff] }
  0xf6   :  { %6355 = vmatmul.mubr.bf16.gmra.mrb[64].mxu1 %v12128_v11  ;;  %5177 = vmatprep.subr.bf16.mxu0 %v11011_v52  ;;  %v11017_v11 = vld [vmem:[#allocation2 + $0x6e4] ss:$16 sps:$4 sm:$0xff]   ;;  %v11003_v51 = vld [vmem:[#allocation2 + $0x328] ss:$16 sps:$4 sm:$0xff]   ;;  %v11018_v52 = vld [vmem:[#allocation2 + $0x700] ss:$16 sps:$4 sm:$0xff]  }
  0xf7   :  { %5067 = vmatmul.mubr.bf16.gmra.mrb[12].mxu0 %v12516_v23  ;;  %6364 = vmatprep.mubr.bf16.mxu1 %v12132_v13  ;;  %v11015_v23 = vld [vmem:[#allocation2 + $0x6e0] ss:$16 sps:$4 sm:$0xff]   ;;  %v11020_v13 = vld [vmem:[#allocation2 + $0x704] ss:$16 sps:$4 sm:$0xff]  }
  0xf8   :  { %5076 = vmatprep.mubr.bf16.mxu0 %v12518_v27  ;;  %6466 = vmatpush1.bf16.msra.mxu1 %v10979_v57  ;;  %v264_v57 = vld [vmem:[%s15348_s0 + $0x660] sm:$0xff] }
  0xf9   :  { %6467 = vmatprep.subr.bf16.mxu1 %v10990_v49  ;;  %5178 = vmatpush1.bf16.msra.mxu0 %v11009_v55  ;;  %v11014_v49 = vld [vmem:[#allocation2 + $0x34c] ss:$16 sps:$4 sm:$0xff]   ;;  %v12556_v37 = vpack.c.bf16 %v284_v48, %v264_v57  ;;  %v304_v55 = vld [vmem:[%s15348_s0 + $0x7a0] sm:$0xff]  ;;  %v11021_v57 = vld [vmem:[#allocation2 + $0x368] ss:$16 sps:$4 sm:$0xff]  }
  0xfa   :  { %5179 = vmatprep.subr.bf16.mxu0 %v11017_v11  ;;  %v11023_v11 = vld [vmem:[#allocation2 + $0x36c] ss:$16 sps:$4 sm:$0xff]  }
  0xfb   :  { %v11029_v48 = vld [vmem:[#allocation2 + $0x38c] ss:$16 sps:$4 sm:$0xff]  }
  0xfc   :  { %6468 = vmatpush1.bf16.msra.mxu1 %v10988_v26 }
  0xfd   :  { %6469 = vmatprep.subr.bf16.mxu1 %v10999_v18  ;;  %5180 = vmatpush1.bf16.msra.mxu0 %v11015_v23  ;;  %v11024_v18 = vld [vmem:[#allocation2 + $0x720] ss:$16 sps:$4 sm:$0xff]  }
  0xfe   :  { %6365 = vmatmul.mubr.bf16.gmra.mrb[68].mxu1 %v12164_v39  ;;  %v325_v39 = vld [vmem:[%s15348_s0 + $0x848] sm:$0xff]  ;;  %5181 = vmatprep.subr.bf16.mxu0 %v11020_v13  ;;  %v324_v23 = vld [vmem:[%s15348_s0 + $0x840] sm:$0xff] }
  0xff   :  { %5077 = vmatmul.mubr.bf16.gmra.mrb[16].mxu0 %v12536_v20  ;;  %6374 = vmatprep.mubr.bf16.mxu1 %v12168_v41  ;;  %v12558_v26 = vpack.c.bf16 %v325_v39, %v305_v15  ;;  %v11012_v41 = vld [vmem:[#allocation2 + $0x348] ss:$16 sps:$4 sm:$0xff]   ;;  %v11030_v15 = vld [vmem:[#allocation2 + $0x740] ss:$16 sps:$4 sm:$0xff]   ;;  %v12576_v39 = vpack.c.bf16 %v324_v23, %v304_v55 }
 0x100   :  { %5086 = vmatprep.mubr.bf16.mxu0 %v12538_v22  ;;  %6470 = vmatpush1.bf16.msra.mxu1 %v10997_v21  ;;  %v11032_v21 = vld [vmem:[#allocation2 + $0x744] ss:$16 sps:$4 sm:$0xff]   ;;  %v365_v13 = vld [vmem:[%s15348_s0 + $0x988] sm:$0xff] }
 0x101   :  { %6471 = vmatprep.subr.bf16.mxu1 %v11005_v53  ;;  %5182 = vmatpush1.bf16.msra.mxu0 %v11018_v52  ;;  %v345_v53 = vld [vmem:[%s15348_s0 + $0x8e8] sm:$0xff]  ;;  %v11033_v52 = vld [vmem:[#allocation2 + $0x760] ss:$16 sps:$4 sm:$0xff]  }
 0x102   :  { %5183 = vmatprep.subr.bf16.mxu0 %v11026_v50  ;;  %v11038_v50 = vld [vmem:[#allocation2 + $0x3ac] ss:$16 sps:$4 sm:$0xff]  }
 0x103   :  { %v385_v55 = vld [vmem:[%s15348_s0 + $0xa28] sm:$0xff] }
 0x104   :  { %6472 = vmatpush1.bf16.msra.mxu1 %v11003_v51  ;;  %v12578_v51 = vpack.c.bf16 %v365_v13, %v345_v53  ;;  %v405_v23 = vld [vmem:[%s15348_s0 + $0xac8] sm:$0xff] }
 0x105   :  { %6473 = vmatprep.subr.bf16.mxu1 %v11014_v49  ;;  %5184 = vmatpush1.bf16.msra.mxu0 %v11024_v18  ;;  %v11027_v49 = vld [vmem:[#allocation2 + $0x388] ss:$16 sps:$4 sm:$0xff]   ;;  %v11041_v18 = vld [vmem:[#allocation2 + $0x784] ss:$16 sps:$4 sm:$0xff]   ;;  %v11044_v53 = vld [vmem:[#allocation2 + $0x3cc] ss:$16 sps:$4 sm:$0xff]  }
 0x106   :  { %6375 = vmatmul.mubr.bf16.gmra.mrb[72].mxu1 %v12200_v1  ;;  %5185 = vmatprep.subr.bf16.mxu0 %v11032_v21  ;;  %v11035_v1 = vld [vmem:[#allocation2 + $0x764] ss:$16 sps:$4 sm:$0xff]   ;;  %v11039_v21 = vld [vmem:[#allocation2 + $0x780] ss:$16 sps:$4 sm:$0xff]  }
 0x107   :  { %5087 = vmatmul.mubr.bf16.gmra.mrb[20].mxu0 %v12556_v37  ;;  %6384 = vmatprep.mubr.bf16.mxu1 %v12204_v3  ;;  %v344_v3 = vld [vmem:[%s15348_s0 + $0x8e0] sm:$0xff] }
 0x108   :  { %5096 = vmatprep.mubr.bf16.mxu0 %v12558_v26  ;;  %6474 = vmatpush1.bf16.msra.mxu1 %v11012_v41  ;;  %v364_v41 = vld [vmem:[%s15348_s0 + $0x980] sm:$0xff] }
 0x109   :  { %6475 = vmatprep.subr.bf16.mxu1 %v11023_v11  ;;  %5186 = vmatpush1.bf16.msra.mxu0 %v11030_v15  ;;  %v11036_v11 = vld [vmem:[#allocation2 + $0x3a8] ss:$16 sps:$4 sm:$0xff]   ;;  %v12596_v13 = vpack.c.bf16 %v364_v41, %v344_v3  ;;  %v11045_v15 = vld [vmem:[#allocation2 + $0x7a0] ss:$16 sps:$4 sm:$0xff]  }
 0x10a   :  { %5187 = vmatprep.subr.bf16.mxu0 %v11035_v1  ;;  %v384_v1 = vld [vmem:[%s15348_s0 + $0xa20] sm:$0xff]  ;;  %v445_v3 = vld [vmem:[%s15348_s0 + $0xc08] sm:$0xff] }
 0x10b   :  { %v11048_v41 = vld [vmem:[#allocation2 + $0x7c0] ss:$16 sps:$4 sm:$0xff]  }
 0x10c   :  { %6476 = vmatpush1.bf16.msra.mxu1 %v11021_v57  ;;  %v12598_v57 = vpack.c.bf16 %v405_v23, %v385_v55  ;;  %v11056_v55 = vld [vmem:[#allocation2 + $0x7e4] ss:$16 sps:$4 sm:$0xff]  }
 0x10d   :  { %6477 = vmatprep.subr.bf16.mxu1 %v11029_v48  ;;  %5188 = vmatpush1.bf16.msra.mxu0 %v11033_v52  ;;  %v11042_v48 = vld [vmem:[#allocation2 + $0x3c8] ss:$16 sps:$4 sm:$0xff]   ;;  %v11053_v52 = vld [vmem:[#allocation2 + $0x3ec] ss:$16 sps:$4 sm:$0xff]  }
 0x10e   :  { %6385 = vmatmul.mubr.bf16.gmra.mrb[76].mxu1 %v12236_v29  ;;  %5189 = vmatprep.subr.bf16.mxu0 %v11041_v18  ;;  %v11047_v29 = vld [vmem:[#allocation2 + $0x7a4] ss:$16 sps:$4 sm:$0xff]   ;;  %v11051_v18 = vld [vmem:[#allocation2 + $0x3e8] ss:$16 sps:$4 sm:$0xff]  }
 0x10f   :  { %5097 = vmatmul.mubr.bf16.gmra.mrb[24].mxu0 %v12576_v39  ;;  %6394 = vmatprep.mubr.bf16.mxu1 %v12240_v31  ;;  %v404_v31 = vld [vmem:[%s15348_s0 + $0xac0] sm:$0xff] }
 0x110   :  { %5106 = vmatprep.mubr.bf16.mxu0 %v12578_v51  ;;  %6478 = vmatpush1.bf16.msra.mxu1 %v11027_v49  ;;  %v11050_v49 = vld [vmem:[#allocation2 + $0x7c4] ss:$16 sps:$4 sm:$0xff]   ;;  %v12616_v23 = vpack.c.bf16 %v404_v31, %v384_v1 }
 0x111   :  { %6479 = vmatprep.subr.bf16.mxu1 %v11038_v50  ;;  %5190 = vmatpush1.bf16.msra.mxu0 %v11039_v21  ;;  %v425_v50 = vld [vmem:[%s15348_s0 + $0xb68] sm:$0xff]  ;;  %v11054_v21 = vld [vmem:[#allocation2 + $0x7e0] ss:$16 sps:$4 sm:$0xff]  }
 0x112   :  { %5191 = vmatprep.subr.bf16.mxu0 %v11047_v29  ;;  %v11080_v29 = vld [vmem:[#allocation2 + $0x804] ss:$16 sps:$4 sm:$0xff]  }
 0x114   :  { %6480 = vmatpush1.bf16.msra.mxu1 %v11036_v11  ;;  %v12618_v11 = vpack.c.bf16 %v445_v3, %v425_v50 }
 0x115   :  { %6481 = vmatprep.subr.bf16.mxu1 %v11044_v53  ;;  %5192 = vmatpush1.bf16.msra.mxu0 %v11045_v15  ;;  %v424_v53 = vld [vmem:[%s15348_s0 + $0xb60] sm:$0xff]  ;;  %v485_v15 = vld [vmem:[%s15348_s0 + $0xd48] sm:$0xff] }
 0x116   :  { %6395 = vmatmul.mubr.bf16.gmra.mrb[80].mxu1 %v12272_v63  ;;  %5193 = vmatprep.subr.bf16.mxu0 %v11050_v49  ;;  %v11059_v63 = vld [vmem:[#allocation2 + $0x40c] ss:$16 sps:$4 sm:$0xff]  }
 0x117   :  { %5107 = vmatmul.mubr.bf16.gmra.mrb[28].mxu0 %v12596_v13  ;;  %6404 = vmatprep.mubr.bf16.mxu1 %v12276_v5  ;;  %v444_v5 = vld [vmem:[%s15348_s0 + $0xc00] sm:$0xff]  ;;  %v505_v49 = vld [vmem:[%s15348_s0 + $0xde8] sm:$0xff] }
 0x118   :  { %5116 = vmatprep.mubr.bf16.mxu0 %v12598_v57  ;;  %6482 = vmatpush1.bf16.msra.mxu1 %v11042_v48  ;;  %v465_v48 = vld [vmem:[%s15348_s0 + $0xca8] sm:$0xff]  ;;  %v12636_v1 = vpack.c.bf16 %v444_v5, %v424_v53  ;;  %v107_v5 = vld [vmem:[%s15348_s0 + $0x178] sm:$0xff] }
 0x119   :  { %6483 = vmatprep.subr.bf16.mxu1 %v11053_v52  ;;  %5194 = vmatpush1.bf16.msra.mxu0 %v11048_v41  ;;  %v12638_v31 = vpack.c.bf16 %v485_v15, %v465_v48  ;;  %v525_v52 = vld [vmem:[%s15348_s0 + $0xe88] sm:$0xff] }
 0x11a   :  { %5195 = vmatprep.subr.bf16.mxu0 %v11056_v55  ;;  %v12658_v3 = vpack.c.bf16 %v525_v52, %v505_v49  ;;  %v545_v41 = vld [vmem:[%s15348_s0 + $0xf28] sm:$0xff]  ;;  %v106_v49 = vld [vmem:[%s15348_s0 + $0x170] sm:$0xff] }
 0x11b   :  { %v12675_v55 = vpack.c.bf16 %v545_v41, %v545_v41  ;;  %v11062_v15 = vld [vmem:[#allocation2 + $0x42c] ss:$16 sps:$4 sm:$0xff]   ;;  %v126_v52 = vld [vmem:[%s15348_s0 + $0x210] sm:$0xff] }
 0x11c   :  { %6484 = vmatpush1.bf16.msra.mxu1 %v11051_v18  ;;  %v147_v41 = vld [vmem:[%s15348_s0 + $0x2b8] sm:$0xff] }
 0x11d   :  { %6614 = vmatprep.subr.bf16.mxu1 %v11059_v63  ;;  %5196 = vmatpush1.bf16.msra.mxu0 %v11054_v21  ;;  %v87_v63 = vld [vmem:[%s15348_s0 + $0xd8] sm:$0xff] }
 0x11e   :  { %6405 = vmatmul.mubr.bf16.gmra.mrb[84].mxu1 %v12308_v43  ;;  %5326 = vmatprep.subr.bf16.mxu0 %v11080_v29  ;;  %v464_v43 = vld [vmem:[%s15348_s0 + $0xca0] sm:$0xff]  ;;  %v11057_v29 = vld [vmem:[#allocation2 + $0x408] ss:$16 sps:$4 sm:$0xff]  }
 0x11f   :  { %5117 = vmatmul.mubr.bf16.gmra.mrb[32].mxu0 %v12616_v23  ;;  %6414 = vmatprep.mubr.bf16.mxu1 %v12312_v45  ;;  %v484_v45 = vld [vmem:[%s15348_s0 + $0xd40] sm:$0xff] }
 0x120   :  { %5126 = vmatprep.mubr.bf16.mxu0 %v12618_v11  ;;  %v12656_v50 = vpack.c.bf16 %v484_v45, %v464_v43  ;;  %v11078_v45 = vld [vmem:[#allocation2 + $0x800] ss:$16 sps:$4 sm:$0xff]  }
 0x126   :  { %6415 = vmatmul.mubr.bf16.gmra.mrb[88].mxu1 %v12344_v7  ;;  %v504_v7 = vld [vmem:[%s15348_s0 + $0xde0] sm:$0xff] }
 0x127   :  { %5127 = vmatmul.mubr.bf16.gmra.mrb[36].mxu0 %v12636_v1  ;;  %6424 = vmatprep.mubr.bf16.mxu1 %v12348_v9  ;;  %v524_v9 = vld [vmem:[%s15348_s0 + $0xe80] sm:$0xff] }
 0x128   :  { %5136 = vmatprep.mubr.bf16.mxu0 %v12638_v31  ;;  %v12673_v18 = vpack.c.bf16 %v524_v9, %v504_v7  ;;  %v11065_v7 = vld [vmem:[#allocation2 + $0x44c] ss:$16 sps:$4 sm:$0xff]   ;;  %v11083_v9 = vld [vmem:[#allocation2 + $0x824] ss:$16 sps:$4 sm:$0xff]  }
 0x12e   :  { %6425 = vmatmul.mubr.bf16.gmra.mrb[92].mxu1 %v12380_v28  ;;  %v544_v28 = vld [vmem:[%s15348_s0 + $0xf20] sm:$0xff] }
 0x12f   :  { %5137 = vmatmul.mubr.bf16.gmra.mrb[40].mxu0 %v12656_v50  ;;  %6434 = vmatprep.mubr.bf16.mxu1 %v12384_v36  ;;  %v67_v36 = vld [vmem:[%s15348_s0 + $0x38] sm:$0xff]  ;;  %v12690_v21 = vpack.c.bf16 %v544_v28, %v544_v28 }
 0x130   :  { %5146 = vmatprep.mubr.bf16.mxu0 %v12658_v3  ;;  %v12692_v53 = vpack.c.bf16 %v87_v63, %v67_v36  ;;  %v167_v28 = vld [vmem:[%s15348_s0 + $0x358] sm:$0xff]  ;;  %v11081_v36 = vld [vmem:[#allocation2 + $0x820] ss:$16 sps:$4 sm:$0xff]  }
 0x131   :  { %v11063_v63 = vld [vmem:[#allocation2 + $0x448] ss:$16 sps:$4 sm:$0xff]  }
 0x136   :  { %6435 = vmatmul.mubr.bf16.gmra.mrb[96].mxu1 %v12410_v60  ;;  %v66_v60 = vld [vmem:[%s15348_s0 + $0x30] sm:$0xff] }
 0x137   :  { %5147 = vmatmul.mubr.bf16.gmra.mrb[44].mxu0 %v12673_v18  ;;  %6444 = vmatprep.mubr.bf16.mxu1 %v12414_v62  ;;  %v86_v62 = vld [vmem:[%s15348_s0 + $0xd0] sm:$0xff] }
 0x138   :  { %5156 = vmatprep.mubr.bf16.mxu0 %v12675_v55  ;;  %v12710_v48 = vpack.c.bf16 %v86_v62, %v66_v60  ;;  %v12734_v62 = vpack.c.bf16 %v126_v52, %v106_v49  ;;  %v187_v49 = vld [vmem:[%s15348_s0 + $0x3f8] sm:$0xff]  ;;  %v11092_v52 = vld [vmem:[#allocation2 + $0x864] ss:$16 sps:$4 sm:$0xff]  }
 0x13a   :  { %15385 = vst [vmem:[#allocation15_spill] sm:$0xff] %v12710_v48 }
 0x13e   :  { %6445 = vmatmul.mubr.bf16.gmra.mrb[100].mxu1 %v12434_v24  ;;  %v127_v24 = vld [vmem:[%s15348_s0 + $0x218] sm:$0xff] }
 0x13f   :  { %5157 = vmatmul.mubr.bf16.gmra.mrb[48].mxu0 %v12690_v21  ;;  %6485 = vmatprep.mubr.bf16.mxu1 %v11992_v54  ;;  %v12712_v43 = vpack.c.bf16 %v127_v24, %v107_v5  ;;  %v11060_v54 = vld [vmem:[#allocation2 + $0x428] ss:$16 sps:$4 sm:$0xff]   ;;  %v11068_v5 = vld [vmem:[#allocation2 + $0x46c] ss:$16 sps:$4 sm:$0xff]  }
 0x140   :  { %5197 = vmatprep.mubr.bf16.mxu0 %v12692_v53 }
 0x141   :  { %15386 = vst [vmem:[#allocation16_spill] sm:$0xff] %v12712_v43 }
 0x146   :  { %6486 = vmatmul.mubr.bf16.vlgmr.msra.gmra.mrb[52].mxu1 %v12022_v16 }
 0x147   :  { %5198 = vmatmul.mubr.bf16.vlgmr.msra.gmra.mrb[0].mxu0 %v12710_v48  ;;  %6615 = vmatpush1.bf16.msra.mxu1 %v11057_v29  ;;  %v12738_v29 = vpack.c.bf16 %v167_v28, %v147_v41 }
 0x148   :  { %5207 = vmatprep.mubr.bf16.mxu0 %v12712_v43  ;;  %6495 = vmatprep.mubr.bf16.mxu1 %v12026_v19  ;;  %v11089_v43 = vld [vmem:[#allocation2 + $0x844] ss:$16 sps:$4 sm:$0xff]  }
 0x149   :  { %6616 = vmatprep.subr.bf16.mxu1 %v11062_v15  ;;  %v12730_v16 = vpop.f32.mrb[0].mxu1  ;;  %5327 = vmatpush1.bf16.msra.mxu0 %v11078_v45  ;;  %v146_v19 = vld [vmem:[%s15348_s0 + $0x2b0] sm:$0xff] }
 0x14a   :  { %15387 = vst [vmem:[#allocation17_spill] sm:$0xff] %v12730_v16  ;;  %v12732_v60 = vpop.f32.mrb[1].mxu1  ;;  %5328 = vmatprep.subr.bf16.mxu0 %v11083_v9  ;;  %v166_v15 = vld [vmem:[%s15348_s0 + $0x350] sm:$0xff] }
 0x14b   :  { %15388 = vst [vmem:[#allocation18_spill] sm:$0xff] %v12732_v60  ;;  %v12736_v24 = vpop.f32.mrb[2].mxu1  ;;  %6617 = vmatpush1.bf16.msra.mxu1 %v11060_v54  ;;  %v11087_v45 = vld [vmem:[#allocation2 + $0x840] ss:$16 sps:$4 sm:$0xff]   ;;  %v11066_v54 = vld [vmem:[#allocation2 + $0x468] ss:$16 sps:$4 sm:$0xff]   ;;  %v12762_v28 = vpack.c.bf16 %v166_v15, %v146_v19 }
 0x14c   :  { %15389 = vst [vmem:[#allocation19_spill] sm:$0xff] %v12736_v24  ;;  %v12740_v48 = vpop.f32.mrb[3].mxu1  ;;  %6618 = vmatprep.subr.bf16.mxu1 %v11065_v7  ;;  %v11071_v7 = vld [vmem:[#allocation2 + $0x48c] ss:$16 sps:$4 sm:$0xff]   ;;  %v11090_v24 = vld [vmem:[#allocation2 + $0x860] ss:$16 sps:$4 sm:$0xff]  }
 0x14d   :  { %15390 = vst [vmem:[#allocation20_spill] sm:$0xff] %v12740_v48  ;;  %5329 = vmatpush1.bf16.msra.mxu0 %v11081_v36  ;;  %v11069_v36 = vld [vmem:[#allocation2 + $0x488] ss:$16 sps:$4 sm:$0xff]   ;;  %v11098_v60 = vld [vmem:[#allocation2 + $0x884] ss:$16 sps:$4 sm:$0xff]  }
 0x14e   :  { %6496 = vmatmul.mubr.bf16.gmra.mrb[56].mxu1 %v12058_v35  ;;  %v207_v35 = vld [vmem:[%s15348_s0 + $0x498] sm:$0xff]  ;;  %5330 = vmatprep.subr.bf16.mxu0 %v11089_v43  ;;  %v186_v43 = vld [vmem:[%s15348_s0 + $0x3f0] sm:$0xff] }
 0x14f   :  { %5208 = vmatmul.mubr.bf16.gmra.mrb[4].mxu0 %v12734_v62  ;;  %6619 = vmatpush1.bf16.msra.mxu1 %v11063_v63  ;;  %v12766_v48 = vpack.c.bf16 %v207_v35, %v187_v49  ;;  %v206_v19 = vld [vmem:[%s15348_s0 + $0x490] sm:$0xff]  ;;  %v227_v15 = vld [vmem:[%s15348_s0 + $0x538] sm:$0xff] }
 0x150   :  { %5217 = vmatprep.mubr.bf16.mxu0 %v12738_v29  ;;  %6505 = vmatprep.mubr.bf16.mxu1 %v12062_v38  ;;  %v11074_v38 = vld [vmem:[#allocation2 + $0x4ac] ss:$16 sps:$4 sm:$0xff]   ;;  %v11096_v49 = vld [vmem:[#allocation2 + $0x880] ss:$16 sps:$4 sm:$0xff]  }
 0x151   :  { %6620 = vmatprep.subr.bf16.mxu1 %v11068_v5  ;;  %v12758_v9 = vpop.f32.mrb[4].mxu1  ;;  %5331 = vmatpush1.bf16.msra.mxu0 %v11087_v45  ;;  %v11072_v45 = vld [vmem:[#allocation2 + $0x4a8] ss:$16 sps:$4 sm:$0xff]  }
 0x152   :  { %15391 = vst [vmem:[#allocation21_spill] sm:$0xff] %v12758_v9  ;;  %v12760_v41 = vpop.f32.mrb[5].mxu1  ;;  %5332 = vmatprep.subr.bf16.mxu0 %v11092_v52  ;;  %v11104_v52 = vld [vmem:[#allocation2 + $0x8a4] ss:$16 sps:$4 sm:$0xff]   ;;  %v11086_v9 = vld [vmem:[#allocation2 + $0x4ec] ss:$16 sps:$4 sm:$0xff]  }
 0x153   :  { %15392 = vst [vmem:[#allocation22_spill] sm:$0xff] %v12760_v41  ;;  %v12764_v63 = vpop.f32.mrb[6].mxu1  ;;  %6621 = vmatpush1.bf16.msra.mxu1 %v11066_v54  ;;  %v11077_v54 = vld [vmem:[#allocation2 + $0x4cc] ss:$16 sps:$4 sm:$0xff]  }
 0x154   :  { %15393 = vst [vmem:[#allocation23_spill] sm:$0xff] %v12764_v63  ;;  %v12768_v5 = vpop.f32.mrb[7].mxu1  ;;  %6622 = vmatprep.subr.bf16.mxu1 %v11071_v7  ;;  %v11075_v63 = vld [vmem:[#allocation2 + $0x4c8] ss:$16 sps:$4 sm:$0xff]  }
 0x155   :  { %15394 = vst [vmem:[#allocation24_spill] sm:$0xff] %v12768_v5  ;;  %5333 = vmatpush1.bf16.msra.mxu0 %v11090_v24  ;;  %v12790_v5 = vpack.c.bf16 %v206_v19, %v186_v43  ;;  %v11102_v24 = vld [vmem:[#allocation2 + $0x8a0] ss:$16 sps:$4 sm:$0xff]   ;;  %v267_v43 = vld [vmem:[%s15348_s0 + $0x678] sm:$0xff] }
 0x156   :  { %6506 = vmatmul.mubr.bf16.gmra.mrb[60].mxu1 %v12094_v56  ;;  %v247_v56 = vld [vmem:[%s15348_s0 + $0x5d8] sm:$0xff]  ;;  %5334 = vmatprep.subr.bf16.mxu0 %v11098_v60  ;;  %v226_v60 = vld [vmem:[%s15348_s0 + $0x530] sm:$0xff] }
 0x157   :  { %5218 = vmatmul.mubr.bf16.gmra.mrb[8].mxu0 %v12762_v28  ;;  %6515 = vmatprep.mubr.bf16.mxu1 %v12098_v58  ;;  %v12794_v41 = vpack.c.bf16 %v247_v56, %v227_v15  ;;  %v11084_v19 = vld [vmem:[#allocation2 + $0x4e8] ss:$16 sps:$4 sm:$0xff]   ;;  %v11095_v15 = vld [vmem:[#allocation2 + $0x50c] ss:$16 sps:$4 sm:$0xff]   ;;  %v11105_v56 = vld [vmem:[#allocation2 + $0x8c0] ss:$16 sps:$4 sm:$0xff]  }
 0x158   :  { %5227 = vmatprep.mubr.bf16.mxu0 %v12766_v48  ;;  %6623 = vmatpush1.bf16.msra.mxu1 %v11069_v36  ;;  %v11107_v36 = vld [vmem:[#allocation2 + $0x8c4] ss:$16 sps:$4 sm:$0xff]  }
 0x159   :  { %v12786_v35 = vpop.f32.mrb[8].mxu1  ;;  %6624 = vmatprep.subr.bf16.mxu1 %v11074_v38  ;;  %5335 = vmatpush1.bf16.msra.mxu0 %v11096_v49  ;;  %v246_v38 = vld [vmem:[%s15348_s0 + $0x5d0] sm:$0xff] }
 0x15a   :  { %15395 = vst [vmem:[#allocation25_spill] sm:$0xff] %v12786_v35  ;;  %v12788_v7 = vpop.f32.mrb[9].mxu1  ;;  %5336 = vmatprep.subr.bf16.mxu0 %v11104_v52  ;;  %v12818_v52 = vpack.c.bf16 %v246_v38, %v226_v60  ;;  %v307_v60 = vld [vmem:[%s15348_s0 + $0x7b8] sm:$0xff] }
 0x15b   :  { %15396 = vst [vmem:[#allocation26_spill] sm:$0xff] %v12788_v7  ;;  %v12792_v58 = vpop.f32.mrb[10].mxu1  ;;  %v11101_v7 = vld [vmem:[#allocation2 + $0x52c] ss:$16 sps:$4 sm:$0xff]   ;;  %v11099_v38 = vld [vmem:[#allocation2 + $0x528] ss:$16 sps:$4 sm:$0xff]  }
 0x15c   :  { %15397 = vst [vmem:[#allocation27_spill] sm:$0xff] %v12792_v58  ;;  %v12796_v16 = vpop.f32.mrb[11].mxu1  ;;  %6625 = vmatpush1.bf16.msra.mxu1 %v11072_v45  ;;  %v11113_v45 = vld [vmem:[#allocation2 + $0x8e4] ss:$16 sps:$4 sm:$0xff]  }
 0x15d   :  { %15398 = vst [vmem:[#allocation28_spill] sm:$0xff] %v12796_v16  ;;  %6626 = vmatprep.subr.bf16.mxu1 %v11077_v54  ;;  %5337 = vmatpush1.bf16.msra.mxu0 %v11102_v24  ;;  %v11093_v16 = vld [vmem:[#allocation2 + $0x508] ss:$16 sps:$4 sm:$0xff]   ;;  %v11116_v24 = vld [vmem:[#allocation2 + $0x904] ss:$16 sps:$4 sm:$0xff]  }
 0x15e   :  { %6516 = vmatmul.mubr.bf16.gmra.mrb[64].mxu1 %v12130_v12  ;;  %v287_v12 = vld [vmem:[%s15348_s0 + $0x718] sm:$0xff]  ;;  %5338 = vmatprep.subr.bf16.mxu0 %v11107_v36  ;;  %v286_v36 = vld [vmem:[%s15348_s0 + $0x710] sm:$0xff] }
 0x15f   :  { %5228 = vmatmul.mubr.bf16.gmra.mrb[12].mxu0 %v12790_v5  ;;  %6525 = vmatprep.mubr.bf16.mxu1 %v12134_v14  ;;  %v12822_v58 = vpack.c.bf16 %v287_v12, %v267_v43  ;;  %v11110_v43 = vld [vmem:[#allocation2 + $0x54c] ss:$16 sps:$4 sm:$0xff]   ;;  %v11114_v12 = vld [vmem:[#allocation2 + $0x900] ss:$16 sps:$4 sm:$0xff]  }
 0x160   :  { %5237 = vmatprep.mubr.bf16.mxu0 %v12794_v41  ;;  %6627 = vmatpush1.bf16.msra.mxu1 %v11075_v63  ;;  %v11111_v63 = vld [vmem:[#allocation2 + $0x8e0] ss:$16 sps:$4 sm:$0xff]  }
 0x161   :  { %v12814_v54 = vpop.f32.mrb[12].mxu1  ;;  %6628 = vmatprep.subr.bf16.mxu1 %v11086_v9  ;;  %5339 = vmatpush1.bf16.msra.mxu0 %v11105_v56  ;;  %v266_v9 = vld [vmem:[%s15348_s0 + $0x670] sm:$0xff] }
 0x162   :  { %15399 = vst [vmem:[#allocation29_spill] sm:$0xff] %v12814_v54  ;;  %v12816_v49 = vpop.f32.mrb[13].mxu1  ;;  %5340 = vmatprep.subr.bf16.mxu0 %v11113_v45  ;;  %v12846_v45 = vpack.c.bf16 %v286_v36, %v266_v9  ;;  %v347_v9 = vld [vmem:[%s15348_s0 + $0x8f8] sm:$0xff] }
 0x163   :  { %15400 = vst [vmem:[#allocation30_spill] sm:$0xff] %v12816_v49  ;;  %v12820_v14 = vpop.f32.mrb[14].mxu1  ;;  %v11119_v49 = vld [vmem:[#allocation2 + $0x56c] ss:$16 sps:$4 sm:$0xff]   ;;  %v11117_v36 = vld [vmem:[#allocation2 + $0x568] ss:$16 sps:$4 sm:$0xff]  }
 0x164   :  { %15401 = vst [vmem:[#allocation31_spill] sm:$0xff] %v12820_v14  ;;  %v12824_v35 = vpop.f32.mrb[15].mxu1  ;;  %6629 = vmatpush1.bf16.msra.mxu1 %v11084_v19  ;;  %v11122_v19 = vld [vmem:[#allocation2 + $0x924] ss:$16 sps:$4 sm:$0xff]  }
 0x165   :  { %15402 = vst [vmem:[#allocation32_spill] sm:$0xff] %v12824_v35  ;;  %6630 = vmatprep.subr.bf16.mxu1 %v11095_v15  ;;  %5341 = vmatpush1.bf16.msra.mxu0 %v11111_v63  ;;  %v11108_v35 = vld [vmem:[#allocation2 + $0x548] ss:$16 sps:$4 sm:$0xff]   ;;  %v11128_v63 = vld [vmem:[#allocation2 + $0x944] ss:$16 sps:$4 sm:$0xff]  }
 0x166   :  { %6526 = vmatmul.mubr.bf16.gmra.mrb[68].mxu1 %v12166_v40  ;;  %v327_v40 = vld [vmem:[%s15348_s0 + $0x858] sm:$0xff]  ;;  %5342 = vmatprep.subr.bf16.mxu0 %v11116_v24  ;;  %v326_v24 = vld [vmem:[%s15348_s0 + $0x850] sm:$0xff] }
 0x167   :  { %5238 = vmatmul.mubr.bf16.gmra.mrb[16].mxu0 %v12818_v52  ;;  %6535 = vmatprep.mubr.bf16.mxu1 %v12170_v42  ;;  %v12850_v14 = vpack.c.bf16 %v327_v40, %v307_v60  ;;  %v11125_v60 = vld [vmem:[#allocation2 + $0x58c] ss:$16 sps:$4 sm:$0xff]   ;;  %v11126_v40 = vld [vmem:[#allocation2 + $0x940] ss:$16 sps:$4 sm:$0xff]  }
 0x168   :  { %5247 = vmatprep.mubr.bf16.mxu0 %v12822_v58  ;;  %6631 = vmatpush1.bf16.msra.mxu1 %v11093_v16  ;;  %v11120_v16 = vld [vmem:[#allocation2 + $0x920] ss:$16 sps:$4 sm:$0xff]  }
 0x169   :  { %v12842_v15 = vpop.f32.mrb[16].mxu1  ;;  %6632 = vmatprep.subr.bf16.mxu1 %v11101_v7  ;;  %5343 = vmatpush1.bf16.msra.mxu0 %v11114_v12  ;;  %v306_v7 = vld [vmem:[%s15348_s0 + $0x7b0] sm:$0xff] }
 0x16a   :  { %15403 = vst [vmem:[#allocation33_spill] sm:$0xff] %v12842_v15  ;;  %v12844_v56 = vpop.f32.mrb[17].mxu1  ;;  %5344 = vmatprep.subr.bf16.mxu0 %v11122_v19  ;;  %v12874_v19 = vpack.c.bf16 %v326_v24, %v306_v7  ;;  %v387_v7 = vld [vmem:[%s15348_s0 + $0xa38] sm:$0xff] }
 0x16b   :  { %15404 = vst [vmem:[#allocation34_spill] sm:$0xff] %v12844_v56  ;;  %v12848_v42 = vpop.f32.mrb[18].mxu1  ;;  %v11132_v24 = vld [vmem:[#allocation2 + $0x5a8] ss:$16 sps:$4 sm:$0xff]  }
 0x16c   :  { %15405 = vst [vmem:[#allocation35_spill] sm:$0xff] %v12848_v42  ;;  %v12852_v54 = vpop.f32.mrb[19].mxu1  ;;  %6633 = vmatpush1.bf16.msra.mxu1 %v11099_v38  ;;  %v11131_v38 = vld [vmem:[#allocation2 + $0x964] ss:$16 sps:$4 sm:$0xff]  }
 0x16d   :  { %15406 = vst [vmem:[#allocation36_spill] sm:$0xff] %v12852_v54  ;;  %6634 = vmatprep.subr.bf16.mxu1 %v11110_v43  ;;  %5345 = vmatpush1.bf16.msra.mxu0 %v11120_v16  ;;  %v11123_v54 = vld [vmem:[#allocation2 + $0x588] ss:$16 sps:$4 sm:$0xff]   ;;  %v11137_v16 = vld [vmem:[#allocation2 + $0x984] ss:$16 sps:$4 sm:$0xff]  }
 0x16e   :  { %6536 = vmatmul.mubr.bf16.gmra.mrb[72].mxu1 %v12202_v2  ;;  %v367_v2 = vld [vmem:[%s15348_s0 + $0x998] sm:$0xff]  ;;  %5346 = vmatprep.subr.bf16.mxu0 %v11128_v63  ;;  %v366_v63 = vld [vmem:[%s15348_s0 + $0x990] sm:$0xff] }
 0x16f   :  { %5248 = vmatmul.mubr.bf16.gmra.mrb[20].mxu0 %v12846_v45  ;;  %6545 = vmatprep.mubr.bf16.mxu1 %v12206_v4  ;;  %v11129_v4 = vld [vmem:[#allocation2 + $0x960] ss:$16 sps:$4 sm:$0xff]   ;;  %v12878_v56 = vpack.c.bf16 %v367_v2, %v347_v9  ;;  %v11143_v2 = vld [vmem:[#allocation2 + $0x9a4] ss:$16 sps:$4 sm:$0xff]  }
 0x170   :  { %5257 = vmatprep.mubr.bf16.mxu0 %v12850_v14  ;;  %6635 = vmatpush1.bf16.msra.mxu1 %v11108_v35  ;;  %v11134_v35 = vld [vmem:[#allocation2 + $0x5ac] ss:$16 sps:$4 sm:$0xff]   ;;  %v11135_v9 = vld [vmem:[#allocation2 + $0x980] ss:$16 sps:$4 sm:$0xff]  }
 0x171   :  { %v12870_v43 = vpop.f32.mrb[20].mxu1  ;;  %6636 = vmatprep.subr.bf16.mxu1 %v11119_v49  ;;  %5347 = vmatpush1.bf16.msra.mxu0 %v11126_v40  ;;  %v346_v49 = vld [vmem:[%s15348_s0 + $0x8f0] sm:$0xff] }
 0x172   :  { %15407 = vst [vmem:[#allocation37_spill] sm:$0xff] %v12870_v43  ;;  %v12872_v12 = vpop.f32.mrb[21].mxu1  ;;  %5348 = vmatprep.subr.bf16.mxu0 %v11131_v38  ;;  %v12902_v40 = vpack.c.bf16 %v366_v63, %v346_v49  ;;  %v11138_v38 = vld [vmem:[#allocation2 + $0x5c8] ss:$16 sps:$4 sm:$0xff]   ;;  %v406_v49 = vld [vmem:[%s15348_s0 + $0xad0] sm:$0xff]  ;;  %v15442_v43 = vld [vmem:[#allocation12_spill] sm:$0xff] }
 0x173   :  { %15408 = vst [vmem:[#allocation38_spill] sm:$0xff] %v12872_v12  ;;  %v12876_v42 = vpop.f32.mrb[22].mxu1  ;;  %v427_v63 = vld [vmem:[%s15348_s0 + $0xb78] sm:$0xff] }
 0x174   :  { %15409 = vst [vmem:[#allocation39_spill] sm:$0xff] %v12876_v42  ;;  %v12880_v15 = vpop.f32.mrb[23].mxu1  ;;  %6637 = vmatpush1.bf16.msra.mxu1 %v11117_v36 }
 0x175   :  { %15410 = vst [vmem:[#allocation40_spill] sm:$0xff] %v12880_v15  ;;  %6638 = vmatprep.subr.bf16.mxu1 %v11125_v60  ;;  %5349 = vmatpush1.bf16.msra.mxu0 %v11129_v4  ;;  %v11141_v15 = vld [vmem:[#allocation2 + $0x9a0] ss:$16 sps:$4 sm:$0xff]   ;;  %v11146_v4 = vld [vmem:[#allocation2 + $0x9c4] ss:$16 sps:$4 sm:$0xff]  }
 0x176   :  { %6546 = vmatmul.mubr.bf16.gmra.mrb[76].mxu1 %v12238_v30  ;;  %v407_v30 = vld [vmem:[%s15348_s0 + $0xad8] sm:$0xff]  ;;  %5350 = vmatprep.subr.bf16.mxu0 %v11137_v16  ;;  %v386_v16 = vld [vmem:[%s15348_s0 + $0xa30] sm:$0xff] }
 0x177   :  { %5258 = vmatmul.mubr.bf16.gmra.mrb[24].mxu0 %v12874_v19  ;;  %6555 = vmatprep.mubr.bf16.mxu1 %v12242_v32  ;;  %v11140_v32 = vld [vmem:[#allocation2 + $0x5cc] ss:$16 sps:$4 sm:$0xff]   ;;  %v12906_v12 = vpack.c.bf16 %v407_v30, %v387_v7  ;;  %v11144_v7 = vld [vmem:[#allocation2 + $0x9c0] ss:$16 sps:$4 sm:$0xff]   ;;  %v11147_v30 = vld [vmem:[#allocation2 + $0x5e8] ss:$16 sps:$4 sm:$0xff]  }
 0x178   :  { %5267 = vmatprep.mubr.bf16.mxu0 %v12878_v56  ;;  %6639 = vmatpush1.bf16.msra.mxu1 %v11123_v54 }
 0x179   :  { %v12898_v36 = vpop.f32.mrb[24].mxu1  ;;  %6640 = vmatprep.subr.bf16.mxu1 %v11134_v35  ;;  %5351 = vmatpush1.bf16.msra.mxu0 %v11135_v9  ;;  %v11149_v35 = vld [vmem:[#allocation2 + $0x5ec] ss:$16 sps:$4 sm:$0xff]  }
 0x17a   :  { %15411 = vst [vmem:[#allocation41_spill] sm:$0xff] %v12898_v36  ;;  %v12900_v60 = vpop.f32.mrb[25].mxu1  ;;  %5352 = vmatprep.subr.bf16.mxu0 %v11143_v2  ;;  %v11155_v9 = vld [vmem:[#allocation2 + $0x60c] ss:$16 sps:$4 sm:$0xff]   ;;  %v11185_v36 = vld [vmem:[#allocation2 + $0xa44] ss:$16 sps:$4 sm:$0xff]  }
 0x17b   :  { %15412 = vst [vmem:[#allocation42_spill] sm:$0xff] %v12900_v60  ;;  %v12904_v42 = vpop.f32.mrb[26].mxu1 }
 0x17c   :  { %15413 = vst [vmem:[#allocation43_spill] sm:$0xff] %v12904_v42  ;;  %v12908_v54 = vpop.f32.mrb[27].mxu1  ;;  %6641 = vmatpush1.bf16.msra.mxu1 %v11132_v24  ;;  %v11152_v24 = vld [vmem:[#allocation2 + $0x9e4] ss:$16 sps:$4 sm:$0xff]  }
 0x17d   :  { %15414 = vst [vmem:[#allocation44_spill] sm:$0xff] %v12908_v54  ;;  %6642 = vmatprep.subr.bf16.mxu1 %v11140_v32  ;;  %5353 = vmatpush1.bf16.msra.mxu0 %v11141_v15  ;;  %v12930_v54 = vpack.c.bf16 %v406_v49, %v386_v16  ;;  %v11176_v15 = vld [vmem:[#allocation2 + $0xa04] ss:$16 sps:$4 sm:$0xff]   ;;  %v467_v16 = vld [vmem:[%s15348_s0 + $0xcb8] sm:$0xff] }
 0x17e   :  { %6556 = vmatmul.mubr.bf16.gmra.mrb[80].mxu1 %v12274_v0  ;;  %v447_v0 = vld [vmem:[%s15348_s0 + $0xc18] sm:$0xff]  ;;  %5354 = vmatprep.subr.bf16.mxu0 %v11146_v4  ;;  %v426_v4 = vld [vmem:[%s15348_s0 + $0xb70] sm:$0xff] }
 0x17f   :  { %5268 = vmatmul.mubr.bf16.gmra.mrb[28].mxu0 %v12902_v40  ;;  %6565 = vmatprep.mubr.bf16.mxu1 %v12278_v6  ;;  %v12934_v6 = vpack.c.bf16 %v447_v0, %v427_v63 }
 0x180   :  { %5277 = vmatprep.mubr.bf16.mxu0 %v12906_v12  ;;  %6643 = vmatpush1.bf16.msra.mxu1 %v11138_v38  ;;  %v11150_v38 = vld [vmem:[#allocation2 + $0x9e0] ss:$16 sps:$4 sm:$0xff]  }
 0x181   :  { %v12926_v2 = vpop.f32.mrb[28].mxu1  ;;  %6644 = vmatprep.subr.bf16.mxu1 %v11149_v35  ;;  %5355 = vmatpush1.bf16.msra.mxu0 %v11144_v7  ;;  %v446_v35 = vld [vmem:[%s15348_s0 + $0xc10] sm:$0xff] }
 0x182   :  { %15415 = vst [vmem:[#allocation45_spill] sm:$0xff] %v12926_v2  ;;  %v12928_v32 = vpop.f32.mrb[29].mxu1  ;;  %5356 = vmatprep.subr.bf16.mxu0 %v11152_v24  ;;  %v12958_v0 = vpack.c.bf16 %v446_v35, %v426_v4  ;;  %v466_v24 = vld [vmem:[%s15348_s0 + $0xcb0] sm:$0xff]  ;;  %v11164_v2 = vld [vmem:[#allocation2 + $0x66c] ss:$16 sps:$4 sm:$0xff]  }
 0x183   :  { %15416 = vst [vmem:[#allocation46_spill] sm:$0xff] %v12928_v32  ;;  %v12932_v42 = vpop.f32.mrb[30].mxu1  ;;  %v15438_v32 = vld [vmem:[#allocation10_spill] sm:$0xff] }
 0x184   :  { %15417 = vst [vmem:[#allocation47_spill] sm:$0xff] %v12932_v42  ;;  %v12936_v60 = vpop.f32.mrb[31].mxu1  ;;  %6645 = vmatpush1.bf16.msra.mxu1 %v11147_v30  ;;  %v108_v42 = vld [vmem:[%s15348_s0 + $0x180] sm:$0xff] }
 0x185   :  { %15418 = vst [vmem:[#allocation48_spill] sm:$0xff] %v12936_v60  ;;  %6775 = vmatprep.subr.bf16.mxu1 %v11155_v9  ;;  %5357 = vmatpush1.bf16.msra.mxu0 %v11150_v38  ;;  %v486_v9 = vld [vmem:[%s15348_s0 + $0xd50] sm:$0xff]  ;;  %v507_v38 = vld [vmem:[%s15348_s0 + $0xdf8] sm:$0xff] }
 0x186   :  { %6566 = vmatmul.mubr.bf16.gmra.mrb[84].mxu1 %v12310_v44  ;;  %v487_v44 = vld [vmem:[%s15348_s0 + $0xd58] sm:$0xff]  ;;  %5487 = vmatprep.subr.bf16.mxu0 %v11176_v15 }
 0x187   :  { %5278 = vmatmul.mubr.bf16.gmra.mrb[32].mxu0 %v12930_v54  ;;  %6575 = vmatprep.mubr.bf16.mxu1 %v12314_v46  ;;  %v12962_v7 = vpack.c.bf16 %v487_v44, %v467_v16  ;;  %v11156_v60 = vld [vmem:[#allocation2 + $0x628] ss:$16 sps:$4 sm:$0xff]  }
 0x188   :  { %5287 = vmatprep.mubr.bf16.mxu0 %v12934_v6 }
 0x189   :  { %v12954_v49 = vpop.f32.mrb[32].mxu1 }
 0x18a   :  { %15419 = vst [vmem:[#allocation49_spill] sm:$0xff] %v12954_v49  ;;  %v12956_v63 = vpop.f32.mrb[33].mxu1 }
 0x18b   :  { %15420 = vst [vmem:[#allocation50_spill] sm:$0xff] %v12956_v63  ;;  %v12960_v46 = vpop.f32.mrb[34].mxu1  ;;  %v11174_v63 = vld [vmem:[#allocation2 + $0xa00] ss:$16 sps:$4 sm:$0xff]  }
 0x18c   :  { %15421 = vst [vmem:[#allocation51_spill] sm:$0xff] %v12960_v46  ;;  %v12964_v30 = vpop.f32.mrb[35].mxu1 }
 0x18d   :  { %15422 = vst [vmem:[#allocation52_spill] sm:$0xff] %v12964_v30 }
 0x18e   :  { %6576 = vmatmul.mubr.bf16.gmra.mrb[88].mxu1 %v12346_v8  ;;  %v527_v8 = vld [vmem:[%s15348_s0 + $0xe98] sm:$0xff] }
 0x18f   :  { %5288 = vmatmul.mubr.bf16.gmra.mrb[36].mxu0 %v12958_v0  ;;  %6585 = vmatprep.mubr.bf16.mxu1 %v12350_v10  ;;  %v12986_v10 = vpack.c.bf16 %v486_v9, %v466_v24  ;;  %v12990_v16 = vpack.c.bf16 %v527_v8, %v507_v38  ;;  %v526_v24 = vld [vmem:[%s15348_s0 + $0xe90] sm:$0xff]  ;;  %v547_v9 = vld [vmem:[%s15348_s0 + $0xf38] sm:$0xff] }
 0x190   :  { %5297 = vmatprep.mubr.bf16.mxu0 %v12962_v7 }
 0x191   :  { %v12982_v15 = vpop.f32.mrb[36].mxu1 }
 0x192   :  { %15423 = vst [vmem:[#allocation53_spill] sm:$0xff] %v12982_v15  ;;  %v12984_v4 = vpop.f32.mrb[37].mxu1  ;;  %v68_v15 = vld [vmem:[%s15348_s0 + $0x40] sm:$0xff] }
 0x193   :  { %15424 = vst [vmem:[#allocation54_spill] sm:$0xff] %v12984_v4  ;;  %v12988_v35 = vpop.f32.mrb[38].mxu1  ;;  %v506_v4 = vld [vmem:[%s15348_s0 + $0xdf0] sm:$0xff] }
 0x194   :  { %15425 = vst [vmem:[#allocation55_spill] sm:$0xff] %v12988_v35  ;;  %v12992_v44 = vpop.f32.mrb[39].mxu1 }
 0x195   :  { %15426 = vst [vmem:[#allocation56_spill] sm:$0xff] %v12992_v44 }
 0x196   :  { %6586 = vmatmul.mubr.bf16.gmra.mrb[92].mxu1 %v12382_v33  ;;  %v13011_v33 = vpack.c.bf16 %v526_v24, %v506_v4  ;;  %v69_v4 = vld [vmem:[%s15348_s0 + $0x48] sm:$0xff] }
 0x197   :  { %5298 = vmatmul.mubr.bf16.gmra.mrb[40].mxu0 %v12986_v10  ;;  %6595 = vmatprep.mubr.bf16.mxu1 %v12386_v47  ;;  %v13015_v47 = vpack.c.bf16 %v547_v9, %v547_v9  ;;  %v89_v24 = vld [vmem:[%s15348_s0 + $0xe8] sm:$0xff] }
 0x198   :  { %5307 = vmatprep.mubr.bf16.mxu0 %v12990_v16 }
 0x199   :  { %v13007_v38 = vpop.f32.mrb[40].mxu1 }
 0x19a   :  { %15427 = vst [vmem:[#allocation57_spill] sm:$0xff] %v13007_v38  ;;  %v13009_v8 = vpop.f32.mrb[41].mxu1 }
 0x19b   :  { %15428 = vst [vmem:[#allocation58_spill] sm:$0xff] %v13009_v8  ;;  %v13013_v44 = vpop.f32.mrb[42].mxu1  ;;  %v546_v8 = vld [vmem:[%s15348_s0 + $0xf30] sm:$0xff] }
 0x19c   :  { %15429 = vst [vmem:[#allocation59_spill] sm:$0xff] %v13013_v44  ;;  %v13017_v35 = vpop.f32.mrb[43].mxu1 }
 0x19d   :  { %15430 = vst [vmem:[#allocation60_spill] sm:$0xff] %v13017_v35 }
 0x19e   :  { %6596 = vmatmul.mubr.bf16.gmra.mrb[96].mxu1 %v12412_v61  ;;  %v13036_v61 = vpack.c.bf16 %v546_v8, %v546_v8  ;;  %v88_v8 = vld [vmem:[%s15348_s0 + $0xe0] sm:$0xff] }
 0x19f   :  { %5308 = vmatmul.mubr.bf16.gmra.mrb[44].mxu0 %v13011_v33  ;;  %6605 = vmatprep.mubr.bf16.mxu1 %v12416_v17  ;;  %v13040_v17 = vpack.c.bf16 %v89_v24, %v69_v4  ;;  %v109_v4 = vld [vmem:[%s15348_s0 + $0x188] sm:$0xff] }
 0x1a0   :  { %5317 = vmatprep.mubr.bf16.mxu0 %v13015_v47 }
 0x1a1   :  { %v13032_v9 = vpop.f32.mrb[44].mxu1 }
 0x1a2   :  { %15431 = vst [vmem:[#allocation61_spill] sm:$0xff] %v13032_v9  ;;  %v13034_v35 = vpop.f32.mrb[45].mxu1  ;;  %v15435_v9 = vld [vmem:[#allocation9_spill] sm:$0xff] }
 0x1a3   :  { %15432 = vst [vmem:[#allocation62_spill] sm:$0xff] %v13034_v35  ;;  %v13038_v44 = vpop.f32.mrb[46].mxu1  ;;  %v13064_v35 = vpack.c.bf16 %v88_v8, %v68_v15  ;;  %v128_v15 = vld [vmem:[%s15348_s0 + $0x220] sm:$0xff]  ;;  %v11161_v8 = vld [vmem:[#allocation2 + $0x64c] ss:$16 sps:$4 sm:$0xff]  }
 0x1a4   :  { %15433 = vst [vmem:[#allocation63_spill] sm:$0xff] %v13038_v44  ;;  %v13042_v38 = vpop.f32.mrb[47].mxu1 }
 0x1a5   :  { %15434 = vst [vmem:[#allocation64_spill] sm:$0xff] %v13042_v38  ;;  %v11153_v38 = vld [vmem:[#allocation2 + $0x608] ss:$16 sps:$4 sm:$0xff]  }
 0x1a6   :  { %6606 = vmatmul.mubr.bf16.gmra.mrb[100].mxu1 %v12436_v25  ;;  %v129_v25 = vld [vmem:[%s15348_s0 + $0x228] sm:$0xff] }
 0x1a7   :  { %5318 = vmatmul.mubr.bf16.gmra.mrb[48].mxu0 %v13036_v61  ;;  %6646 = vmatprep.mubr.bf16.mxu1 %v15435_v9  ;;  %v11158_v9 = vld [vmem:[#allocation2 + $0x62c] ss:$16 sps:$4 sm:$0xff]   ;;  %v13066_v46 = vpack.c.bf16 %v129_v25, %v109_v4  ;;  %v11177_v4 = vld [vmem:[#allocation2 + $0xa20] ss:$16 sps:$4 sm:$0xff]  }
 0x1a8   :  { %5358 = vmatprep.mubr.bf16.mxu0 %v13040_v17  ;;  %v15439_v25 = vld [vmem:[#allocation11_spill] sm:$0xff] }
 0x1a9   :  { %v13060_v24 = vpop.f32.mrb[48].mxu1 }
 0x1aa   :  { %15436 = vst [vmem:[#allocation9_spill] sm:$0xff] %v13060_v24  ;;  %v13062_v44 = vpop.f32.mrb[49].mxu1  ;;  %v13084_v24 = vpack.c.bf16 %v128_v15, %v108_v42  ;;  %v168_v42 = vld [vmem:[%s15348_s0 + $0x360] sm:$0xff] }
 0x1ab   :  { %15437 = vst [vmem:[#allocation65_spill] sm:$0xff] %v13062_v44  ;;  %v4840_v30 = vpop.f32.mrb[50].mxu1  ;;  %v11179_v44 = vld [vmem:[#allocation2 + $0xa24] ss:$16 sps:$4 sm:$0xff]  }
 0x1ac   :  { %v4841_v49 = vpop.f32.mrb[51].mxu1  ;;  %v169_v30 = vld [vmem:[%s15348_s0 + $0x368] sm:$0xff]  ;;  %15440 = vst [vmem:[#allocation10_spill] sm:$0xff] %v13084_v24  ;;  %v11188_v15 = vld [vmem:[#allocation2 + $0xa64] ss:$16 sps:$4 sm:$0xff]  }
 0x1ad   :  { %v149_v49 = vld [vmem:[%s15348_s0 + $0x2c8] sm:$0xff] }
 0x1ae   :  { %6647 = vmatmul.mubr.bf16.vlgmr.msra.gmra.mrb[52].mxu1 %v15438_v32  ;;  %v11159_v32 = vld [vmem:[#allocation2 + $0x648] ss:$16 sps:$4 sm:$0xff]  }
 0x1af   :  { %5359 = vmatmul.mubr.bf16.vlgmr.msra.gmra.mrb[0].mxu0 %v13064_v35  ;;  %6776 = vmatpush1.bf16.msra.mxu1 %v11153_v38  ;;  %v13086_v38 = vpack.c.bf16 %v169_v30, %v149_v49  ;;  %v11167_v49 = vld [vmem:[#allocation2 + $0x68c] ss:$16 sps:$4 sm:$0xff]  }
 0x1b0   :  { %5368 = vmatprep.mubr.bf16.mxu0 %v13066_v46  ;;  %6656 = vmatprep.mubr.bf16.mxu1 %v15439_v25 }
 0x1b1   :  { %6777 = vmatprep.subr.bf16.mxu1 %v11158_v9  ;;  %5488 = vmatpush1.bf16.msra.mxu0 %v11174_v63  ;;  %15441 = vst [vmem:[#allocation11_spill] sm:$0xff] %v13086_v38  ;;  %v148_v9 = vld [vmem:[%s15348_s0 + $0x2c0] sm:$0xff] }
 0x1b2   :  { %5489 = vmatprep.subr.bf16.mxu0 %v11179_v44  ;;  %v11183_v63 = vld [vmem:[#allocation2 + $0xa40] ss:$16 sps:$4 sm:$0xff]   ;;  %v189_v44 = vld [vmem:[%s15348_s0 + $0x408] sm:$0xff]  ;;  %v13104_v30 = vpack.c.bf16 %v168_v42, %v148_v9 }
 0x1b3   :  { %6778 = vmatpush1.bf16.msra.mxu1 %v11156_v60  ;;  %v11162_v60 = vld [vmem:[#allocation2 + $0x668] ss:$16 sps:$4 sm:$0xff]  }
 0x1b4   :  { %6779 = vmatprep.subr.bf16.mxu1 %v11161_v8  ;;  %v15443_v8 = vld [vmem:[#allocation13_spill] sm:$0xff] }
 0x1b5   :  { %5490 = vmatpush1.bf16.msra.mxu0 %v11177_v4  ;;  %v11165_v4 = vld [vmem:[#allocation2 + $0x688] ss:$16 sps:$4 sm:$0xff]  }
 0x1b6   :  { %6657 = vmatmul.mubr.bf16.gmra.mrb[56].mxu1 %v15442_v43  ;;  %v209_v43 = vld [vmem:[%s15348_s0 + $0x4a8] sm:$0xff]  ;;  %5491 = vmatprep.subr.bf16.mxu0 %v11185_v36  ;;  %v188_v36 = vld [vmem:[%s15348_s0 + $0x400] sm:$0xff] }
 0x1b7   :  { %5369 = vmatmul.mubr.bf16.gmra.mrb[4].mxu0 %v13084_v24  ;;  %6780 = vmatpush1.bf16.msra.mxu1 %v11159_v32  ;;  %v13106_v25 = vpack.c.bf16 %v209_v43, %v189_v44  ;;  %v11170_v32 = vld [vmem:[#allocation2 + $0x6ac] ss:$16 sps:$4 sm:$0xff]   ;;  %v11194_v24 = vld [vmem:[#allocation2 + $0xa84] ss:$16 sps:$4 sm:$0xff]   ;;  %v11168_v42 = vld [vmem:[#allocation2 + $0x6a8] ss:$16 sps:$4 sm:$0xff]  }
 0x1b8   :  { %5378 = vmatprep.mubr.bf16.mxu0 %v13086_v38  ;;  %6666 = vmatprep.mubr.bf16.mxu1 %v15443_v8  ;;  %v11186_v38 = vld [vmem:[#allocation2 + $0xa60] ss:$16 sps:$4 sm:$0xff]   ;;  %v229_v9 = vld [vmem:[%s15348_s0 + $0x548] sm:$0xff]  ;;  %v11200_v44 = vld [vmem:[#allocation2 + $0xaa4] ss:$16 sps:$4 sm:$0xff]  }
 0x1b9   :  { %6781 = vmatprep.subr.bf16.mxu1 %v11164_v2  ;;  %5492 = vmatpush1.bf16.msra.mxu0 %v11183_v63  ;;  %15444 = vst [vmem:[#allocation12_spill] sm:$0xff] %v13106_v25  ;;  %v208_v2 = vld [vmem:[%s15348_s0 + $0x4a0] sm:$0xff]  ;;  %v11173_v63 = vld [vmem:[#allocation2 + $0x6cc] ss:$16 sps:$4 sm:$0xff]   ;;  %v11171_v8 = vld [vmem:[#allocation2 + $0x6c8] ss:$16 sps:$4 sm:$0xff]  }
 0x1ba   :  { %5493 = vmatprep.subr.bf16.mxu0 %v11188_v15  ;;  %v13124_v15 = vpack.c.bf16 %v208_v2, %v188_v36  ;;  %v289_v36 = vld [vmem:[%s15348_s0 + $0x728] sm:$0xff] }
 0x1bb   :  { %6782 = vmatpush1.bf16.msra.mxu1 %v11162_v60  ;;  %v11192_v60 = vld [vmem:[#allocation2 + $0xa80] ss:$16 sps:$4 sm:$0xff]   ;;  %v11180_v2 = vld [vmem:[#allocation2 + $0x6e8] ss:$16 sps:$4 sm:$0xff]  }
 0x1bc   :  { %6783 = vmatprep.subr.bf16.mxu1 %v11167_v49  ;;  %v11182_v49 = vld [vmem:[#allocation2 + $0x6ec] ss:$16 sps:$4 sm:$0xff]  }
 0x1bd   :  { %5494 = vmatpush1.bf16.msra.mxu0 %v11186_v38  ;;  %v248_v38 = vld [vmem:[%s15348_s0 + $0x5e0] sm:$0xff] }
 0x1be   :  { %6667 = vmatmul.mubr.bf16.gmra.mrb[60].mxu1 %v12496_v34  ;;  %v249_v34 = vld [vmem:[%s15348_s0 + $0x5e8] sm:$0xff]  ;;  %5495 = vmatprep.subr.bf16.mxu0 %v11194_v24  ;;  %v228_v24 = vld [vmem:[%s15348_s0 + $0x540] sm:$0xff] }
 0x1bf   :  { %5379 = vmatmul.mubr.bf16.gmra.mrb[8].mxu0 %v13104_v30  ;;  %6676 = vmatprep.mubr.bf16.mxu1 %v12498_v59  ;;  %v13126_v43 = vpack.c.bf16 %v249_v34, %v229_v9  ;;  %v11198_v59 = vld [vmem:[#allocation2 + $0xaa0] ss:$16 sps:$4 sm:$0xff]   ;;  %v11191_v9 = vld [vmem:[#allocation2 + $0x70c] ss:$16 sps:$4 sm:$0xff]  }
 0x1c0   :  { %5388 = vmatprep.mubr.bf16.mxu0 %v13106_v25  ;;  %6784 = vmatpush1.bf16.msra.mxu1 %v11165_v4  ;;  %v11203_v25 = vld [vmem:[#allocation2 + $0xac4] ss:$16 sps:$4 sm:$0xff]   ;;  %v11201_v34 = vld [vmem:[#allocation2 + $0xac0] ss:$16 sps:$4 sm:$0xff]  }
 0x1c1   :  { %6785 = vmatprep.subr.bf16.mxu1 %v11170_v32  ;;  %15445 = vst [vmem:[#allocation13_spill] sm:$0xff] %v13126_v43  ;;  %5496 = vmatpush1.bf16.msra.mxu0 %v11192_v60  ;;  %v15446_v4 = vld [vmem:[#allocation14_spill] sm:$0xff]  ;;  %v11189_v60 = vld [vmem:[#allocation2 + $0x708] ss:$16 sps:$4 sm:$0xff]  }
 0x1c2   :  { %5497 = vmatprep.subr.bf16.mxu0 %v11200_v44  ;;  %v269_v32 = vld [vmem:[%s15348_s0 + $0x688] sm:$0xff] }
 0x1c3   :  { %v13146_v44 = vpack.c.bf16 %v289_v36, %v269_v32  ;;  %v11218_v32 = vld [vmem:[#allocation2 + $0xb24] ss:$16 sps:$4 sm:$0xff]  }
 0x1c4   :  { %6786 = vmatpush1.bf16.msra.mxu1 %v11168_v42  ;;  %v11209_v42 = vld [vmem:[#allocation2 + $0xae4] ss:$16 sps:$4 sm:$0xff]  }
 0x1c5   :  { %6787 = vmatprep.subr.bf16.mxu1 %v11173_v63  ;;  %5498 = vmatpush1.bf16.msra.mxu0 %v11198_v59  ;;  %v13144_v63 = vpack.c.bf16 %v248_v38, %v228_v24  ;;  %v11195_v59 = vld [vmem:[#allocation2 + $0x728] ss:$16 sps:$4 sm:$0xff]   ;;  %v11206_v24 = vld [vmem:[#allocation2 + $0x74c] ss:$16 sps:$4 sm:$0xff]   ;;  %v11210_v38 = vld [vmem:[#allocation2 + $0xb00] ss:$16 sps:$4 sm:$0xff]  }
 0x1c6   :  { %6677 = vmatmul.mubr.bf16.gmra.mrb[64].mxu1 %v15446_v4  ;;  %5499 = vmatprep.subr.bf16.mxu0 %v11203_v25  ;;  %v11197_v4 = vld [vmem:[#allocation2 + $0x72c] ss:$16 sps:$4 sm:$0xff]   ;;  %v268_v25 = vld [vmem:[%s15348_s0 + $0x680] sm:$0xff] }
 0x1c7   :  { %5389 = vmatmul.mubr.bf16.gmra.mrb[12].mxu0 %v13124_v15  ;;  %6686 = vmatprep.mubr.bf16.mxu1 %v12518_v27  ;;  %v11207_v27 = vld [vmem:[#allocation2 + $0xae0] ss:$16 sps:$4 sm:$0xff]  }
 0x1c8   :  { %5398 = vmatprep.mubr.bf16.mxu0 %v13126_v43  ;;  %6788 = vmatpush1.bf16.msra.mxu1 %v11171_v8  ;;  %v11212_v43 = vld [vmem:[#allocation2 + $0xb04] ss:$16 sps:$4 sm:$0xff]  }
 0x1c9   :  { %6789 = vmatprep.subr.bf16.mxu1 %v11182_v49  ;;  %5500 = vmatpush1.bf16.msra.mxu0 %v11201_v34  ;;  %v288_v8 = vld [vmem:[%s15348_s0 + $0x720] sm:$0xff]  ;;  %v309_v49 = vld [vmem:[%s15348_s0 + $0x7c8] sm:$0xff] }
 0x1ca   :  { %5501 = vmatprep.subr.bf16.mxu0 %v11209_v42  ;;  %v13164_v36 = vpack.c.bf16 %v288_v8, %v268_v25  ;;  %v11215_v34 = vld [vmem:[#allocation2 + $0x76c] ss:$16 sps:$4 sm:$0xff]   ;;  %v11224_v42 = vld [vmem:[#allocation2 + $0xb44] ss:$16 sps:$4 sm:$0xff]   ;;  %v11222_v8 = vld [vmem:[#allocation2 + $0xb40] ss:$16 sps:$4 sm:$0xff]  }
 0x1cb   :  { %v11221_v25 = vld [vmem:[#allocation2 + $0x78c] ss:$16 sps:$4 sm:$0xff]  }
 0x1cc   :  { %6790 = vmatpush1.bf16.msra.mxu1 %v11180_v2  ;;  %v11204_v2 = vld [vmem:[#allocation2 + $0x748] ss:$16 sps:$4 sm:$0xff]  }
 0x1cd   :  { %6791 = vmatprep.subr.bf16.mxu1 %v11191_v9  ;;  %5502 = vmatpush1.bf16.msra.mxu0 %v11207_v27  ;;  %v11213_v27 = vld [vmem:[#allocation2 + $0x768] ss:$16 sps:$4 sm:$0xff]  }
 0x1ce   :  { %6687 = vmatmul.mubr.bf16.gmra.mrb[68].mxu1 %v12536_v20  ;;  %v329_v20 = vld [vmem:[%s15348_s0 + $0x868] sm:$0xff]  ;;  %5503 = vmatprep.subr.bf16.mxu0 %v11212_v43  ;;  %v308_v43 = vld [vmem:[%s15348_s0 + $0x7c0] sm:$0xff] }
 0x1cf   :  { %5399 = vmatmul.mubr.bf16.gmra.mrb[16].mxu0 %v13144_v63  ;;  %6696 = vmatprep.mubr.bf16.mxu1 %v12538_v22  ;;  %v13166_v9 = vpack.c.bf16 %v329_v20, %v309_v49  ;;  %v11216_v22 = vld [vmem:[#allocation2 + $0xb20] ss:$16 sps:$4 sm:$0xff]   ;;  %v11227_v49 = vld [vmem:[#allocation2 + $0xb64] ss:$16 sps:$4 sm:$0xff]  }
 0x1d0   :  { %5408 = vmatprep.mubr.bf16.mxu0 %v13146_v44  ;;  %6792 = vmatpush1.bf16.msra.mxu1 %v11189_v60  ;;  %v328_v60 = vld [vmem:[%s15348_s0 + $0x860] sm:$0xff] }
 0x1d1   :  { %6793 = vmatprep.subr.bf16.mxu1 %v11197_v4  ;;  %5504 = vmatpush1.bf16.msra.mxu0 %v11210_v38  ;;  %v349_v4 = vld [vmem:[%s15348_s0 + $0x908] sm:$0xff]  ;;  %v13184_v20 = vpack.c.bf16 %v328_v60, %v308_v43  ;;  %v11231_v43 = vld [vmem:[#allocation2 + $0xb80] ss:$16 sps:$4 sm:$0xff]  }
 0x1d2   :  { %5505 = vmatprep.subr.bf16.mxu0 %v11218_v32  ;;  %v11233_v32 = vld [vmem:[#allocation2 + $0xb84] ss:$16 sps:$4 sm:$0xff]   ;;  %v11236_v60 = vld [vmem:[#allocation2 + $0x7cc] ss:$16 sps:$4 sm:$0xff]  }
 0x1d4   :  { %6794 = vmatpush1.bf16.msra.mxu1 %v11195_v59  ;;  %v11219_v59 = vld [vmem:[#allocation2 + $0x788] ss:$16 sps:$4 sm:$0xff]  }
 0x1d5   :  { %6795 = vmatprep.subr.bf16.mxu1 %v11206_v24  ;;  %5506 = vmatpush1.bf16.msra.mxu0 %v11216_v22  ;;  %v11225_v24 = vld [vmem:[#allocation2 + $0xb60] ss:$16 sps:$4 sm:$0xff]   ;;  %v389_v22 = vld [vmem:[%s15348_s0 + $0xa48] sm:$0xff] }
 0x1d6   :  { %6697 = vmatmul.mubr.bf16.gmra.mrb[72].mxu1 %v12556_v37  ;;  %v369_v37 = vld [vmem:[%s15348_s0 + $0x9a8] sm:$0xff]  ;;  %5507 = vmatprep.subr.bf16.mxu0 %v11224_v42 }
 0x1d7   :  { %5409 = vmatmul.mubr.bf16.gmra.mrb[20].mxu0 %v13164_v36  ;;  %6706 = vmatprep.mubr.bf16.mxu1 %v12558_v26  ;;  %v13186_v38 = vpack.c.bf16 %v369_v37, %v349_v4  ;;  %v11230_v26 = vld [vmem:[#allocation2 + $0x7ac] ss:$16 sps:$4 sm:$0xff]   ;;  %v11228_v42 = vld [vmem:[#allocation2 + $0x7a8] ss:$16 sps:$4 sm:$0xff]  }
 0x1d8   :  { %5418 = vmatprep.mubr.bf16.mxu0 %v13166_v9  ;;  %6796 = vmatpush1.bf16.msra.mxu1 %v11204_v2  ;;  %v348_v2 = vld [vmem:[%s15348_s0 + $0x900] sm:$0xff]  ;;  %v11234_v37 = vld [vmem:[#allocation2 + $0x7c8] ss:$16 sps:$4 sm:$0xff]  }
 0x1d9   :  { %6797 = vmatprep.subr.bf16.mxu1 %v11215_v34  ;;  %5508 = vmatpush1.bf16.msra.mxu0 %v11222_v8  ;;  %v368_v34 = vld [vmem:[%s15348_s0 + $0x9a0] sm:$0xff] }
 0x1da   :  { %5509 = vmatprep.subr.bf16.mxu0 %v11227_v49  ;;  %v13204_v4 = vpack.c.bf16 %v368_v34, %v348_v2  ;;  %v11242_v8 = vld [vmem:[#allocation2 + $0xbc4] ss:$16 sps:$4 sm:$0xff]   ;;  %v11245_v49 = vld [vmem:[#allocation2 + $0x7ec] ss:$16 sps:$4 sm:$0xff]   ;;  %v11243_v2 = vld [vmem:[#allocation2 + $0x7e8] ss:$16 sps:$4 sm:$0xff]  }
 0x1db   :  { %v11248_v34 = vld [vmem:[#allocation2 + $0xbe4] ss:$16 sps:$4 sm:$0xff]  }
 0x1dc   :  { %6798 = vmatpush1.bf16.msra.mxu1 %v11213_v27  ;;  %v11237_v27 = vld [vmem:[#allocation2 + $0xba0] ss:$16 sps:$4 sm:$0xff]  }
 0x1dd   :  { %6799 = vmatprep.subr.bf16.mxu1 %v11221_v25  ;;  %5510 = vmatpush1.bf16.msra.mxu0 %v11225_v24  ;;  %v408_v24 = vld [vmem:[%s15348_s0 + $0xae0] sm:$0xff] }
 0x1de   :  { %6707 = vmatmul.mubr.bf16.gmra.mrb[76].mxu1 %v12576_v39  ;;  %v409_v39 = vld [vmem:[%s15348_s0 + $0xae8] sm:$0xff]  ;;  %5511 = vmatprep.subr.bf16.mxu0 %v11233_v32  ;;  %v11240_v32 = vld [vmem:[#allocation2 + $0xbc0] ss:$16 sps:$4 sm:$0xff]  }
 0x1df   :  { %5419 = vmatmul.mubr.bf16.gmra.mrb[24].mxu0 %v13184_v20  ;;  %6716 = vmatprep.mubr.bf16.mxu1 %v12578_v51  ;;  %v11239_v51 = vld [vmem:[#allocation2 + $0xba4] ss:$16 sps:$4 sm:$0xff]   ;;  %v13206_v25 = vpack.c.bf16 %v409_v39, %v389_v22  ;;  %v11251_v22 = vld [vmem:[#allocation2 + $0x80c] ss:$16 sps:$4 sm:$0xff]  }
 0x1e0   :  { %5428 = vmatprep.mubr.bf16.mxu0 %v13186_v38  ;;  %6800 = vmatpush1.bf16.msra.mxu1 %v11219_v59  ;;  %v388_v59 = vld [vmem:[%s15348_s0 + $0xa40] sm:$0xff] }
 0x1e1   :  { %6801 = vmatprep.subr.bf16.mxu1 %v11230_v26  ;;  %5512 = vmatpush1.bf16.msra.mxu0 %v11231_v43  ;;  %v429_v26 = vld [vmem:[%s15348_s0 + $0xb88] sm:$0xff]  ;;  %v13224_v39 = vpack.c.bf16 %v408_v24, %v388_v59  ;;  %v11246_v43 = vld [vmem:[#allocation2 + $0xbe0] ss:$16 sps:$4 sm:$0xff]  }
 0x1e2   :  { %5513 = vmatprep.subr.bf16.mxu0 %v11239_v51  ;;  %v448_v51 = vld [vmem:[%s15348_s0 + $0xc20] sm:$0xff]  ;;  %v509_v59 = vld [vmem:[%s15348_s0 + $0xe08] sm:$0xff] }
 0x1e4   :  { %6802 = vmatpush1.bf16.msra.mxu1 %v11228_v42 }
 0x1e5   :  { %6803 = vmatprep.subr.bf16.mxu1 %v11236_v60  ;;  %5514 = vmatpush1.bf16.msra.mxu0 %v11237_v27  ;;  %v428_v60 = vld [vmem:[%s15348_s0 + $0xb80] sm:$0xff] }
 0x1e6   :  { %6717 = vmatmul.mubr.bf16.gmra.mrb[80].mxu1 %v12596_v13  ;;  %v449_v13 = vld [vmem:[%s15348_s0 + $0xc28] sm:$0xff]  ;;  %5515 = vmatprep.subr.bf16.mxu0 %v11242_v8  ;;  %v13244_v27 = vpack.c.bf16 %v448_v51, %v428_v60  ;;  %v111_v60 = vld [vmem:[%s15348_s0 + $0x198] sm:$0xff] }
 0x1e7   :  { %5429 = vmatmul.mubr.bf16.gmra.mrb[28].mxu0 %v13204_v4  ;;  %6726 = vmatprep.mubr.bf16.mxu1 %v12598_v57  ;;  %v13226_v42 = vpack.c.bf16 %v449_v13, %v429_v26  ;;  %v11272_v57 = vld [vmem:[#allocation2 + $0xc04] ss:$16 sps:$4 sm:$0xff]  }
 0x1e8   :  { %5438 = vmatprep.mubr.bf16.mxu0 %v13206_v25  ;;  %6804 = vmatpush1.bf16.msra.mxu1 %v11234_v37  ;;  %v469_v37 = vld [vmem:[%s15348_s0 + $0xcc8] sm:$0xff]  ;;  %v528_v13 = vld [vmem:[%s15348_s0 + $0xea0] sm:$0xff] }
 0x1e9   :  { %6805 = vmatprep.subr.bf16.mxu1 %v11245_v49  ;;  %5516 = vmatpush1.bf16.msra.mxu0 %v11240_v32  ;;  %v488_v49 = vld [vmem:[%s15348_s0 + $0xd60] sm:$0xff]  ;;  %v549_v32 = vld [vmem:[%s15348_s0 + $0xf48] sm:$0xff] }
 0x1ea   :  { %5517 = vmatprep.subr.bf16.mxu0 %v11248_v34  ;;  %v13283_v34 = vpack.c.bf16 %v549_v32, %v549_v32  ;;  %v15448_v32 = vld [vmem:[#allocation16_spill] sm:$0xff] }
 0x1ec   :  { %6806 = vmatpush1.bf16.msra.mxu1 %v11243_v2 }
 0x1ed   :  { %6936 = vmatprep.subr.bf16.mxu1 %v11251_v22  ;;  %5518 = vmatpush1.bf16.msra.mxu0 %v11246_v43  ;;  %v91_v22 = vld [vmem:[%s15348_s0 + $0xf8] sm:$0xff] }
 0x1ee   :  { %6727 = vmatmul.mubr.bf16.gmra.mrb[84].mxu1 %v12616_v23  ;;  %v489_v23 = vld [vmem:[%s15348_s0 + $0xd68] sm:$0xff]  ;;  %5648 = vmatprep.subr.bf16.mxu0 %v11272_v57 }
 0x1ef   :  { %5439 = vmatmul.mubr.bf16.gmra.mrb[32].mxu0 %v13224_v39  ;;  %6736 = vmatprep.mubr.bf16.mxu1 %v12618_v11  ;;  %v13246_v8 = vpack.c.bf16 %v489_v23, %v469_v37  ;;  %v468_v11 = vld [vmem:[%s15348_s0 + $0xcc0] sm:$0xff]  ;;  %v11249_v37 = vld [vmem:[#allocation2 + $0x808] ss:$16 sps:$4 sm:$0xff]   ;;  %v11254_v23 = vld [vmem:[#allocation2 + $0x82c] ss:$16 sps:$4 sm:$0xff]  }
 0x1f0   :  { %5448 = vmatprep.mubr.bf16.mxu0 %v13226_v42  ;;  %v13264_v24 = vpack.c.bf16 %v488_v49, %v468_v11  ;;  %v11270_v11 = vld [vmem:[#allocation2 + $0xc00] ss:$16 sps:$4 sm:$0xff]   ;;  %v15447_v49 = vld [vmem:[#allocation15_spill] sm:$0xff] }
 0x1f6   :  { %6737 = vmatmul.mubr.bf16.gmra.mrb[88].mxu1 %v12636_v1  ;;  %v529_v1 = vld [vmem:[%s15348_s0 + $0xea8] sm:$0xff] }
 0x1f7   :  { %5449 = vmatmul.mubr.bf16.gmra.mrb[36].mxu0 %v13244_v27  ;;  %6746 = vmatprep.mubr.bf16.mxu1 %v12638_v31  ;;  %v13266_v26 = vpack.c.bf16 %v529_v1, %v509_v59  ;;  %v508_v31 = vld [vmem:[%s15348_s0 + $0xe00] sm:$0xff]  ;;  %v11252_v1 = vld [vmem:[#allocation2 + $0x828] ss:$16 sps:$4 sm:$0xff]  }
 0x1f8   :  { %5458 = vmatprep.mubr.bf16.mxu0 %v13246_v8  ;;  %v13281_v2 = vpack.c.bf16 %v528_v13, %v508_v31  ;;  %v11275_v59 = vld [vmem:[#allocation2 + $0xc24] ss:$16 sps:$4 sm:$0xff]  }
 0x1f9   :  { %v110_v31 = vld [vmem:[%s15348_s0 + $0x190] sm:$0xff] }
 0x1fa   :  { %v130_v13 = vld [vmem:[%s15348_s0 + $0x230] sm:$0xff] }
 0x1fe   :  { %6747 = vmatmul.mubr.bf16.gmra.mrb[92].mxu1 %v12656_v50  ;;  %v548_v50 = vld [vmem:[%s15348_s0 + $0xf40] sm:$0xff] }
 0x1ff   :  { %5459 = vmatmul.mubr.bf16.gmra.mrb[40].mxu0 %v13264_v24  ;;  %6756 = vmatprep.mubr.bf16.mxu1 %v12658_v3  ;;  %v71_v3 = vld [vmem:[%s15348_s0 + $0x58] sm:$0xff]  ;;  %v13298_v43 = vpack.c.bf16 %v548_v50, %v548_v50 }
 0x200   :  { %5468 = vmatprep.mubr.bf16.mxu0 %v13266_v26  ;;  %v13300_v57 = vpack.c.bf16 %v91_v22, %v71_v3  ;;  %v11257_v50 = vld [vmem:[#allocation2 + $0x84c] ss:$16 sps:$4 sm:$0xff]  }
 0x201   :  { %v151_v3 = vld [vmem:[%s15348_s0 + $0x2d8] sm:$0xff] }
 0x202   :  { %v171_v22 = vld [vmem:[%s15348_s0 + $0x378] sm:$0xff] }
 0x206   :  { %6757 = vmatmul.mubr.bf16.gmra.mrb[96].mxu1 %v12673_v18  ;;  %v70_v18 = vld [vmem:[%s15348_s0 + $0x50] sm:$0xff] }
 0x207   :  { %5469 = vmatmul.mubr.bf16.gmra.mrb[44].mxu0 %v13281_v2  ;;  %6766 = vmatprep.mubr.bf16.mxu1 %v12675_v55  ;;  %v90_v55 = vld [vmem:[%s15348_s0 + $0xf0] sm:$0xff] }
 0x208   :  { %5478 = vmatprep.mubr.bf16.mxu0 %v13283_v34  ;;  %v13318_v51 = vpack.c.bf16 %v90_v55, %v70_v18  ;;  %v11273_v18 = vld [vmem:[#allocation2 + $0xc20] ss:$16 sps:$4 sm:$0xff]   ;;  %v13338_v55 = vpack.c.bf16 %v130_v13, %v110_v31  ;;  %v11284_v31 = vld [vmem:[#allocation2 + $0xc64] ss:$16 sps:$4 sm:$0xff]   ;;  %v211_v13 = vld [vmem:[%s15348_s0 + $0x4b8] sm:$0xff] }
 0x20e   :  { %6767 = vmatmul.mubr.bf16.gmra.mrb[100].mxu1 %v12690_v21  ;;  %v131_v21 = vld [vmem:[%s15348_s0 + $0x238] sm:$0xff] }
 0x20f   :  { %5479 = vmatmul.mubr.bf16.gmra.mrb[48].mxu0 %v13298_v43  ;;  %6807 = vmatprep.mubr.bf16.mxu1 %v12692_v53  ;;  %v13320_v53 = vpack.c.bf16 %v131_v21, %v111_v60  ;;  %v11255_v60 = vld [vmem:[#allocation2 + $0x848] ss:$16 sps:$4 sm:$0xff]   ;;  %v13340_v21 = vpack.c.bf16 %v171_v22, %v151_v3 }
 0x210   :  { %5519 = vmatprep.mubr.bf16.mxu0 %v13300_v57  ;;  %v11261_v22 = vld [vmem:[#allocation2 + $0x888] ss:$16 sps:$4 sm:$0xff]  }
 0x216   :  { %6808 = vmatmul.mubr.bf16.vlgmr.msra.gmra.mrb[52].mxu1 %v15447_v49  ;;  %v11279_v49 = vld [vmem:[#allocation2 + $0xc40] ss:$16 sps:$4 sm:$0xff]  }
 0x217   :  { %5520 = vmatmul.mubr.bf16.vlgmr.msra.gmra.mrb[0].mxu0 %v13318_v51  ;;  %6937 = vmatpush1.bf16.msra.mxu1 %v11249_v37  ;;  %v11260_v37 = vld [vmem:[#allocation2 + $0x86c] ss:$16 sps:$4 sm:$0xff]  }
 0x218   :  { %5529 = vmatprep.mubr.bf16.mxu0 %v13320_v53  ;;  %6817 = vmatprep.mubr.bf16.mxu1 %v15448_v32  ;;  %v11263_v32 = vld [vmem:[#allocation2 + $0x88c] ss:$16 sps:$4 sm:$0xff]  }
 0x219   :  { %6938 = vmatprep.subr.bf16.mxu1 %v11254_v23  ;;  %5649 = vmatpush1.bf16.msra.mxu0 %v11270_v11  ;;  %v11281_v23 = vld [vmem:[#allocation2 + $0xc44] ss:$16 sps:$4 sm:$0xff]  }
 0x21a   :  { %5650 = vmatprep.subr.bf16.mxu0 %v11275_v59  ;;  %v150_v11 = vld [vmem:[%s15348_s0 + $0x2d0] sm:$0xff] }
 0x21b   :  { %6939 = vmatpush1.bf16.msra.mxu1 %v11252_v1  ;;  %v170_v59 = vld [vmem:[%s15348_s0 + $0x370] sm:$0xff]  ;;  %v11258_v1 = vld [vmem:[#allocation2 + $0x868] ss:$16 sps:$4 sm:$0xff]  }
 0x21c   :  { %6940 = vmatprep.subr.bf16.mxu1 %v11257_v50  ;;  %v13358_v50 = vpack.c.bf16 %v170_v59, %v150_v11  ;;  %v231_v11 = vld [vmem:[%s15348_s0 + $0x558] sm:$0xff] }
 0x21d   :  { %5651 = vmatpush1.bf16.msra.mxu0 %v11273_v18  ;;  %v11266_v18 = vld [vmem:[#allocation2 + $0x8ac] ss:$16 sps:$4 sm:$0xff]  }
 0x21e   :  { %6818 = vmatmul.mubr.bf16.gmra.mrb[56].mxu1 %v12734_v62  ;;  %v191_v62 = vld [vmem:[%s15348_s0 + $0x418] sm:$0xff]  ;;  %5652 = vmatprep.subr.bf16.mxu0 %v11281_v23  ;;  %v210_v23 = vld [vmem:[%s15348_s0 + $0x4b0] sm:$0xff] }
 0x21f   :  { %5530 = vmatmul.mubr.bf16.gmra.mrb[4].mxu0 %v13338_v55  ;;  %6941 = vmatpush1.bf16.msra.mxu1 %v11255_v60  ;;  %v13360_v3 = vpack.c.bf16 %v211_v13, %v191_v62  ;;  %v11290_v60 = vld [vmem:[#allocation2 + $0xc84] ss:$16 sps:$4 sm:$0xff]   ;;  %v11269_v59 = vld [vmem:[#allocation2 + $0x8cc] ss:$16 sps:$4 sm:$0xff]   ;;  %v11267_v13 = vld [vmem:[#allocation2 + $0x8c8] ss:$16 sps:$4 sm:$0xff]  }
 0x220   :  { %5539 = vmatprep.mubr.bf16.mxu0 %v13340_v21  ;;  %6827 = vmatprep.mubr.bf16.mxu1 %v12738_v29  ;;  %v11282_v29 = vld [vmem:[#allocation2 + $0xc60] ss:$16 sps:$4 sm:$0xff]  }
 0x221   :  { %6942 = vmatprep.subr.bf16.mxu1 %v11260_v37  ;;  %5653 = vmatpush1.bf16.msra.mxu0 %v11279_v49  ;;  %15449 = vst [vmem:[#allocation14_spill] sm:$0xff] %v13360_v3  ;;  %v190_v37 = vld [vmem:[%s15348_s0 + $0x410] sm:$0xff]  ;;  %v11264_v49 = vld [vmem:[#allocation2 + $0x8a8] ss:$16 sps:$4 sm:$0xff]  }
 0x222   :  { %5654 = vmatprep.subr.bf16.mxu0 %v11284_v31  ;;  %v13378_v31 = vpack.c.bf16 %v210_v23, %v190_v37  ;;  %v11276_v37 = vld [vmem:[#allocation2 + $0x8e8] ss:$16 sps:$4 sm:$0xff]   ;;  %v11287_v23 = vld [vmem:[#allocation2 + $0x90c] ss:$16 sps:$4 sm:$0xff]  }
 0x223   :  { %6943 = vmatpush1.bf16.msra.mxu1 %v11258_v1  ;;  %v11296_v1 = vld [vmem:[#allocation2 + $0xca4] ss:$16 sps:$4 sm:$0xff]  }
 0x224   :  { %6944 = vmatprep.subr.bf16.mxu1 %v11263_v32  ;;  %v11294_v32 = vld [vmem:[#allocation2 + $0xca0] ss:$16 sps:$4 sm:$0xff]  }
 0x225   :  { %5655 = vmatpush1.bf16.msra.mxu0 %v11282_v29  ;;  %v230_v29 = vld [vmem:[%s15348_s0 + $0x550] sm:$0xff] }
 0x226   :  { %6828 = vmatmul.mubr.bf16.gmra.mrb[60].mxu1 %v12762_v28  ;;  %v251_v28 = vld [vmem:[%s15348_s0 + $0x5f8] sm:$0xff]  ;;  %5656 = vmatprep.subr.bf16.mxu0 %v11290_v60 }
 0x227   :  { %5540 = vmatmul.mubr.bf16.gmra.mrb[8].mxu0 %v13358_v50  ;;  %6837 = vmatprep.mubr.bf16.mxu1 %v12766_v48  ;;  %v11288_v48 = vld [vmem:[#allocation2 + $0xc80] ss:$16 sps:$4 sm:$0xff]   ;;  %v13380_v62 = vpack.c.bf16 %v251_v28, %v231_v11  ;;  %v271_v60 = vld [vmem:[%s15348_s0 + $0x698] sm:$0xff]  ;;  %v11305_v11 = vld [vmem:[#allocation2 + $0xce4] ss:$16 sps:$4 sm:$0xff]  }
 0x228   :  { %5549 = vmatprep.mubr.bf16.mxu0 %v13360_v3  ;;  %6945 = vmatpush1.bf16.msra.mxu1 %v11261_v22  ;;  %v11278_v22 = vld [vmem:[#allocation2 + $0x8ec] ss:$16 sps:$4 sm:$0xff]   ;;  %v11299_v3 = vld [vmem:[#allocation2 + $0xcc4] ss:$16 sps:$4 sm:$0xff]  }
 0x229   :  { %6946 = vmatprep.subr.bf16.mxu1 %v11266_v18  ;;  %15450 = vst [vmem:[#allocation15_spill] sm:$0xff] %v13380_v62  ;;  %5657 = vmatpush1.bf16.msra.mxu0 %v11288_v48  ;;  %v250_v18 = vld [vmem:[%s15348_s0 + $0x5f0] sm:$0xff]  ;;  %v11285_v48 = vld [vmem:[#allocation2 + $0x908] ss:$16 sps:$4 sm:$0xff]  }
 0x22a   :  { %5658 = vmatprep.subr.bf16.mxu0 %v11296_v1  ;;  %v13398_v28 = vpack.c.bf16 %v250_v18, %v230_v29  ;;  %v11293_v1 = vld [vmem:[#allocation2 + $0x92c] ss:$16 sps:$4 sm:$0xff]   ;;  %v11314_v18 = vld [vmem:[#allocation2 + $0xd24] ss:$16 sps:$4 sm:$0xff]  }
 0x22b   :  { %v11302_v29 = vld [vmem:[#allocation2 + $0x94c] ss:$16 sps:$4 sm:$0xff]  }
 0x22c   :  { %6947 = vmatpush1.bf16.msra.mxu1 %v11264_v49 }
 0x22d   :  { %6948 = vmatprep.subr.bf16.mxu1 %v11269_v59  ;;  %5659 = vmatpush1.bf16.msra.mxu0 %v11294_v32  ;;  %v11303_v59 = vld [vmem:[#allocation2 + $0xce0] ss:$16 sps:$4 sm:$0xff]   ;;  %v311_v32 = vld [vmem:[%s15348_s0 + $0x7d8] sm:$0xff] }
 0x22e   :  { %6838 = vmatmul.mubr.bf16.gmra.mrb[64].mxu1 %v12790_v5  ;;  %v291_v5 = vld [vmem:[%s15348_s0 + $0x738] sm:$0xff]  ;;  %5660 = vmatprep.subr.bf16.mxu0 %v11299_v3  ;;  %v270_v3 = vld [vmem:[%s15348_s0 + $0x690] sm:$0xff] }
 0x22f   :  { %5550 = vmatmul.mubr.bf16.gmra.mrb[12].mxu0 %v13378_v31  ;;  %6847 = vmatprep.mubr.bf16.mxu1 %v12794_v41  ;;  %v11297_v41 = vld [vmem:[#allocation2 + $0xcc0] ss:$16 sps:$4 sm:$0xff]   ;;  %v13400_v49 = vpack.c.bf16 %v291_v5, %v271_v60 }
 0x230   :  { %5559 = vmatprep.mubr.bf16.mxu0 %v13380_v62  ;;  %6949 = vmatpush1.bf16.msra.mxu1 %v11267_v13  ;;  %v11308_v62 = vld [vmem:[#allocation2 + $0xd04] ss:$16 sps:$4 sm:$0xff]  }
 0x231   :  { %6950 = vmatprep.subr.bf16.mxu1 %v11278_v22  ;;  %5661 = vmatpush1.bf16.msra.mxu0 %v11297_v41  ;;  %v290_v13 = vld [vmem:[%s15348_s0 + $0x730] sm:$0xff]  ;;  %v11291_v22 = vld [vmem:[#allocation2 + $0x928] ss:$16 sps:$4 sm:$0xff]  }
 0x232   :  { %5662 = vmatprep.subr.bf16.mxu0 %v11305_v11  ;;  %v13418_v60 = vpack.c.bf16 %v290_v13, %v270_v3  ;;  %v11312_v41 = vld [vmem:[#allocation2 + $0xd20] ss:$16 sps:$4 sm:$0xff]   ;;  %v11320_v11 = vld [vmem:[#allocation2 + $0xd44] ss:$16 sps:$4 sm:$0xff]   ;;  %v11317_v3 = vld [vmem:[#allocation2 + $0x98c] ss:$16 sps:$4 sm:$0xff]  }
 0x233   :  { %v11323_v13 = vld [vmem:[#allocation2 + $0xd64] ss:$16 sps:$4 sm:$0xff]  }
 0x234   :  { %6951 = vmatpush1.bf16.msra.mxu1 %v11276_v37  ;;  %v11300_v37 = vld [vmem:[#allocation2 + $0x948] ss:$16 sps:$4 sm:$0xff]  }
 0x235   :  { %6952 = vmatprep.subr.bf16.mxu1 %v11287_v23  ;;  %5663 = vmatpush1.bf16.msra.mxu0 %v11303_v59  ;;  %v11311_v23 = vld [vmem:[#allocation2 + $0x96c] ss:$16 sps:$4 sm:$0xff]  }
 0x236   :  { %6848 = vmatmul.mubr.bf16.gmra.mrb[68].mxu1 %v12818_v52  ;;  %v331_v52 = vld [vmem:[%s15348_s0 + $0x878] sm:$0xff]  ;;  %5664 = vmatprep.subr.bf16.mxu0 %v11308_v62  ;;  %v310_v62 = vld [vmem:[%s15348_s0 + $0x7d0] sm:$0xff] }
 0x237   :  { %5560 = vmatmul.mubr.bf16.gmra.mrb[16].mxu0 %v13398_v28  ;;  %6857 = vmatprep.mubr.bf16.mxu1 %v12822_v58  ;;  %v11306_v58 = vld [vmem:[#allocation2 + $0xd00] ss:$16 sps:$4 sm:$0xff]   ;;  %v13420_v5 = vpack.c.bf16 %v331_v52, %v311_v32  ;;  %v351_v59 = vld [vmem:[%s15348_s0 + $0x918] sm:$0xff] }
 0x238   :  { %5569 = vmatprep.mubr.bf16.mxu0 %v13400_v49  ;;  %6953 = vmatpush1.bf16.msra.mxu1 %v11285_v48  ;;  %v330_v48 = vld [vmem:[%s15348_s0 + $0x870] sm:$0xff] }
 0x239   :  { %6954 = vmatprep.subr.bf16.mxu1 %v11293_v1  ;;  %5665 = vmatpush1.bf16.msra.mxu0 %v11306_v58  ;;  %v11309_v1 = vld [vmem:[#allocation2 + $0x968] ss:$16 sps:$4 sm:$0xff]   ;;  %v13438_v32 = vpack.c.bf16 %v330_v48, %v310_v62  ;;  %v11321_v58 = vld [vmem:[#allocation2 + $0xd60] ss:$16 sps:$4 sm:$0xff]   ;;  %v11332_v62 = vld [vmem:[#allocation2 + $0x9cc] ss:$16 sps:$4 sm:$0xff]  }
 0x23a   :  { %5666 = vmatprep.subr.bf16.mxu0 %v11314_v18  ;;  %v11329_v18 = vld [vmem:[#allocation2 + $0xd84] ss:$16 sps:$4 sm:$0xff]  }
 0x23b   :  { %v11335_v48 = vld [vmem:[#allocation2 + $0xda4] ss:$16 sps:$4 sm:$0xff]  }
 0x23c   :  { %6955 = vmatpush1.bf16.msra.mxu1 %v11291_v22  ;;  %v11315_v22 = vld [vmem:[#allocation2 + $0x988] ss:$16 sps:$4 sm:$0xff]  }
 0x23d   :  { %6956 = vmatprep.subr.bf16.mxu1 %v11302_v29  ;;  %5667 = vmatpush1.bf16.msra.mxu0 %v11312_v41  ;;  %v11326_v29 = vld [vmem:[#allocation2 + $0x9ac] ss:$16 sps:$4 sm:$0xff]   ;;  %v370_v41 = vld [vmem:[%s15348_s0 + $0x9b0] sm:$0xff] }
 0x23e   :  { %6858 = vmatmul.mubr.bf16.gmra.mrb[72].mxu1 %v12846_v45  ;;  %v371_v45 = vld [vmem:[%s15348_s0 + $0x9b8] sm:$0xff]  ;;  %5668 = vmatprep.subr.bf16.mxu0 %v11320_v11 }
 0x23f   :  { %5570 = vmatmul.mubr.bf16.gmra.mrb[20].mxu0 %v13418_v60  ;;  %6867 = vmatprep.mubr.bf16.mxu1 %v12850_v14  ;;  %v11318_v14 = vld [vmem:[#allocation2 + $0xd40] ss:$16 sps:$4 sm:$0xff]   ;;  %v13440_v52 = vpack.c.bf16 %v371_v45, %v351_v59  ;;  %v11324_v11 = vld [vmem:[#allocation2 + $0x9a8] ss:$16 sps:$4 sm:$0xff]  }
 0x240   :  { %5579 = vmatprep.mubr.bf16.mxu0 %v13420_v5  ;;  %6957 = vmatpush1.bf16.msra.mxu1 %v11300_v37  ;;  %v350_v37 = vld [vmem:[%s15348_s0 + $0x910] sm:$0xff] }
 0x241   :  { %6958 = vmatprep.subr.bf16.mxu1 %v11311_v23  ;;  %5669 = vmatpush1.bf16.msra.mxu0 %v11318_v14  ;;  %v391_v23 = vld [vmem:[%s15348_s0 + $0xa58] sm:$0xff]  ;;  %v13458_v59 = vpack.c.bf16 %v370_v41, %v350_v37  ;;  %v11333_v14 = vld [vmem:[#allocation2 + $0xda0] ss:$16 sps:$4 sm:$0xff]   ;;  %v11344_v37 = vld [vmem:[#allocation2 + $0xde4] ss:$16 sps:$4 sm:$0xff]  }
 0x242   :  { %5670 = vmatprep.subr.bf16.mxu0 %v11323_v13  ;;  %v11341_v13 = vld [vmem:[#allocation2 + $0x9ec] ss:$16 sps:$4 sm:$0xff]  }
 0x243   :  { %v11347_v41 = vld [vmem:[#allocation2 + $0xa0c] ss:$16 sps:$4 sm:$0xff]  }
 0x244   :  { %6959 = vmatpush1.bf16.msra.mxu1 %v11309_v1  ;;  %v11330_v1 = vld [vmem:[#allocation2 + $0x9c8] ss:$16 sps:$4 sm:$0xff]  }
 0x245   :  { %6960 = vmatprep.subr.bf16.mxu1 %v11317_v3  ;;  %5671 = vmatpush1.bf16.msra.mxu0 %v11321_v58  ;;  %v11338_v3 = vld [vmem:[#allocation2 + $0xdc4] ss:$16 sps:$4 sm:$0xff]  }
 0x246   :  { %6868 = vmatmul.mubr.bf16.gmra.mrb[76].mxu1 %v12874_v19  ;;  %v411_v19 = vld [vmem:[%s15348_s0 + $0xaf8] sm:$0xff]  ;;  %5672 = vmatprep.subr.bf16.mxu0 %v11329_v18  ;;  %v410_v58 = vld [vmem:[%s15348_s0 + $0xaf0] sm:$0xff] }
 0x247   :  { %5580 = vmatmul.mubr.bf16.gmra.mrb[24].mxu0 %v13438_v32  ;;  %6877 = vmatprep.mubr.bf16.mxu1 %v12878_v56  ;;  %v11327_v56 = vld [vmem:[#allocation2 + $0xd80] ss:$16 sps:$4 sm:$0xff]   ;;  %v13460_v45 = vpack.c.bf16 %v411_v19, %v391_v23 }
 0x248   :  { %5589 = vmatprep.mubr.bf16.mxu0 %v13440_v52  ;;  %6961 = vmatpush1.bf16.msra.mxu1 %v11315_v22  ;;  %v390_v22 = vld [vmem:[%s15348_s0 + $0xa50] sm:$0xff] }
 0x249   :  { %6962 = vmatprep.subr.bf16.mxu1 %v11326_v29  ;;  %5673 = vmatpush1.bf16.msra.mxu0 %v11327_v56  ;;  %v431_v29 = vld [vmem:[%s15348_s0 + $0xb98] sm:$0xff]  ;;  %v11336_v18 = vld [vmem:[#allocation2 + $0xdc0] ss:$16 sps:$4 sm:$0xff]   ;;  %v13478_v23 = vpack.c.bf16 %v410_v58, %v390_v22  ;;  %v11368_v56 = vld [vmem:[#allocation2 + $0xe04] ss:$16 sps:$4 sm:$0xff]  }
 0x24a   :  { %5674 = vmatprep.subr.bf16.mxu0 %v11335_v48  ;;  %v450_v48 = vld [vmem:[%s15348_s0 + $0xc30] sm:$0xff]  ;;  %v511_v22 = vld [vmem:[%s15348_s0 + $0xe18] sm:$0xff] }
 0x24c   :  { %6963 = vmatpush1.bf16.msra.mxu1 %v11324_v11  ;;  %v11342_v11 = vld [vmem:[#allocation2 + $0xde0] ss:$16 sps:$4 sm:$0xff]  }
 0x24d   :  { %6964 = vmatprep.subr.bf16.mxu1 %v11332_v62  ;;  %5675 = vmatpush1.bf16.msra.mxu0 %v11333_v14  ;;  %v430_v62 = vld [vmem:[%s15348_s0 + $0xb90] sm:$0xff] }
 0x24e   :  { %6878 = vmatmul.mubr.bf16.gmra.mrb[80].mxu1 %v12902_v40  ;;  %v451_v40 = vld [vmem:[%s15348_s0 + $0xc38] sm:$0xff]  ;;  %5676 = vmatprep.subr.bf16.mxu0 %v11338_v3  ;;  %v13498_v14 = vpack.c.bf16 %v450_v48, %v430_v62  ;;  %v470_v3 = vld [vmem:[%s15348_s0 + $0xcd0] sm:$0xff]  ;;  %v113_v62 = vld [vmem:[%s15348_s0 + $0x1a8] sm:$0xff] }
 0x24f   :  { %5590 = vmatmul.mubr.bf16.gmra.mrb[28].mxu0 %v13458_v59  ;;  %6887 = vmatprep.mubr.bf16.mxu1 %v12906_v12  ;;  %v11339_v12 = vld [vmem:[#allocation2 + $0x9e8] ss:$16 sps:$4 sm:$0xff]   ;;  %v13480_v19 = vpack.c.bf16 %v451_v40, %v431_v29  ;;  %v530_v40 = vld [vmem:[%s15348_s0 + $0xeb0] sm:$0xff] }
 0x250   :  { %5599 = vmatprep.mubr.bf16.mxu0 %v13460_v45  ;;  %6965 = vmatpush1.bf16.msra.mxu1 %v11330_v1  ;;  %v471_v1 = vld [vmem:[%s15348_s0 + $0xcd8] sm:$0xff] }
 0x251   :  { %6966 = vmatprep.subr.bf16.mxu1 %v11341_v13  ;;  %5677 = vmatpush1.bf16.msra.mxu0 %v11336_v18  ;;  %v490_v13 = vld [vmem:[%s15348_s0 + $0xd70] sm:$0xff]  ;;  %v551_v18 = vld [vmem:[%s15348_s0 + $0xf58] sm:$0xff] }
 0x252   :  { %5678 = vmatprep.subr.bf16.mxu0 %v11344_v37  ;;  %v13518_v58 = vpack.c.bf16 %v490_v13, %v470_v3  ;;  %v13537_v37 = vpack.c.bf16 %v551_v18, %v551_v18  ;;  %v11366_v3 = vld [vmem:[#allocation2 + $0xe00] ss:$16 sps:$4 sm:$0xff]   ;;  %v11371_v13 = vld [vmem:[#allocation2 + $0xe24] ss:$16 sps:$4 sm:$0xff]   ;;  %v173_v18 = vld [vmem:[%s15348_s0 + $0x388] sm:$0xff] }
 0x254   :  { %6967 = vmatpush1.bf16.msra.mxu1 %v11339_v12 }
 0x255   :  { %7097 = vmatprep.subr.bf16.mxu1 %v11347_v41  ;;  %5679 = vmatpush1.bf16.msra.mxu0 %v11342_v11  ;;  %v93_v41 = vld [vmem:[%s15348_s0 + $0x108] sm:$0xff] }
 0x256   :  { %6888 = vmatmul.mubr.bf16.gmra.mrb[84].mxu1 %v12930_v54  ;;  %v491_v54 = vld [vmem:[%s15348_s0 + $0xd78] sm:$0xff]  ;;  %5809 = vmatprep.subr.bf16.mxu0 %v11368_v56 }
 0x257   :  { %5600 = vmatmul.mubr.bf16.gmra.mrb[32].mxu0 %v13478_v23  ;;  %6897 = vmatprep.mubr.bf16.mxu1 %v12934_v6  ;;  %v13500_v6 = vpack.c.bf16 %v491_v54, %v471_v1  ;;  %v11345_v1 = vld [vmem:[#allocation2 + $0xa08] ss:$16 sps:$4 sm:$0xff]   ;;  %v11350_v54 = vld [vmem:[#allocation2 + $0xa2c] ss:$16 sps:$4 sm:$0xff]  }
 0x258   :  { %5609 = vmatprep.mubr.bf16.mxu0 %v13480_v19 }
 0x25e   :  { %6898 = vmatmul.mubr.bf16.gmra.mrb[88].mxu1 %v12958_v0  ;;  %v531_v0 = vld [vmem:[%s15348_s0 + $0xeb8] sm:$0xff] }
 0x25f   :  { %5610 = vmatmul.mubr.bf16.gmra.mrb[36].mxu0 %v13498_v14  ;;  %6907 = vmatprep.mubr.bf16.mxu1 %v12962_v7  ;;  %v13520_v29 = vpack.c.bf16 %v531_v0, %v511_v22  ;;  %v510_v7 = vld [vmem:[%s15348_s0 + $0xe10] sm:$0xff]  ;;  %v11348_v22 = vld [vmem:[#allocation2 + $0xa28] ss:$16 sps:$4 sm:$0xff]   ;;  %v112_v0 = vld [vmem:[%s15348_s0 + $0x1a0] sm:$0xff] }
 0x260   :  { %5619 = vmatprep.mubr.bf16.mxu0 %v13500_v6  ;;  %v13535_v12 = vpack.c.bf16 %v530_v40, %v510_v7  ;;  %v132_v7 = vld [vmem:[%s15348_s0 + $0x240] sm:$0xff]  ;;  %v11353_v40 = vld [vmem:[#allocation2 + $0xa4c] ss:$16 sps:$4 sm:$0xff]  }
 0x266   :  { %6908 = vmatmul.mubr.bf16.gmra.mrb[92].mxu1 %v12986_v10  ;;  %v550_v10 = vld [vmem:[%s15348_s0 + $0xf50] sm:$0xff] }
 0x267   :  { %5620 = vmatmul.mubr.bf16.gmra.mrb[40].mxu0 %v13518_v58  ;;  %6917 = vmatprep.mubr.bf16.mxu1 %v12990_v16  ;;  %v73_v16 = vld [vmem:[%s15348_s0 + $0x68] sm:$0xff]  ;;  %v13552_v11 = vpack.c.bf16 %v550_v10, %v550_v10  ;;  %v11369_v10 = vld [vmem:[#allocation2 + $0xe20] ss:$16 sps:$4 sm:$0xff]  }
 0x268   :  { %5629 = vmatprep.mubr.bf16.mxu0 %v13520_v29  ;;  %v13554_v56 = vpack.c.bf16 %v93_v41, %v73_v16  ;;  %v13592_v16 = vpack.c.bf16 %v132_v7, %v112_v0  ;;  %v11351_v41 = vld [vmem:[#allocation2 + $0xa48] ss:$16 sps:$4 sm:$0xff]  }
 0x269   :  { %v193_v0 = vld [vmem:[%s15348_s0 + $0x428] sm:$0xff] }
 0x26a   :  { %v213_v7 = vld [vmem:[%s15348_s0 + $0x4c8] sm:$0xff] }
 0x26e   :  { %6918 = vmatmul.mubr.bf16.gmra.mrb[96].mxu1 %v13011_v33  ;;  %v72_v33 = vld [vmem:[%s15348_s0 + $0x60] sm:$0xff] }
 0x26f   :  { %5630 = vmatmul.mubr.bf16.gmra.mrb[44].mxu0 %v13535_v12  ;;  %6927 = vmatprep.mubr.bf16.mxu1 %v13015_v47  ;;  %v92_v47 = vld [vmem:[%s15348_s0 + $0x100] sm:$0xff] }
 0x270   :  { %5639 = vmatprep.mubr.bf16.mxu0 %v13537_v37  ;;  %v13572_v48 = vpack.c.bf16 %v92_v47, %v72_v33  ;;  %v11377_v47 = vld [vmem:[#allocation2 + $0xe44] ss:$16 sps:$4 sm:$0xff]  }
 0x276   :  { %6928 = vmatmul.mubr.bf16.gmra.mrb[100].mxu1 %v13036_v61  ;;  %v133_v61 = vld [vmem:[%s15348_s0 + $0x248] sm:$0xff] }
 0x277   :  { %5640 = vmatmul.mubr.bf16.gmra.mrb[48].mxu0 %v13552_v11  ;;  %6968 = vmatprep.mubr.bf16.mxu1 %v13040_v17  ;;  %v13574_v17 = vpack.c.bf16 %v133_v61, %v113_v62  ;;  %v15451_v62 = vld [vmem:[#allocation10_spill] sm:$0xff]  ;;  %v152_v61 = vld [vmem:[%s15348_s0 + $0x2e0] sm:$0xff] }
 0x278   :  { %5680 = vmatprep.mubr.bf16.mxu0 %v13554_v56 }
 0x27e   :  { %6969 = vmatmul.mubr.bf16.vlgmr.msra.gmra.mrb[52].mxu1 %v13064_v35  ;;  %v153_v35 = vld [vmem:[%s15348_s0 + $0x2e8] sm:$0xff] }
 0x27f   :  { %5681 = vmatmul.mubr.bf16.vlgmr.msra.gmra.mrb[0].mxu0 %v13572_v48  ;;  %7098 = vmatpush1.bf16.msra.mxu1 %v11345_v1  ;;  %v13594_v33 = vpack.c.bf16 %v173_v18, %v153_v35  ;;  %v11375_v1 = vld [vmem:[#allocation2 + $0xe40] ss:$16 sps:$4 sm:$0xff]   ;;  %v13614_v18 = vpack.c.bf16 %v213_v7, %v193_v0  ;;  %v11392_v0 = vld [vmem:[#allocation2 + $0xea4] ss:$16 sps:$4 sm:$0xff]  }
 0x280   :  { %5690 = vmatprep.mubr.bf16.mxu0 %v13574_v17  ;;  %6978 = vmatprep.mubr.bf16.mxu1 %v13066_v46  ;;  %v11356_v46 = vld [vmem:[#allocation2 + $0xa6c] ss:$16 sps:$4 sm:$0xff]  }
 0x281   :  { %7099 = vmatprep.subr.bf16.mxu1 %v11350_v54  ;;  %5810 = vmatpush1.bf16.msra.mxu0 %v11366_v3  ;;  %v172_v54 = vld [vmem:[%s15348_s0 + $0x380] sm:$0xff]  ;;  %v11354_v3 = vld [vmem:[#allocation2 + $0xa68] ss:$16 sps:$4 sm:$0xff]   ;;  %15454 = vst [vmem:[#allocation10_spill] sm:$0xff] %v13614_v18 }
 0x282   :  { %5811 = vmatprep.subr.bf16.mxu0 %v11371_v13  ;;  %v11380_v13 = vld [vmem:[#allocation2 + $0xe64] ss:$16 sps:$4 sm:$0xff]   ;;  %v13612_v35 = vpack.c.bf16 %v172_v54, %v152_v61  ;;  %v11360_v54 = vld [vmem:[#allocation2 + $0xaa8] ss:$16 sps:$4 sm:$0xff]  }
 0x283   :  { %7100 = vmatpush1.bf16.msra.mxu1 %v11348_v22  ;;  %v15452_v22 = vld [vmem:[#allocation11_spill] sm:$0xff]  ;;  %v212_v61 = vld [vmem:[%s15348_s0 + $0x4c0] sm:$0xff] }
 0x284   :  { %7101 = vmatprep.subr.bf16.mxu1 %v11353_v40  ;;  %v11359_v40 = vld [vmem:[#allocation2 + $0xa8c] ss:$16 sps:$4 sm:$0xff]   ;;  %15453 = vst [vmem:[#allocation16_spill] sm:$0xff] %v13612_v35 }
 0x285   :  { %5812 = vmatpush1.bf16.msra.mxu0 %v11369_v10  ;;  %v11357_v10 = vld [vmem:[#allocation2 + $0xa88] ss:$16 sps:$4 sm:$0xff]  }
 0x286   :  { %6979 = vmatmul.mubr.bf16.gmra.mrb[56].mxu1 %v15451_v62  ;;  %5813 = vmatprep.subr.bf16.mxu0 %v11377_v47  ;;  %v11386_v62 = vld [vmem:[#allocation2 + $0xe84] ss:$16 sps:$4 sm:$0xff]  }
 0x287   :  { %5691 = vmatmul.mubr.bf16.gmra.mrb[4].mxu0 %v13592_v16  ;;  %7102 = vmatpush1.bf16.msra.mxu1 %v11351_v41  ;;  %v11378_v41 = vld [vmem:[#allocation2 + $0xe60] ss:$16 sps:$4 sm:$0xff]  }
 0x288   :  { %5700 = vmatprep.mubr.bf16.mxu0 %v13594_v33  ;;  %6988 = vmatprep.mubr.bf16.mxu1 %v15452_v22  ;;  %v15455_v22 = vld [vmem:[#allocation12_spill] sm:$0xff] }
 0x289   :  { %7103 = vmatprep.subr.bf16.mxu1 %v11356_v46  ;;  %5814 = vmatpush1.bf16.msra.mxu0 %v11375_v1  ;;  %v11362_v46 = vld [vmem:[#allocation2 + $0xaac] ss:$16 sps:$4 sm:$0xff]   ;;  %v192_v47 = vld [vmem:[%s15348_s0 + $0x420] sm:$0xff] }
 0x28a   :  { %5815 = vmatprep.subr.bf16.mxu0 %v11380_v13  ;;  %v233_v1 = vld [vmem:[%s15348_s0 + $0x568] sm:$0xff]  ;;  %v13632_v7 = vpack.c.bf16 %v212_v61, %v192_v47 }
 0x28b   :  { %7104 = vmatpush1.bf16.msra.mxu1 %v11354_v3  ;;  %v11384_v3 = vld [vmem:[#allocation2 + $0xe80] ss:$16 sps:$4 sm:$0xff]   ;;  %v11365_v13 = vld [vmem:[#allocation2 + $0xacc] ss:$16 sps:$4 sm:$0xff]   ;;  %v11372_v61 = vld [vmem:[#allocation2 + $0xae8] ss:$16 sps:$4 sm:$0xff]  }
 0x28c   :  { %7105 = vmatprep.subr.bf16.mxu1 %v11359_v40  ;;  %15456 = vst [vmem:[#allocation11_spill] sm:$0xff] %v13632_v7  ;;  %v273_v47 = vld [vmem:[%s15348_s0 + $0x6a8] sm:$0xff] }
 0x28d   :  { %5816 = vmatpush1.bf16.msra.mxu0 %v11378_v41  ;;  %v15458_v41 = vld [vmem:[#allocation13_spill] sm:$0xff] }
 0x28e   :  { %6989 = vmatmul.mubr.bf16.gmra.mrb[60].mxu1 %v13104_v30  ;;  %v253_v30 = vld [vmem:[%s15348_s0 + $0x608] sm:$0xff]  ;;  %5817 = vmatprep.subr.bf16.mxu0 %v11386_v62  ;;  %v252_v62 = vld [vmem:[%s15348_s0 + $0x600] sm:$0xff] }
 0x28f   :  { %5701 = vmatmul.mubr.bf16.gmra.mrb[8].mxu0 %v13612_v35  ;;  %6998 = vmatprep.mubr.bf16.mxu1 %v15455_v22  ;;  %v13634_v40 = vpack.c.bf16 %v253_v30, %v233_v1  ;;  %v11363_v22 = vld [vmem:[#allocation2 + $0xac8] ss:$16 sps:$4 sm:$0xff]   ;;  %v11395_v35 = vld [vmem:[#allocation2 + $0xec4] ss:$16 sps:$4 sm:$0xff]   ;;  %v11393_v1 = vld [vmem:[#allocation2 + $0xec0] ss:$16 sps:$4 sm:$0xff]  }
 0x290   :  { %5710 = vmatprep.mubr.bf16.mxu0 %v13614_v18  ;;  %7106 = vmatpush1.bf16.msra.mxu1 %v11357_v10  ;;  %v11390_v18 = vld [vmem:[#allocation2 + $0xea0] ss:$16 sps:$4 sm:$0xff]   ;;  %v11374_v10 = vld [vmem:[#allocation2 + $0xaec] ss:$16 sps:$4 sm:$0xff]  }
 0x291   :  { %7107 = vmatprep.subr.bf16.mxu1 %v11362_v46  ;;  %15457 = vst [vmem:[#allocation12_spill] sm:$0xff] %v13634_v40  ;;  %5818 = vmatpush1.bf16.msra.mxu0 %v11384_v3  ;;  %v232_v46 = vld [vmem:[%s15348_s0 + $0x560] sm:$0xff]  ;;  %v11383_v30 = vld [vmem:[#allocation2 + $0xb0c] ss:$16 sps:$4 sm:$0xff]  }
 0x292   :  { %5819 = vmatprep.subr.bf16.mxu0 %v11392_v0  ;;  %v13652_v3 = vpack.c.bf16 %v252_v62, %v232_v46  ;;  %v11381_v0 = vld [vmem:[#allocation2 + $0xb08] ss:$16 sps:$4 sm:$0xff]   ;;  %v11398_v46 = vld [vmem:[#allocation2 + $0xb4c] ss:$16 sps:$4 sm:$0xff]   ;;  %v11410_v62 = vld [vmem:[#allocation2 + $0xf24] ss:$16 sps:$4 sm:$0xff]  }
 0x294   :  { %7108 = vmatpush1.bf16.msra.mxu1 %v11360_v54  ;;  %v11401_v54 = vld [vmem:[#allocation2 + $0xee4] ss:$16 sps:$4 sm:$0xff]  }
 0x295   :  { %7109 = vmatprep.subr.bf16.mxu1 %v11365_v13  ;;  %5820 = vmatpush1.bf16.msra.mxu0 %v11390_v18  ;;  %v292_v18 = vld [vmem:[%s15348_s0 + $0x740] sm:$0xff] }
 0x296   :  { %6999 = vmatmul.mubr.bf16.gmra.mrb[64].mxu1 %v13124_v15  ;;  %v293_v15 = vld [vmem:[%s15348_s0 + $0x748] sm:$0xff]  ;;  %5821 = vmatprep.subr.bf16.mxu0 %v11395_v35  ;;  %v272_v35 = vld [vmem:[%s15348_s0 + $0x6a0] sm:$0xff] }
 0x297   :  { %5711 = vmatmul.mubr.bf16.gmra.mrb[12].mxu0 %v13632_v7  ;;  %7008 = vmatprep.mubr.bf16.mxu1 %v15458_v41  ;;  %v13654_v13 = vpack.c.bf16 %v293_v15, %v273_v47  ;;  %v11399_v41 = vld [vmem:[#allocation2 + $0xee0] ss:$16 sps:$4 sm:$0xff]   ;;  %v11404_v7 = vld [vmem:[#allocation2 + $0xf04] ss:$16 sps:$4 sm:$0xff]   ;;  %v13672_v47 = vpack.c.bf16 %v292_v18, %v272_v35  ;;  %v11413_v35 = vld [vmem:[#allocation2 + $0xb8c] ss:$16 sps:$4 sm:$0xff]  }
 0x298   :  { %5720 = vmatprep.mubr.bf16.mxu0 %v13634_v40  ;;  %7110 = vmatpush1.bf16.msra.mxu1 %v11363_v22  ;;  %v11389_v40 = vld [vmem:[#allocation2 + $0xb2c] ss:$16 sps:$4 sm:$0xff]   ;;  %v11419_v18 = vld [vmem:[#allocation2 + $0xf64] ss:$16 sps:$4 sm:$0xff]  }
 0x299   :  { %7111 = vmatprep.subr.bf16.mxu1 %v11374_v10  ;;  %5822 = vmatpush1.bf16.msra.mxu0 %v11393_v1  ;;  %v313_v22 = vld [vmem:[%s15348_s0 + $0x7e8] sm:$0xff]  ;;  %v11408_v1 = vld [vmem:[#allocation2 + $0xf20] ss:$16 sps:$4 sm:$0xff]  }
 0x29a   :  { %5823 = vmatprep.subr.bf16.mxu0 %v11401_v54  ;;  %v11387_v10 = vld [vmem:[#allocation2 + $0xb28] ss:$16 sps:$4 sm:$0xff]   ;;  %v11416_v54 = vld [vmem:[#allocation2 + $0xf44] ss:$16 sps:$4 sm:$0xff]  }
 0x29c   :  { %7112 = vmatpush1.bf16.msra.mxu1 %v11372_v61  ;;  %v11396_v61 = vld [vmem:[#allocation2 + $0xb48] ss:$16 sps:$4 sm:$0xff]  }
 0x29d   :  { %7113 = vmatprep.subr.bf16.mxu1 %v11383_v30  ;;  %5824 = vmatpush1.bf16.msra.mxu0 %v11399_v41  ;;  %v11407_v30 = vld [vmem:[#allocation2 + $0xb6c] ss:$16 sps:$4 sm:$0xff]   ;;  %v11405_v41 = vld [vmem:[#allocation2 + $0xb68] ss:$16 sps:$4 sm:$0xff]  }
 0x29e   :  { %7009 = vmatmul.mubr.bf16.gmra.mrb[68].mxu1 %v13144_v63  ;;  %v333_v63 = vld [vmem:[%s15348_s0 + $0x888] sm:$0xff]  ;;  %5825 = vmatprep.subr.bf16.mxu0 %v11404_v7  ;;  %v312_v7 = vld [vmem:[%s15348_s0 + $0x7e0] sm:$0xff] }
 0x29f   :  { %5721 = vmatmul.mubr.bf16.gmra.mrb[16].mxu0 %v13652_v3  ;;  %7018 = vmatprep.mubr.bf16.mxu1 %v13146_v44  ;;  %v11402_v44 = vld [vmem:[#allocation2 + $0xf00] ss:$16 sps:$4 sm:$0xff]   ;;  %v13674_v15 = vpack.c.bf16 %v333_v63, %v313_v22 }
 0x2a0   :  { %5730 = vmatprep.mubr.bf16.mxu0 %v13654_v13  ;;  %7114 = vmatpush1.bf16.msra.mxu1 %v11381_v0  ;;  %v353_v0 = vld [vmem:[%s15348_s0 + $0x928] sm:$0xff] }
 0x2a1   :  { %7115 = vmatprep.subr.bf16.mxu1 %v11389_v40  ;;  %5826 = vmatpush1.bf16.msra.mxu0 %v11402_v44  ;;  %v332_v40 = vld [vmem:[%s15348_s0 + $0x880] sm:$0xff] }
 0x2a2   :  { %5827 = vmatprep.subr.bf16.mxu0 %v11410_v62  ;;  %v13692_v22 = vpack.c.bf16 %v332_v40, %v312_v7  ;;  %v11417_v44 = vld [vmem:[#allocation2 + $0xf60] ss:$16 sps:$4 sm:$0xff]   ;;  %v11425_v62 = vld [vmem:[#allocation2 + $0xf84] ss:$16 sps:$4 sm:$0xff]   ;;  %v11428_v7 = vld [vmem:[#allocation2 + $0xbcc] ss:$16 sps:$4 sm:$0xff]  }
 0x2a3   :  { %v11431_v40 = vld [vmem:[#allocation2 + $0xfa4] ss:$16 sps:$4 sm:$0xff]  }
 0x2a4   :  { %7116 = vmatpush1.bf16.msra.mxu1 %v11387_v10  ;;  %v11411_v10 = vld [vmem:[#allocation2 + $0xb88] ss:$16 sps:$4 sm:$0xff]  }
 0x2a5   :  { %7117 = vmatprep.subr.bf16.mxu1 %v11398_v46  ;;  %5828 = vmatpush1.bf16.msra.mxu0 %v11408_v1  ;;  %v11422_v46 = vld [vmem:[#allocation2 + $0xbac] ss:$16 sps:$4 sm:$0xff]   ;;  %v372_v1 = vld [vmem:[%s15348_s0 + $0x9c0] sm:$0xff] }
 0x2a6   :  { %7019 = vmatmul.mubr.bf16.gmra.mrb[72].mxu1 %v13164_v36  ;;  %v373_v36 = vld [vmem:[%s15348_s0 + $0x9c8] sm:$0xff]  ;;  %5829 = vmatprep.subr.bf16.mxu0 %v11416_v54 }
 0x2a7   :  { %5731 = vmatmul.mubr.bf16.gmra.mrb[20].mxu0 %v13672_v47  ;;  %7028 = vmatprep.mubr.bf16.mxu1 %v13166_v9  ;;  %v11414_v9 = vld [vmem:[#allocation2 + $0xf40] ss:$16 sps:$4 sm:$0xff]   ;;  %v13694_v63 = vpack.c.bf16 %v373_v36, %v353_v0  ;;  %v11420_v54 = vld [vmem:[#allocation2 + $0xba8] ss:$16 sps:$4 sm:$0xff]  }
 0x2a8   :  { %5740 = vmatprep.mubr.bf16.mxu0 %v13674_v15  ;;  %7118 = vmatpush1.bf16.msra.mxu1 %v11396_v61  ;;  %v352_v61 = vld [vmem:[%s15348_s0 + $0x920] sm:$0xff] }
 0x2a9   :  { %7119 = vmatprep.subr.bf16.mxu1 %v11407_v30  ;;  %5830 = vmatpush1.bf16.msra.mxu0 %v11414_v9  ;;  %v393_v30 = vld [vmem:[%s15348_s0 + $0xa68] sm:$0xff]  ;;  %v13712_v0 = vpack.c.bf16 %v372_v1, %v352_v61  ;;  %v11429_v9 = vld [vmem:[#allocation2 + $0xfa0] ss:$16 sps:$4 sm:$0xff]   ;;  %v11440_v61 = vld [vmem:[#allocation2 + $0xfe4] ss:$16 sps:$4 sm:$0xff]  }
 0x2aa   :  { %5831 = vmatprep.subr.bf16.mxu0 %v11419_v18  ;;  %v11437_v18 = vld [vmem:[#allocation2 + $0xbec] ss:$16 sps:$4 sm:$0xff]  }
 0x2ab   :  { %v11443_v1 = vld [vmem:[#allocation2 + $0xc0c] ss:$16 sps:$4 sm:$0xff]  }
 0x2ac   :  { %7120 = vmatpush1.bf16.msra.mxu1 %v11405_v41  ;;  %v11426_v41 = vld [vmem:[#allocation2 + $0xbc8] ss:$16 sps:$4 sm:$0xff]  }
 0x2ad   :  { %7121 = vmatprep.subr.bf16.mxu1 %v11413_v35  ;;  %5832 = vmatpush1.bf16.msra.mxu0 %v11417_v44  ;;  %v11434_v35 = vld [vmem:[#allocation2 + $0xfc4] ss:$16 sps:$4 sm:$0xff]  }
 0x2ae   :  { %7029 = vmatmul.mubr.bf16.gmra.mrb[76].mxu1 %v13184_v20  ;;  %v413_v20 = vld [vmem:[%s15348_s0 + $0xb08] sm:$0xff]  ;;  %5833 = vmatprep.subr.bf16.mxu0 %v11425_v62  ;;  %v412_v44 = vld [vmem:[%s15348_s0 + $0xb00] sm:$0xff] }
 0x2af   :  { %5741 = vmatmul.mubr.bf16.gmra.mrb[24].mxu0 %v13692_v22  ;;  %7038 = vmatprep.mubr.bf16.mxu1 %v13186_v38  ;;  %v11423_v38 = vld [vmem:[#allocation2 + $0xf80] ss:$16 sps:$4 sm:$0xff]   ;;  %v13714_v36 = vpack.c.bf16 %v413_v20, %v393_v30 }
 0x2b0   :  { %5750 = vmatprep.mubr.bf16.mxu0 %v13694_v63  ;;  %7122 = vmatpush1.bf16.msra.mxu1 %v11411_v10  ;;  %v392_v10 = vld [vmem:[%s15348_s0 + $0xa60] sm:$0xff] }
 0x2b1   :  { %7123 = vmatprep.subr.bf16.mxu1 %v11422_v46  ;;  %5834 = vmatpush1.bf16.msra.mxu0 %v11423_v38  ;;  %v433_v46 = vld [vmem:[%s15348_s0 + $0xba8] sm:$0xff]  ;;  %v11432_v62 = vld [vmem:[#allocation2 + $0xfc0] ss:$16 sps:$4 sm:$0xff]   ;;  %v13732_v30 = vpack.c.bf16 %v412_v44, %v392_v10  ;;  %v11464_v38 = vld [vmem:[#allocation2 + $0x1004] ss:$16 sps:$4 sm:$0xff]  }
 0x2b2   :  { %5835 = vmatprep.subr.bf16.mxu0 %v11431_v40  ;;  %v452_v40 = vld [vmem:[%s15348_s0 + $0xc40] sm:$0xff]  ;;  %v513_v10 = vld [vmem:[%s15348_s0 + $0xe28] sm:$0xff] }
 0x2b4   :  { %7124 = vmatpush1.bf16.msra.mxu1 %v11420_v54  ;;  %v11438_v54 = vld [vmem:[#allocation2 + $0xfe0] ss:$16 sps:$4 sm:$0xff]  }
 0x2b5   :  { %7125 = vmatprep.subr.bf16.mxu1 %v11428_v7  ;;  %5836 = vmatpush1.bf16.msra.mxu0 %v11429_v9  ;;  %v432_v7 = vld [vmem:[%s15348_s0 + $0xba0] sm:$0xff] }
 0x2b6   :  { %7039 = vmatmul.mubr.bf16.gmra.mrb[80].mxu1 %v13204_v4  ;;  %v453_v4 = vld [vmem:[%s15348_s0 + $0xc48] sm:$0xff]  ;;  %5837 = vmatprep.subr.bf16.mxu0 %v11434_v35  ;;  %v13752_v9 = vpack.c.bf16 %v452_v40, %v432_v7  ;;  %v472_v35 = vld [vmem:[%s15348_s0 + $0xce0] sm:$0xff]  ;;  %v115_v7 = vld [vmem:[%s15348_s0 + $0x1b8] sm:$0xff] }
 0x2b7   :  { %5751 = vmatmul.mubr.bf16.gmra.mrb[28].mxu0 %v13712_v0  ;;  %7048 = vmatprep.mubr.bf16.mxu1 %v13206_v25  ;;  %v11435_v25 = vld [vmem:[#allocation2 + $0xbe8] ss:$16 sps:$4 sm:$0xff]   ;;  %v13734_v20 = vpack.c.bf16 %v453_v4, %v433_v46  ;;  %v532_v4 = vld [vmem:[%s15348_s0 + $0xec0] sm:$0xff] }
 0x2b8   :  { %5760 = vmatprep.mubr.bf16.mxu0 %v13714_v36  ;;  %7126 = vmatpush1.bf16.msra.mxu1 %v11426_v41  ;;  %v473_v41 = vld [vmem:[%s15348_s0 + $0xce8] sm:$0xff] }
 0x2b9   :  { %7127 = vmatprep.subr.bf16.mxu1 %v11437_v18  ;;  %5838 = vmatpush1.bf16.msra.mxu0 %v11432_v62  ;;  %v492_v18 = vld [vmem:[%s15348_s0 + $0xd80] sm:$0xff]  ;;  %v553_v62 = vld [vmem:[%s15348_s0 + $0xf68] sm:$0xff] }
 0x2ba   :  { %5839 = vmatprep.subr.bf16.mxu0 %v11440_v61  ;;  %v13772_v44 = vpack.c.bf16 %v492_v18, %v472_v35  ;;  %v13791_v61 = vpack.c.bf16 %v553_v62, %v553_v62  ;;  %v11462_v35 = vld [vmem:[#allocation2 + $0x1000] ss:$16 sps:$4 sm:$0xff]   ;;  %v11467_v18 = vld [vmem:[#allocation2 + $0x1024] ss:$16 sps:$4 sm:$0xff]   ;;  %v175_v62 = vld [vmem:[%s15348_s0 + $0x398] sm:$0xff] }
 0x2bc   :  { %7128 = vmatpush1.bf16.msra.mxu1 %v11435_v25 }
 0x2bd   :  { %7258 = vmatprep.subr.bf16.mxu1 %v11443_v1  ;;  %5840 = vmatpush1.bf16.msra.mxu0 %v11438_v54  ;;  %v95_v1 = vld [vmem:[%s15348_s0 + $0x118] sm:$0xff] }
 0x2be   :  { %7049 = vmatmul.mubr.bf16.gmra.mrb[84].mxu1 %v13224_v39  ;;  %v493_v39 = vld [vmem:[%s15348_s0 + $0xd88] sm:$0xff]  ;;  %5970 = vmatprep.subr.bf16.mxu0 %v11464_v38 }
 0x2bf   :  { %5761 = vmatmul.mubr.bf16.gmra.mrb[32].mxu0 %v13732_v30  ;;  %7058 = vmatprep.mubr.bf16.mxu1 %v13226_v42  ;;  %v13754_v42 = vpack.c.bf16 %v493_v39, %v473_v41  ;;  %v11441_v41 = vld [vmem:[#allocation2 + $0xc08] ss:$16 sps:$4 sm:$0xff]   ;;  %v11446_v39 = vld [vmem:[#allocation2 + $0xc2c] ss:$16 sps:$4 sm:$0xff]  }
 0x2c0   :  { %5770 = vmatprep.mubr.bf16.mxu0 %v13734_v20 }
 0x2c6   :  { %7059 = vmatmul.mubr.bf16.gmra.mrb[88].mxu1 %v13244_v27  ;;  %v533_v27 = vld [vmem:[%s15348_s0 + $0xec8] sm:$0xff] }
 0x2c7   :  { %5771 = vmatmul.mubr.bf16.gmra.mrb[36].mxu0 %v13752_v9  ;;  %7068 = vmatprep.mubr.bf16.mxu1 %v13246_v8  ;;  %v13774_v46 = vpack.c.bf16 %v533_v27, %v513_v10  ;;  %v512_v8 = vld [vmem:[%s15348_s0 + $0xe20] sm:$0xff]  ;;  %v11444_v10 = vld [vmem:[#allocation2 + $0xc28] ss:$16 sps:$4 sm:$0xff]   ;;  %v114_v27 = vld [vmem:[%s15348_s0 + $0x1b0] sm:$0xff] }
 0x2c8   :  { %5780 = vmatprep.mubr.bf16.mxu0 %v13754_v42  ;;  %v13789_v25 = vpack.c.bf16 %v532_v4, %v512_v8  ;;  %v134_v8 = vld [vmem:[%s15348_s0 + $0x250] sm:$0xff]  ;;  %v11449_v4 = vld [vmem:[#allocation2 + $0xc4c] ss:$16 sps:$4 sm:$0xff]  }
 0x2ce   :  { %7069 = vmatmul.mubr.bf16.gmra.mrb[92].mxu1 %v13264_v24  ;;  %v552_v24 = vld [vmem:[%s15348_s0 + $0xf60] sm:$0xff] }
 0x2cf   :  { %5781 = vmatmul.mubr.bf16.gmra.mrb[40].mxu0 %v13772_v44  ;;  %7078 = vmatprep.mubr.bf16.mxu1 %v13266_v26  ;;  %v75_v26 = vld [vmem:[%s15348_s0 + $0x78] sm:$0xff]  ;;  %v13806_v54 = vpack.c.bf16 %v552_v24, %v552_v24  ;;  %v11465_v24 = vld [vmem:[#allocation2 + $0x1020] ss:$16 sps:$4 sm:$0xff]  }
 0x2d0   :  { %5790 = vmatprep.mubr.bf16.mxu0 %v13774_v46  ;;  %v13808_v38 = vpack.c.bf16 %v95_v1, %v75_v26  ;;  %v13846_v26 = vpack.c.bf16 %v134_v8, %v114_v27  ;;  %v11447_v1 = vld [vmem:[#allocation2 + $0xc48] ss:$16 sps:$4 sm:$0xff]  }
 0x2d6   :  { %7079 = vmatmul.mubr.bf16.gmra.mrb[96].mxu1 %v13281_v2  ;;  %v74_v2 = vld [vmem:[%s15348_s0 + $0x70] sm:$0xff] }
 0x2d7   :  { %5791 = vmatmul.mubr.bf16.gmra.mrb[44].mxu0 %v13789_v25  ;;  %7088 = vmatprep.mubr.bf16.mxu1 %v13283_v34  ;;  %v94_v34 = vld [vmem:[%s15348_s0 + $0x110] sm:$0xff] }
 0x2d8   :  { %5800 = vmatprep.mubr.bf16.mxu0 %v13791_v61  ;;  %v13826_v40 = vpack.c.bf16 %v94_v34, %v74_v2  ;;  %v11473_v34 = vld [vmem:[#allocation2 + $0x1044] ss:$16 sps:$4 sm:$0xff]  }
 0x2de   :  { %7089 = vmatmul.mubr.bf16.gmra.mrb[100].mxu1 %v13298_v43  ;;  %v135_v43 = vld [vmem:[%s15348_s0 + $0x258] sm:$0xff] }
 0x2df   :  { %5801 = vmatmul.mubr.bf16.gmra.mrb[48].mxu0 %v13806_v54  ;;  %7129 = vmatprep.mubr.bf16.mxu1 %v13300_v57  ;;  %v13828_v57 = vpack.c.bf16 %v135_v43, %v115_v7  ;;  %v154_v7 = vld [vmem:[%s15348_s0 + $0x2f0] sm:$0xff] }
 0x2e0   :  { %5841 = vmatprep.mubr.bf16.mxu0 %v13808_v38  ;;  %v11471_v43 = vld [vmem:[#allocation2 + $0x1040] ss:$16 sps:$4 sm:$0xff]  }
 0x2e6   :  { %7130 = vmatmul.mubr.bf16.vlgmr.msra.gmra.mrb[52].mxu1 %v13318_v51  ;;  %v155_v51 = vld [vmem:[%s15348_s0 + $0x2f8] sm:$0xff] }
 0x2e7   :  { %5842 = vmatmul.mubr.bf16.vlgmr.msra.gmra.mrb[0].mxu0 %v13826_v40  ;;  %7259 = vmatpush1.bf16.msra.mxu1 %v11441_v41  ;;  %v13848_v2 = vpack.c.bf16 %v175_v62, %v155_v51  ;;  %v174_v41 = vld [vmem:[%s15348_s0 + $0x390] sm:$0xff]  ;;  %v11458_v51 = vld [vmem:[#allocation2 + $0xcac] ss:$16 sps:$4 sm:$0xff]  }
 0x2e8   :  { %5851 = vmatprep.mubr.bf16.mxu0 %v13828_v57  ;;  %7139 = vmatprep.mubr.bf16.mxu1 %v13320_v53  ;;  %v11452_v53 = vld [vmem:[#allocation2 + $0xc6c] ss:$16 sps:$4 sm:$0xff]   ;;  %v13866_v27 = vpack.c.bf16 %v174_v41, %v154_v7  ;;  %v11482_v62 = vld [vmem:[#allocation2 + $0x1084] ss:$16 sps:$4 sm:$0xff]   ;;  %v11456_v7 = vld [vmem:[#allocation2 + $0xca8] ss:$16 sps:$4 sm:$0xff]  }
 0x2e9   :  { %7260 = vmatprep.subr.bf16.mxu1 %v11446_v39  ;;  %5971 = vmatpush1.bf16.msra.mxu0 %v11462_v35  ;;  %v11450_v39 = vld [vmem:[#allocation2 + $0xc68] ss:$16 sps:$4 sm:$0xff]   ;;  %v11476_v35 = vld [vmem:[#allocation2 + $0x1064] ss:$16 sps:$4 sm:$0xff]   ;;  %v11461_v41 = vld [vmem:[#allocation2 + $0xccc] ss:$16 sps:$4 sm:$0xff]  }
 0x2ea   :  { %5972 = vmatprep.subr.bf16.mxu0 %v11467_v18  ;;  %v215_v18 = vld [vmem:[%s15348_s0 + $0x4d8] sm:$0xff] }
 0x2eb   :  { %7261 = vmatpush1.bf16.msra.mxu1 %v11444_v10  ;;  %v11455_v10 = vld [vmem:[#allocation2 + $0xc8c] ss:$16 sps:$4 sm:$0xff]  }
 0x2ec   :  { %7262 = vmatprep.subr.bf16.mxu1 %v11449_v4  ;;  %v11453_v4 = vld [vmem:[#allocation2 + $0xc88] ss:$16 sps:$4 sm:$0xff]  }
 0x2ed   :  { %5973 = vmatpush1.bf16.msra.mxu0 %v11465_v24  ;;  %v15459_v24 = vld [vmem:[#allocation14_spill] sm:$0xff] }
 0x2ee   :  { %7140 = vmatmul.mubr.bf16.gmra.mrb[56].mxu1 %v13338_v55  ;;  %v195_v55 = vld [vmem:[%s15348_s0 + $0x438] sm:$0xff]  ;;  %5974 = vmatprep.subr.bf16.mxu0 %v11473_v34 }
 0x2ef   :  { %5852 = vmatmul.mubr.bf16.gmra.mrb[4].mxu0 %v13846_v26  ;;  %7263 = vmatpush1.bf16.msra.mxu1 %v11447_v1  ;;  %v13868_v8 = vpack.c.bf16 %v215_v18, %v195_v55  ;;  %v194_v1 = vld [vmem:[%s15348_s0 + $0x430] sm:$0xff]  ;;  %v235_v34 = vld [vmem:[%s15348_s0 + $0x578] sm:$0xff] }
 0x2f0   :  { %5861 = vmatprep.mubr.bf16.mxu0 %v13848_v2  ;;  %7149 = vmatprep.mubr.bf16.mxu1 %v13340_v21  ;;  %v11474_v21 = vld [vmem:[#allocation2 + $0x1060] ss:$16 sps:$4 sm:$0xff]   ;;  %v11459_v18 = vld [vmem:[#allocation2 + $0xcc8] ss:$16 sps:$4 sm:$0xff]  }
 0x2f1   :  { %7264 = vmatprep.subr.bf16.mxu1 %v11452_v53  ;;  %5975 = vmatpush1.bf16.msra.mxu0 %v11471_v43  ;;  %v214_v53 = vld [vmem:[%s15348_s0 + $0x4d0] sm:$0xff] }
 0x2f2   :  { %5976 = vmatprep.subr.bf16.mxu0 %v11476_v35  ;;  %v11480_v43 = vld [vmem:[#allocation2 + $0x1080] ss:$16 sps:$4 sm:$0xff]   ;;  %v13886_v35 = vpack.c.bf16 %v214_v53, %v194_v1  ;;  %v275_v1 = vld [vmem:[%s15348_s0 + $0x6b8] sm:$0xff] }
 0x2f3   :  { %7265 = vmatpush1.bf16.msra.mxu1 %v11450_v39  ;;  %v11488_v39 = vld [vmem:[#allocation2 + $0x10a4] ss:$16 sps:$4 sm:$0xff]   ;;  %v11468_v53 = vld [vmem:[#allocation2 + $0xce8] ss:$16 sps:$4 sm:$0xff]  }
 0x2f4   :  { %7266 = vmatprep.subr.bf16.mxu1 %v11455_v10  ;;  %15460 = vst [vmem:[#allocation13_spill] sm:$0xff] %v13886_v35  ;;  %v11486_v10 = vld [vmem:[#allocation2 + $0x10a0] ss:$16 sps:$4 sm:$0xff]  }
 0x2f5   :  { %5977 = vmatpush1.bf16.msra.mxu0 %v11474_v21  ;;  %v15462_v21 = vld [vmem:[#allocation15_spill] sm:$0xff] }
 0x2f6   :  { %7150 = vmatmul.mubr.bf16.gmra.mrb[60].mxu1 %v13358_v50  ;;  %v255_v50 = vld [vmem:[%s15348_s0 + $0x618] sm:$0xff]  ;;  %5978 = vmatprep.subr.bf16.mxu0 %v11482_v62  ;;  %v254_v62 = vld [vmem:[%s15348_s0 + $0x610] sm:$0xff] }
 0x2f7   :  { %5862 = vmatmul.mubr.bf16.gmra.mrb[8].mxu0 %v13866_v27  ;;  %7159 = vmatprep.mubr.bf16.mxu1 %v15459_v24  ;;  %v13888_v55 = vpack.c.bf16 %v255_v50, %v235_v34  ;;  %v11491_v24 = vld [vmem:[#allocation2 + $0x10c4] ss:$16 sps:$4 sm:$0xff]   ;;  %v11489_v34 = vld [vmem:[#allocation2 + $0x10c0] ss:$16 sps:$4 sm:$0xff]   ;;  %v11479_v50 = vld [vmem:[#allocation2 + $0xd0c] ss:$16 sps:$4 sm:$0xff]  }
 0x2f8   :  { %5871 = vmatprep.mubr.bf16.mxu0 %v13868_v8  ;;  %7267 = vmatpush1.bf16.msra.mxu1 %v11453_v4  ;;  %v11470_v4 = vld [vmem:[#allocation2 + $0xcec] ss:$16 sps:$4 sm:$0xff]  }
 0x2f9   :  { %7268 = vmatprep.subr.bf16.mxu1 %v11458_v51  ;;  %15461 = vst [vmem:[#allocation14_spill] sm:$0xff] %v13888_v55  ;;  %5979 = vmatpush1.bf16.msra.mxu0 %v11480_v43  ;;  %v234_v51 = vld [vmem:[%s15348_s0 + $0x570] sm:$0xff] }
 0x2fa   :  { %5980 = vmatprep.subr.bf16.mxu0 %v11488_v39  ;;  %v13906_v43 = vpack.c.bf16 %v254_v62, %v234_v51  ;;  %v11477_v39 = vld [vmem:[#allocation2 + $0xd08] ss:$16 sps:$4 sm:$0xff]   ;;  %v11494_v51 = vld [vmem:[#allocation2 + $0xd4c] ss:$16 sps:$4 sm:$0xff]   ;;  %v11506_v62 = vld [vmem:[#allocation2 + $0x1124] ss:$16 sps:$4 sm:$0xff]  }
 0x2fc   :  { %7269 = vmatpush1.bf16.msra.mxu1 %v11456_v7  ;;  %v11497_v7 = vld [vmem:[#allocation2 + $0x10e4] ss:$16 sps:$4 sm:$0xff]  }
 0x2fd   :  { %7270 = vmatprep.subr.bf16.mxu1 %v11461_v41  ;;  %5981 = vmatpush1.bf16.msra.mxu0 %v11486_v10  ;;  %v294_v10 = vld [vmem:[%s15348_s0 + $0x750] sm:$0xff] }
 0x2fe   :  { %7160 = vmatmul.mubr.bf16.gmra.mrb[64].mxu1 %v13378_v31  ;;  %v295_v31 = vld [vmem:[%s15348_s0 + $0x758] sm:$0xff]  ;;  %5982 = vmatprep.subr.bf16.mxu0 %v11491_v24 }
 0x2ff   :  { %5872 = vmatmul.mubr.bf16.gmra.mrb[12].mxu0 %v13886_v35  ;;  %7169 = vmatprep.mubr.bf16.mxu1 %v15462_v21  ;;  %v13908_v41 = vpack.c.bf16 %v295_v31, %v275_v1  ;;  %v11495_v21 = vld [vmem:[#allocation2 + $0x10e0] ss:$16 sps:$4 sm:$0xff]   ;;  %v11500_v35 = vld [vmem:[#allocation2 + $0x1104] ss:$16 sps:$4 sm:$0xff]   ;;  %v11483_v24 = vld [vmem:[#allocation2 + $0xd28] ss:$16 sps:$4 sm:$0xff]  }
 0x300   :  { %5881 = vmatprep.mubr.bf16.mxu0 %v13888_v55  ;;  %7271 = vmatpush1.bf16.msra.mxu1 %v11459_v18  ;;  %v11485_v55 = vld [vmem:[#allocation2 + $0xd2c] ss:$16 sps:$4 sm:$0xff]   ;;  %v274_v18 = vld [vmem:[%s15348_s0 + $0x6b0] sm:$0xff] }
 0x301   :  { %7272 = vmatprep.subr.bf16.mxu1 %v11470_v4  ;;  %5983 = vmatpush1.bf16.msra.mxu0 %v11489_v34  ;;  %v315_v4 = vld [vmem:[%s15348_s0 + $0x7f8] sm:$0xff]  ;;  %v13926_v1 = vpack.c.bf16 %v294_v10, %v274_v18  ;;  %v11504_v34 = vld [vmem:[#allocation2 + $0x1120] ss:$16 sps:$4 sm:$0xff]   ;;  %v11515_v10 = vld [vmem:[#allocation2 + $0x1164] ss:$16 sps:$4 sm:$0xff]  }
 0x302   :  { %5984 = vmatprep.subr.bf16.mxu0 %v11497_v7  ;;  %v11512_v7 = vld [vmem:[#allocation2 + $0x1144] ss:$16 sps:$4 sm:$0xff]   ;;  %v11509_v18 = vld [vmem:[#allocation2 + $0xd8c] ss:$16 sps:$4 sm:$0xff]  }
 0x304   :  { %7273 = vmatpush1.bf16.msra.mxu1 %v11468_v53  ;;  %v11492_v53 = vld [vmem:[#allocation2 + $0xd48] ss:$16 sps:$4 sm:$0xff]  }
 0x305   :  { %7274 = vmatprep.subr.bf16.mxu1 %v11479_v50  ;;  %5985 = vmatpush1.bf16.msra.mxu0 %v11495_v21  ;;  %v11503_v50 = vld [vmem:[#allocation2 + $0xd6c] ss:$16 sps:$4 sm:$0xff]   ;;  %v11501_v21 = vld [vmem:[#allocation2 + $0xd68] ss:$16 sps:$4 sm:$0xff]  }
 0x306   :  { %7170 = vmatmul.mubr.bf16.gmra.mrb[68].mxu1 %v13398_v28  ;;  %v335_v28 = vld [vmem:[%s15348_s0 + $0x898] sm:$0xff]  ;;  %5986 = vmatprep.subr.bf16.mxu0 %v11500_v35  ;;  %v314_v35 = vld [vmem:[%s15348_s0 + $0x7f0] sm:$0xff] }
 0x307   :  { %5882 = vmatmul.mubr.bf16.gmra.mrb[16].mxu0 %v13906_v43  ;;  %7179 = vmatprep.mubr.bf16.mxu1 %v13400_v49  ;;  %v11498_v49 = vld [vmem:[#allocation2 + $0x1100] ss:$16 sps:$4 sm:$0xff]   ;;  %v13928_v31 = vpack.c.bf16 %v335_v28, %v315_v4 }
 0x308   :  { %5891 = vmatprep.mubr.bf16.mxu0 %v13908_v41  ;;  %7275 = vmatpush1.bf16.msra.mxu1 %v11477_v39  ;;  %v355_v39 = vld [vmem:[%s15348_s0 + $0x938] sm:$0xff] }
 0x309   :  { %7276 = vmatprep.subr.bf16.mxu1 %v11485_v55  ;;  %5987 = vmatpush1.bf16.msra.mxu0 %v11498_v49  ;;  %v334_v55 = vld [vmem:[%s15348_s0 + $0x890] sm:$0xff] }
 0x30a   :  { %5988 = vmatprep.subr.bf16.mxu0 %v11506_v62  ;;  %v13946_v4 = vpack.c.bf16 %v334_v55, %v314_v35  ;;  %v11513_v49 = vld [vmem:[#allocation2 + $0x1160] ss:$16 sps:$4 sm:$0xff]   ;;  %v11521_v62 = vld [vmem:[#allocation2 + $0x1184] ss:$16 sps:$4 sm:$0xff]   ;;  %v11524_v35 = vld [vmem:[#allocation2 + $0xdcc] ss:$16 sps:$4 sm:$0xff]  }
 0x30b   :  { %v11527_v55 = vld [vmem:[#allocation2 + $0x11a4] ss:$16 sps:$4 sm:$0xff]  }
 0x30c   :  { %7277 = vmatpush1.bf16.msra.mxu1 %v11483_v24  ;;  %v11507_v24 = vld [vmem:[#allocation2 + $0xd88] ss:$16 sps:$4 sm:$0xff]  }
 0x30d   :  { %7278 = vmatprep.subr.bf16.mxu1 %v11494_v51  ;;  %5989 = vmatpush1.bf16.msra.mxu0 %v11504_v34  ;;  %v11518_v51 = vld [vmem:[#allocation2 + $0xdac] ss:$16 sps:$4 sm:$0xff]   ;;  %v374_v34 = vld [vmem:[%s15348_s0 + $0x9d0] sm:$0xff] }
 0x30e   :  { %7180 = vmatmul.mubr.bf16.gmra.mrb[72].mxu1 %v13418_v60  ;;  %v375_v60 = vld [vmem:[%s15348_s0 + $0x9d8] sm:$0xff]  ;;  %5990 = vmatprep.subr.bf16.mxu0 %v11512_v7 }
 0x30f   :  { %5892 = vmatmul.mubr.bf16.gmra.mrb[20].mxu0 %v13926_v1  ;;  %7189 = vmatprep.mubr.bf16.mxu1 %v13420_v5  ;;  %v11510_v5 = vld [vmem:[#allocation2 + $0x1140] ss:$16 sps:$4 sm:$0xff]   ;;  %v13948_v28 = vpack.c.bf16 %v375_v60, %v355_v39  ;;  %v11516_v7 = vld [vmem:[#allocation2 + $0xda8] ss:$16 sps:$4 sm:$0xff]  }
 0x310   :  { %5901 = vmatprep.mubr.bf16.mxu0 %v13928_v31  ;;  %7279 = vmatpush1.bf16.msra.mxu1 %v11492_v53  ;;  %v354_v53 = vld [vmem:[%s15348_s0 + $0x930] sm:$0xff] }
 0x311   :  { %7280 = vmatprep.subr.bf16.mxu1 %v11503_v50  ;;  %5991 = vmatpush1.bf16.msra.mxu0 %v11510_v5  ;;  %v395_v50 = vld [vmem:[%s15348_s0 + $0xa78] sm:$0xff]  ;;  %v13966_v39 = vpack.c.bf16 %v374_v34, %v354_v53  ;;  %v11525_v5 = vld [vmem:[#allocation2 + $0x11a0] ss:$16 sps:$4 sm:$0xff]   ;;  %v11536_v53 = vld [vmem:[#allocation2 + $0x11e4] ss:$16 sps:$4 sm:$0xff]  }
 0x312   :  { %5992 = vmatprep.subr.bf16.mxu0 %v11515_v10  ;;  %v11533_v10 = vld [vmem:[#allocation2 + $0xdec] ss:$16 sps:$4 sm:$0xff]  }
 0x313   :  { %v11539_v34 = vld [vmem:[#allocation2 + $0xe0c] ss:$16 sps:$4 sm:$0xff]  }
 0x314   :  { %7281 = vmatpush1.bf16.msra.mxu1 %v11501_v21  ;;  %v11522_v21 = vld [vmem:[#allocation2 + $0xdc8] ss:$16 sps:$4 sm:$0xff]  }
 0x315   :  { %7282 = vmatprep.subr.bf16.mxu1 %v11509_v18  ;;  %5993 = vmatpush1.bf16.msra.mxu0 %v11513_v49  ;;  %v11530_v18 = vld [vmem:[#allocation2 + $0x11c4] ss:$16 sps:$4 sm:$0xff]  }
 0x316   :  { %7190 = vmatmul.mubr.bf16.gmra.mrb[76].mxu1 %v13438_v32  ;;  %v415_v32 = vld [vmem:[%s15348_s0 + $0xb18] sm:$0xff]  ;;  %5994 = vmatprep.subr.bf16.mxu0 %v11521_v62  ;;  %v414_v49 = vld [vmem:[%s15348_s0 + $0xb10] sm:$0xff] }
 0x317   :  { %5902 = vmatmul.mubr.bf16.gmra.mrb[24].mxu0 %v13946_v4  ;;  %7199 = vmatprep.mubr.bf16.mxu1 %v13440_v52  ;;  %v11519_v52 = vld [vmem:[#allocation2 + $0x1180] ss:$16 sps:$4 sm:$0xff]   ;;  %v13968_v60 = vpack.c.bf16 %v415_v32, %v395_v50 }
 0x318   :  { %5911 = vmatprep.mubr.bf16.mxu0 %v13948_v28  ;;  %7283 = vmatpush1.bf16.msra.mxu1 %v11507_v24  ;;  %v394_v24 = vld [vmem:[%s15348_s0 + $0xa70] sm:$0xff] }
 0x319   :  { %7284 = vmatprep.subr.bf16.mxu1 %v11518_v51  ;;  %5995 = vmatpush1.bf16.msra.mxu0 %v11519_v52  ;;  %v435_v51 = vld [vmem:[%s15348_s0 + $0xbb8] sm:$0xff]  ;;  %v11528_v62 = vld [vmem:[#allocation2 + $0x11c0] ss:$16 sps:$4 sm:$0xff]   ;;  %v13986_v50 = vpack.c.bf16 %v414_v49, %v394_v24  ;;  %v11560_v52 = vld [vmem:[#allocation2 + $0x1204] ss:$16 sps:$4 sm:$0xff]  }
 0x31a   :  { %5996 = vmatprep.subr.bf16.mxu0 %v11527_v55  ;;  %v454_v55 = vld [vmem:[%s15348_s0 + $0xc50] sm:$0xff]  ;;  %v515_v24 = vld [vmem:[%s15348_s0 + $0xe38] sm:$0xff] }
 0x31c   :  { %7285 = vmatpush1.bf16.msra.mxu1 %v11516_v7  ;;  %v11534_v7 = vld [vmem:[#allocation2 + $0x11e0] ss:$16 sps:$4 sm:$0xff]  }
 0x31d   :  { %7286 = vmatprep.subr.bf16.mxu1 %v11524_v35  ;;  %5997 = vmatpush1.bf16.msra.mxu0 %v11525_v5  ;;  %v434_v35 = vld [vmem:[%s15348_s0 + $0xbb0] sm:$0xff] }
 0x31e   :  { %7200 = vmatmul.mubr.bf16.gmra.mrb[80].mxu1 %v13458_v59  ;;  %v455_v59 = vld [vmem:[%s15348_s0 + $0xc58] sm:$0xff]  ;;  %5998 = vmatprep.subr.bf16.mxu0 %v11530_v18  ;;  %v14006_v5 = vpack.c.bf16 %v454_v55, %v434_v35  ;;  %v474_v18 = vld [vmem:[%s15348_s0 + $0xcf0] sm:$0xff]  ;;  %v117_v35 = vld [vmem:[%s15348_s0 + $0x1c8] sm:$0xff] }
 0x31f   :  { %5912 = vmatmul.mubr.bf16.gmra.mrb[28].mxu0 %v13966_v39  ;;  %7209 = vmatprep.mubr.bf16.mxu1 %v13460_v45  ;;  %v11531_v45 = vld [vmem:[#allocation2 + $0xde8] ss:$16 sps:$4 sm:$0xff]   ;;  %v13988_v32 = vpack.c.bf16 %v455_v59, %v435_v51  ;;  %v534_v59 = vld [vmem:[%s15348_s0 + $0xed0] sm:$0xff] }
 0x320   :  { %5921 = vmatprep.mubr.bf16.mxu0 %v13968_v60  ;;  %7287 = vmatpush1.bf16.msra.mxu1 %v11522_v21  ;;  %v475_v21 = vld [vmem:[%s15348_s0 + $0xcf8] sm:$0xff] }
 0x321   :  { %7288 = vmatprep.subr.bf16.mxu1 %v11533_v10  ;;  %5999 = vmatpush1.bf16.msra.mxu0 %v11528_v62  ;;  %v494_v10 = vld [vmem:[%s15348_s0 + $0xd90] sm:$0xff]  ;;  %v555_v62 = vld [vmem:[%s15348_s0 + $0xf78] sm:$0xff] }
 0x322   :  { %6000 = vmatprep.subr.bf16.mxu0 %v11536_v53  ;;  %v14026_v49 = vpack.c.bf16 %v494_v10, %v474_v18  ;;  %v14045_v53 = vpack.c.bf16 %v555_v62, %v555_v62  ;;  %v11558_v18 = vld [vmem:[#allocation2 + $0x1200] ss:$16 sps:$4 sm:$0xff]   ;;  %v11563_v10 = vld [vmem:[#allocation2 + $0x1224] ss:$16 sps:$4 sm:$0xff]   ;;  %v177_v62 = vld [vmem:[%s15348_s0 + $0x3a8] sm:$0xff] }
 0x324   :  { %7289 = vmatpush1.bf16.msra.mxu1 %v11531_v45 }
 0x325   :  { %7419 = vmatprep.subr.bf16.mxu1 %v11539_v34  ;;  %6001 = vmatpush1.bf16.msra.mxu0 %v11534_v7  ;;  %v97_v34 = vld [vmem:[%s15348_s0 + $0x128] sm:$0xff] }
 0x326   :  { %7210 = vmatmul.mubr.bf16.gmra.mrb[84].mxu1 %v13478_v23  ;;  %v495_v23 = vld [vmem:[%s15348_s0 + $0xd98] sm:$0xff]  ;;  %6131 = vmatprep.subr.bf16.mxu0 %v11560_v52 }
 0x327   :  { %5922 = vmatmul.mubr.bf16.gmra.mrb[32].mxu0 %v13986_v50  ;;  %7219 = vmatprep.mubr.bf16.mxu1 %v13480_v19  ;;  %v14008_v19 = vpack.c.bf16 %v495_v23, %v475_v21  ;;  %v11537_v21 = vld [vmem:[#allocation2 + $0xe08] ss:$16 sps:$4 sm:$0xff]   ;;  %v11542_v23 = vld [vmem:[#allocation2 + $0xe2c] ss:$16 sps:$4 sm:$0xff]  }
 0x328   :  { %5931 = vmatprep.mubr.bf16.mxu0 %v13988_v32 }
 0x32e   :  { %7220 = vmatmul.mubr.bf16.gmra.mrb[88].mxu1 %v13498_v14  ;;  %v535_v14 = vld [vmem:[%s15348_s0 + $0xed8] sm:$0xff] }
 0x32f   :  { %5932 = vmatmul.mubr.bf16.gmra.mrb[36].mxu0 %v14006_v5  ;;  %7229 = vmatprep.mubr.bf16.mxu1 %v13500_v6  ;;  %v14028_v51 = vpack.c.bf16 %v535_v14, %v515_v24  ;;  %v514_v6 = vld [vmem:[%s15348_s0 + $0xe30] sm:$0xff]  ;;  %v11540_v24 = vld [vmem:[#allocation2 + $0xe28] ss:$16 sps:$4 sm:$0xff]   ;;  %v116_v14 = vld [vmem:[%s15348_s0 + $0x1c0] sm:$0xff] }
 0x330   :  { %5941 = vmatprep.mubr.bf16.mxu0 %v14008_v19  ;;  %v14043_v45 = vpack.c.bf16 %v534_v59, %v514_v6  ;;  %v136_v6 = vld [vmem:[%s15348_s0 + $0x260] sm:$0xff]  ;;  %v11545_v59 = vld [vmem:[#allocation2 + $0xe4c] ss:$16 sps:$4 sm:$0xff]  }
 0x336   :  { %7230 = vmatmul.mubr.bf16.gmra.mrb[92].mxu1 %v13518_v58  ;;  %v554_v58 = vld [vmem:[%s15348_s0 + $0xf70] sm:$0xff] }
 0x337   :  { %5942 = vmatmul.mubr.bf16.gmra.mrb[40].mxu0 %v14026_v49  ;;  %7239 = vmatprep.mubr.bf16.mxu1 %v13520_v29  ;;  %v77_v29 = vld [vmem:[%s15348_s0 + $0x88] sm:$0xff]  ;;  %v14060_v7 = vpack.c.bf16 %v554_v58, %v554_v58  ;;  %v11561_v58 = vld [vmem:[#allocation2 + $0x1220] ss:$16 sps:$4 sm:$0xff]  }
 0x338   :  { %5951 = vmatprep.mubr.bf16.mxu0 %v14028_v51  ;;  %v14062_v52 = vpack.c.bf16 %v97_v34, %v77_v29  ;;  %v14100_v29 = vpack.c.bf16 %v136_v6, %v116_v14  ;;  %v11543_v34 = vld [vmem:[#allocation2 + $0xe48] ss:$16 sps:$4 sm:$0xff]  }
 0x33e   :  { %7240 = vmatmul.mubr.bf16.gmra.mrb[96].mxu1 %v13535_v12  ;;  %v76_v12 = vld [vmem:[%s15348_s0 + $0x80] sm:$0xff] }
 0x33f   :  { %5952 = vmatmul.mubr.bf16.gmra.mrb[44].mxu0 %v14043_v45  ;;  %7249 = vmatprep.mubr.bf16.mxu1 %v13537_v37  ;;  %v96_v37 = vld [vmem:[%s15348_s0 + $0x120] sm:$0xff] }
 0x340   :  { %5961 = vmatprep.mubr.bf16.mxu0 %v14045_v53  ;;  %v14080_v55 = vpack.c.bf16 %v96_v37, %v76_v12  ;;  %v11569_v37 = vld [vmem:[#allocation2 + $0x1244] ss:$16 sps:$4 sm:$0xff]  }
 0x346   :  { %7250 = vmatmul.mubr.bf16.gmra.mrb[100].mxu1 %v13552_v11  ;;  %v137_v11 = vld [vmem:[%s15348_s0 + $0x268] sm:$0xff] }
 0x347   :  { %5962 = vmatmul.mubr.bf16.gmra.mrb[48].mxu0 %v14060_v7  ;;  %7290 = vmatprep.mubr.bf16.mxu1 %v13554_v56  ;;  %v14082_v56 = vpack.c.bf16 %v137_v11, %v117_v35  ;;  %v156_v35 = vld [vmem:[%s15348_s0 + $0x300] sm:$0xff] }
 0x348   :  { %6002 = vmatprep.mubr.bf16.mxu0 %v14062_v52  ;;  %v11567_v11 = vld [vmem:[#allocation2 + $0x1240] ss:$16 sps:$4 sm:$0xff]  }
 0x34e   :  { %7291 = vmatmul.mubr.bf16.vlgmr.msra.gmra.mrb[52].mxu1 %v13572_v48  ;;  %v157_v48 = vld [vmem:[%s15348_s0 + $0x308] sm:$0xff] }
 0x34f   :  { %6003 = vmatmul.mubr.bf16.vlgmr.msra.gmra.mrb[0].mxu0 %v14080_v55  ;;  %7420 = vmatpush1.bf16.msra.mxu1 %v11537_v21  ;;  %v14102_v12 = vpack.c.bf16 %v177_v62, %v157_v48  ;;  %v176_v21 = vld [vmem:[%s15348_s0 + $0x3a0] sm:$0xff]  ;;  %v11554_v48 = vld [vmem:[#allocation2 + $0xeac] ss:$16 sps:$4 sm:$0xff]  }
 0x350   :  { %6012 = vmatprep.mubr.bf16.mxu0 %v14082_v56  ;;  %7300 = vmatprep.mubr.bf16.mxu1 %v13574_v17  ;;  %v11548_v17 = vld [vmem:[#allocation2 + $0xe6c] ss:$16 sps:$4 sm:$0xff]   ;;  %v14120_v14 = vpack.c.bf16 %v176_v21, %v156_v35  ;;  %v11578_v62 = vld [vmem:[#allocation2 + $0x1284] ss:$16 sps:$4 sm:$0xff]   ;;  %v11552_v21 = vld [vmem:[#allocation2 + $0xea8] ss:$16 sps:$4 sm:$0xff]  }
 0x351   :  { %7421 = vmatprep.subr.bf16.mxu1 %v11542_v23  ;;  %6132 = vmatpush1.bf16.msra.mxu0 %v11558_v18  ;;  %v11546_v23 = vld [vmem:[#allocation2 + $0xe68] ss:$16 sps:$4 sm:$0xff]   ;;  %v11572_v18 = vld [vmem:[#allocation2 + $0x1264] ss:$16 sps:$4 sm:$0xff]  }
 0x352   :  { %6133 = vmatprep.subr.bf16.mxu0 %v11563_v10  ;;  %v217_v10 = vld [vmem:[%s15348_s0 + $0x4e8] sm:$0xff]  ;;  %15463 = vst [vmem:[#allocation15_spill] sm:$0xff] %v14120_v14 }
 0x353   :  { %7422 = vmatpush1.bf16.msra.mxu1 %v11540_v24  ;;  %v11551_v24 = vld [vmem:[#allocation2 + $0xe8c] ss:$16 sps:$4 sm:$0xff]  }
 0x354   :  { %7423 = vmatprep.subr.bf16.mxu1 %v11545_v59  ;;  %v11549_v59 = vld [vmem:[#allocation2 + $0xe88] ss:$16 sps:$4 sm:$0xff]  }
 0x355   :  { %6134 = vmatpush1.bf16.msra.mxu0 %v11561_v58  ;;  %v15465_v58 = vld [vmem:[#allocation16_spill] sm:$0xff]  ;;  %v237_v35 = vld [vmem:[%s15348_s0 + $0x588] sm:$0xff] }
 0x356   :  { %7301 = vmatmul.mubr.bf16.gmra.mrb[56].mxu1 %v13592_v16  ;;  %v197_v16 = vld [vmem:[%s15348_s0 + $0x448] sm:$0xff]  ;;  %6135 = vmatprep.subr.bf16.mxu0 %v11569_v37  ;;  %v216_v37 = vld [vmem:[%s15348_s0 + $0x4e0] sm:$0xff] }
 0x357   :  { %6013 = vmatmul.mubr.bf16.gmra.mrb[4].mxu0 %v14100_v29  ;;  %7424 = vmatpush1.bf16.msra.mxu1 %v11543_v34  ;;  %v14122_v6 = vpack.c.bf16 %v217_v10, %v197_v16  ;;  %v15466_v34 = vld [vmem:[#allocation10_spill] sm:$0xff] }
 0x358   :  { %6022 = vmatprep.mubr.bf16.mxu0 %v14102_v12  ;;  %7310 = vmatprep.mubr.bf16.mxu1 %v13594_v33  ;;  %v11570_v33 = vld [vmem:[#allocation2 + $0x1260] ss:$16 sps:$4 sm:$0xff]   ;;  %v11584_v16 = vld [vmem:[#allocation2 + $0x12a4] ss:$16 sps:$4 sm:$0xff]  }
 0x359   :  { %7425 = vmatprep.subr.bf16.mxu1 %v11548_v17  ;;  %6136 = vmatpush1.bf16.msra.mxu0 %v11567_v11  ;;  %15464 = vst [vmem:[#allocation66_spill] sm:$0xff] %v14122_v6  ;;  %v196_v17 = vld [vmem:[%s15348_s0 + $0x440] sm:$0xff]  ;;  %v257_v11 = vld [vmem:[%s15348_s0 + $0x628] sm:$0xff] }
 0x35a   :  { %6137 = vmatprep.subr.bf16.mxu0 %v11572_v18  ;;  %v11557_v18 = vld [vmem:[#allocation2 + $0xecc] ss:$16 sps:$4 sm:$0xff]   ;;  %v14140_v10 = vpack.c.bf16 %v216_v37, %v196_v17  ;;  %v256_v17 = vld [vmem:[%s15348_s0 + $0x620] sm:$0xff] }
 0x35b   :  { %7426 = vmatpush1.bf16.msra.mxu1 %v11546_v23  ;;  %v11576_v23 = vld [vmem:[#allocation2 + $0x1280] ss:$16 sps:$4 sm:$0xff]   ;;  %v277_v37 = vld [vmem:[%s15348_s0 + $0x6c8] sm:$0xff] }
 0x35c   :  { %7427 = vmatprep.subr.bf16.mxu1 %v11551_v24  ;;  %15467 = vst [vmem:[#allocation16_spill] sm:$0xff] %v14140_v10  ;;  %v14142_v24 = vpack.c.bf16 %v257_v11, %v237_v35  ;;  %v297_v35 = vld [vmem:[%s15348_s0 + $0x768] sm:$0xff] }
 0x35d   :  { %6138 = vmatpush1.bf16.msra.mxu0 %v11570_v33  ;;  %v15469_v33 = vld [vmem:[#allocation11_spill] sm:$0xff] }
 0x35e   :  { %7311 = vmatmul.mubr.bf16.gmra.mrb[60].mxu1 %v15465_v58  ;;  %6139 = vmatprep.subr.bf16.mxu0 %v11578_v62  ;;  %15468 = vst [vmem:[#allocation10_spill] sm:$0xff] %v14142_v24  ;;  %v11555_v58 = vld [vmem:[#allocation2 + $0xec8] ss:$16 sps:$4 sm:$0xff]   ;;  %v236_v62 = vld [vmem:[%s15348_s0 + $0x580] sm:$0xff] }
 0x35f   :  { %6023 = vmatmul.mubr.bf16.gmra.mrb[8].mxu0 %v14120_v14  ;;  %7320 = vmatprep.mubr.bf16.mxu1 %v15466_v34  ;;  %v11582_v34 = vld [vmem:[#allocation2 + $0x12a0] ss:$16 sps:$4 sm:$0xff]   ;;  %v11564_v11 = vld [vmem:[#allocation2 + $0xee8] ss:$16 sps:$4 sm:$0xff]   ;;  %v11596_v14 = vld [vmem:[#allocation2 + $0x1304] ss:$16 sps:$4 sm:$0xff]  }
 0x360   :  { %6032 = vmatprep.mubr.bf16.mxu0 %v14122_v6  ;;  %7428 = vmatpush1.bf16.msra.mxu1 %v11549_v59  ;;  %v11566_v59 = vld [vmem:[#allocation2 + $0xeec] ss:$16 sps:$4 sm:$0xff]   ;;  %v11587_v6 = vld [vmem:[#allocation2 + $0x12c4] ss:$16 sps:$4 sm:$0xff]  }
 0x361   :  { %7429 = vmatprep.subr.bf16.mxu1 %v11554_v48  ;;  %6140 = vmatpush1.bf16.msra.mxu0 %v11576_v23  ;;  %v15470_v48 = vld [vmem:[#allocation12_spill] sm:$0xff] }
 0x362   :  { %6141 = vmatprep.subr.bf16.mxu0 %v11584_v16  ;;  %v11575_v23 = vld [vmem:[#allocation2 + $0xf0c] ss:$16 sps:$4 sm:$0xff]   ;;  %v14160_v16 = vpack.c.bf16 %v256_v17, %v236_v62  ;;  %v11602_v17 = vld [vmem:[#allocation2 + $0x1324] ss:$16 sps:$4 sm:$0xff]  }
 0x363   :  { %v11590_v62 = vld [vmem:[#allocation2 + $0xf4c] ss:$16 sps:$4 sm:$0xff]  }
 0x364   :  { %7430 = vmatpush1.bf16.msra.mxu1 %v11552_v21  ;;  %v11585_v21 = vld [vmem:[#allocation2 + $0x12c0] ss:$16 sps:$4 sm:$0xff]  }
 0x365   :  { %7431 = vmatprep.subr.bf16.mxu1 %v11557_v18  ;;  %6142 = vmatpush1.bf16.msra.mxu0 %v11582_v34  ;;  %v11593_v18 = vld [vmem:[#allocation2 + $0x12e4] ss:$16 sps:$4 sm:$0xff]   ;;  %v317_v34 = vld [vmem:[%s15348_s0 + $0x808] sm:$0xff] }
 0x366   :  { %7321 = vmatmul.mubr.bf16.gmra.mrb[64].mxu1 %v15469_v33  ;;  %6143 = vmatprep.subr.bf16.mxu0 %v11587_v6  ;;  %v14162_v33 = vpack.c.bf16 %v297_v35, %v277_v37  ;;  %v276_v6 = vld [vmem:[%s15348_s0 + $0x6c0] sm:$0xff] }
 0x367   :  { %6033 = vmatmul.mubr.bf16.gmra.mrb[12].mxu0 %v14140_v10  ;;  %7330 = vmatprep.mubr.bf16.mxu1 %v15470_v48  ;;  %v11573_v48 = vld [vmem:[#allocation2 + $0xf08] ss:$16 sps:$4 sm:$0xff]   ;;  %v11581_v10 = vld [vmem:[#allocation2 + $0xf2c] ss:$16 sps:$4 sm:$0xff]  }
 0x368   :  { %6042 = vmatprep.mubr.bf16.mxu0 %v14142_v24  ;;  %7432 = vmatpush1.bf16.msra.mxu1 %v11555_v58  ;;  %v11591_v24 = vld [vmem:[#allocation2 + $0x12e0] ss:$16 sps:$4 sm:$0xff]  }
 0x369   :  { %7433 = vmatprep.subr.bf16.mxu1 %v11566_v59  ;;  %6144 = vmatpush1.bf16.msra.mxu0 %v11585_v21  ;;  %v296_v58 = vld [vmem:[%s15348_s0 + $0x760] sm:$0xff]  ;;  %v11579_v59 = vld [vmem:[#allocation2 + $0xf28] ss:$16 sps:$4 sm:$0xff]  }
 0x36a   :  { %6145 = vmatprep.subr.bf16.mxu0 %v11593_v18  ;;  %v14180_v37 = vpack.c.bf16 %v296_v58, %v276_v6  ;;  %v11600_v21 = vld [vmem:[#allocation2 + $0x1320] ss:$16 sps:$4 sm:$0xff]   ;;  %v11608_v18 = vld [vmem:[#allocation2 + $0x1344] ss:$16 sps:$4 sm:$0xff]   ;;  %v11605_v6 = vld [vmem:[#allocation2 + $0xf8c] ss:$16 sps:$4 sm:$0xff]  }
 0x36b   :  { %v11611_v58 = vld [vmem:[#allocation2 + $0x1364] ss:$16 sps:$4 sm:$0xff]  }
 0x36c   :  { %7434 = vmatpush1.bf16.msra.mxu1 %v11564_v11  ;;  %v11588_v11 = vld [vmem:[#allocation2 + $0xf48] ss:$16 sps:$4 sm:$0xff]  }
 0x36d   :  { %7435 = vmatprep.subr.bf16.mxu1 %v11575_v23  ;;  %6146 = vmatpush1.bf16.msra.mxu0 %v11591_v24  ;;  %v11599_v23 = vld [vmem:[#allocation2 + $0xf6c] ss:$16 sps:$4 sm:$0xff]  }
 0x36e   :  { %7331 = vmatmul.mubr.bf16.gmra.mrb[68].mxu1 %v13652_v3  ;;  %v337_v3 = vld [vmem:[%s15348_s0 + $0x8a8] sm:$0xff]  ;;  %6147 = vmatprep.subr.bf16.mxu0 %v11596_v14  ;;  %v316_v14 = vld [vmem:[%s15348_s0 + $0x800] sm:$0xff] }
 0x36f   :  { %6043 = vmatmul.mubr.bf16.gmra.mrb[16].mxu0 %v14160_v16  ;;  %7340 = vmatprep.mubr.bf16.mxu1 %v13654_v13  ;;  %v11594_v13 = vld [vmem:[#allocation2 + $0x1300] ss:$16 sps:$4 sm:$0xff]   ;;  %v14182_v35 = vpack.c.bf16 %v337_v3, %v317_v34  ;;  %v357_v24 = vld [vmem:[%s15348_s0 + $0x948] sm:$0xff] }
 0x370   :  { %6052 = vmatprep.mubr.bf16.mxu0 %v14162_v33  ;;  %7436 = vmatpush1.bf16.msra.mxu1 %v11573_v48  ;;  %v11597_v48 = vld [vmem:[#allocation2 + $0xf68] ss:$16 sps:$4 sm:$0xff]  }
 0x371   :  { %7437 = vmatprep.subr.bf16.mxu1 %v11581_v10  ;;  %6148 = vmatpush1.bf16.msra.mxu0 %v11594_v13  ;;  %v336_v10 = vld [vmem:[%s15348_s0 + $0x8a0] sm:$0xff] }
 0x372   :  { %6149 = vmatprep.subr.bf16.mxu0 %v11602_v17  ;;  %v14200_v34 = vpack.c.bf16 %v336_v10, %v316_v14  ;;  %v11609_v13 = vld [vmem:[#allocation2 + $0x1360] ss:$16 sps:$4 sm:$0xff]   ;;  %v11617_v17 = vld [vmem:[#allocation2 + $0x1384] ss:$16 sps:$4 sm:$0xff]   ;;  %v11620_v14 = vld [vmem:[#allocation2 + $0xfcc] ss:$16 sps:$4 sm:$0xff]  }
 0x373   :  { %v11623_v10 = vld [vmem:[#allocation2 + $0x13a4] ss:$16 sps:$4 sm:$0xff]  }
 0x374   :  { %7438 = vmatpush1.bf16.msra.mxu1 %v11579_v59  ;;  %v11603_v59 = vld [vmem:[#allocation2 + $0xf88] ss:$16 sps:$4 sm:$0xff]  }
 0x375   :  { %7439 = vmatprep.subr.bf16.mxu1 %v11590_v62  ;;  %6150 = vmatpush1.bf16.msra.mxu0 %v11600_v21  ;;  %v11614_v62 = vld [vmem:[#allocation2 + $0xfac] ss:$16 sps:$4 sm:$0xff]   ;;  %v376_v21 = vld [vmem:[%s15348_s0 + $0x9e0] sm:$0xff] }
 0x376   :  { %7341 = vmatmul.mubr.bf16.gmra.mrb[72].mxu1 %v13672_v47  ;;  %v377_v47 = vld [vmem:[%s15348_s0 + $0x9e8] sm:$0xff]  ;;  %6151 = vmatprep.subr.bf16.mxu0 %v11608_v18 }
 0x377   :  { %6053 = vmatmul.mubr.bf16.gmra.mrb[20].mxu0 %v14180_v37  ;;  %7350 = vmatprep.mubr.bf16.mxu1 %v13674_v15  ;;  %v11606_v15 = vld [vmem:[#allocation2 + $0x1340] ss:$16 sps:$4 sm:$0xff]   ;;  %v14202_v3 = vpack.c.bf16 %v377_v47, %v357_v24  ;;  %v11612_v18 = vld [vmem:[#allocation2 + $0xfa8] ss:$16 sps:$4 sm:$0xff]  }
 0x378   :  { %6062 = vmatprep.mubr.bf16.mxu0 %v14182_v35  ;;  %7440 = vmatpush1.bf16.msra.mxu1 %v11588_v11  ;;  %v356_v11 = vld [vmem:[%s15348_s0 + $0x940] sm:$0xff] }
 0x379   :  { %7441 = vmatprep.subr.bf16.mxu1 %v11599_v23  ;;  %6152 = vmatpush1.bf16.msra.mxu0 %v11606_v15  ;;  %v397_v23 = vld [vmem:[%s15348_s0 + $0xa88] sm:$0xff]  ;;  %v14220_v24 = vpack.c.bf16 %v376_v21, %v356_v11  ;;  %v11621_v15 = vld [vmem:[#allocation2 + $0x13a0] ss:$16 sps:$4 sm:$0xff]   ;;  %v11632_v11 = vld [vmem:[#allocation2 + $0x13e4] ss:$16 sps:$4 sm:$0xff]  }
 0x37a   :  { %6153 = vmatprep.subr.bf16.mxu0 %v11611_v58  ;;  %v11629_v58 = vld [vmem:[#allocation2 + $0xfec] ss:$16 sps:$4 sm:$0xff]  }
 0x37b   :  { %v11635_v21 = vld [vmem:[#allocation2 + $0x100c] ss:$16 sps:$4 sm:$0xff]  }
 0x37c   :  { %7442 = vmatpush1.bf16.msra.mxu1 %v11597_v48  ;;  %v11618_v48 = vld [vmem:[#allocation2 + $0xfc8] ss:$16 sps:$4 sm:$0xff]  }
 0x37d   :  { %7443 = vmatprep.subr.bf16.mxu1 %v11605_v6  ;;  %6154 = vmatpush1.bf16.msra.mxu0 %v11609_v13  ;;  %v11626_v6 = vld [vmem:[#allocation2 + $0x13c4] ss:$16 sps:$4 sm:$0xff]  }
 0x37e   :  { %7351 = vmatmul.mubr.bf16.gmra.mrb[76].mxu1 %v13692_v22  ;;  %v417_v22 = vld [vmem:[%s15348_s0 + $0xb28] sm:$0xff]  ;;  %6155 = vmatprep.subr.bf16.mxu0 %v11617_v17  ;;  %v416_v13 = vld [vmem:[%s15348_s0 + $0xb20] sm:$0xff] }
 0x37f   :  { %6063 = vmatmul.mubr.bf16.gmra.mrb[24].mxu0 %v14200_v34  ;;  %7360 = vmatprep.mubr.bf16.mxu1 %v13694_v63  ;;  %v11615_v63 = vld [vmem:[#allocation2 + $0x1380] ss:$16 sps:$4 sm:$0xff]   ;;  %v14222_v47 = vpack.c.bf16 %v417_v22, %v397_v23 }
 0x380   :  { %6072 = vmatprep.mubr.bf16.mxu0 %v14202_v3  ;;  %7444 = vmatpush1.bf16.msra.mxu1 %v11603_v59  ;;  %v396_v59 = vld [vmem:[%s15348_s0 + $0xa80] sm:$0xff] }
 0x381   :  { %7445 = vmatprep.subr.bf16.mxu1 %v11614_v62  ;;  %6156 = vmatpush1.bf16.msra.mxu0 %v11615_v63  ;;  %v437_v62 = vld [vmem:[%s15348_s0 + $0xbc8] sm:$0xff]  ;;  %v11624_v17 = vld [vmem:[#allocation2 + $0x13c0] ss:$16 sps:$4 sm:$0xff]   ;;  %v14240_v23 = vpack.c.bf16 %v416_v13, %v396_v59 }
 0x382   :  { %6157 = vmatprep.subr.bf16.mxu0 %v11623_v10  ;;  %v436_v63 = vld [vmem:[%s15348_s0 + $0xbc0] sm:$0xff]  ;;  %v477_v10 = vld [vmem:[%s15348_s0 + $0xd08] sm:$0xff] }
 0x384   :  { %7446 = vmatpush1.bf16.msra.mxu1 %v11612_v18  ;;  %v11630_v18 = vld [vmem:[#allocation2 + $0x13e0] ss:$16 sps:$4 sm:$0xff]  }
 0x385   :  { %7447 = vmatprep.subr.bf16.mxu1 %v11620_v14  ;;  %6158 = vmatpush1.bf16.msra.mxu0 %v11621_v15  ;;  %v456_v14 = vld [vmem:[%s15348_s0 + $0xc60] sm:$0xff] }
 0x386   :  { %7361 = vmatmul.mubr.bf16.gmra.mrb[80].mxu1 %v13712_v0  ;;  %v457_v0 = vld [vmem:[%s15348_s0 + $0xc68] sm:$0xff]  ;;  %6159 = vmatprep.subr.bf16.mxu0 %v11626_v6  ;;  %v476_v15 = vld [vmem:[%s15348_s0 + $0xd00] sm:$0xff] }
 0x387   :  { %6073 = vmatmul.mubr.bf16.gmra.mrb[28].mxu0 %v14220_v24  ;;  %7370 = vmatprep.mubr.bf16.mxu1 %v13714_v36  ;;  %v11627_v36 = vld [vmem:[#allocation2 + $0xfe8] ss:$16 sps:$4 sm:$0xff]   ;;  %v14242_v22 = vpack.c.bf16 %v457_v0, %v437_v62  ;;  %v496_v6 = vld [vmem:[%s15348_s0 + $0xda0] sm:$0xff] }
 0x388   :  { %6082 = vmatprep.mubr.bf16.mxu0 %v14222_v47  ;;  %7448 = vmatpush1.bf16.msra.mxu1 %v11618_v48  ;;  %v14260_v48 = vpack.c.bf16 %v456_v14, %v436_v63  ;;  %v14280_v59 = vpack.c.bf16 %v496_v6, %v476_v15  ;;  %v536_v62 = vld [vmem:[%s15348_s0 + $0xee0] sm:$0xff]  ;;  %v557_v0 = vld [vmem:[%s15348_s0 + $0xf88] sm:$0xff]  ;;  %v119_v63 = vld [vmem:[%s15348_s0 + $0x1d8] sm:$0xff] }
 0x389   :  { %7449 = vmatprep.subr.bf16.mxu1 %v11629_v58  ;;  %6160 = vmatpush1.bf16.msra.mxu0 %v11624_v17  ;;  %v517_v58 = vld [vmem:[%s15348_s0 + $0xe48] sm:$0xff]  ;;  %v118_v6 = vld [vmem:[%s15348_s0 + $0x1d0] sm:$0xff] }
 0x38a   :  { %6161 = vmatprep.subr.bf16.mxu0 %v11632_v11  ;;  %v99_v11 = vld [vmem:[%s15348_s0 + $0x138] sm:$0xff] }
 0x38b   :  { %v11636_v15 = vld [vmem:[#allocation2 + $0x1028] ss:$16 sps:$4 sm:$0xff]  }
 0x38c   :  { %7450 = vmatpush1.bf16.msra.mxu1 %v11627_v36  ;;  %v14299_v36 = vpack.c.bf16 %v557_v0, %v557_v0  ;;  %v11639_v0 = vld [vmem:[#allocation2 + $0x1048] ss:$16 sps:$4 sm:$0xff]  }
 0x38d   :  { %7580 = vmatprep.subr.bf16.mxu1 %v11635_v21  ;;  %6162 = vmatpush1.bf16.msra.mxu0 %v11630_v18 }
 0x38e   :  { %7371 = vmatmul.mubr.bf16.gmra.mrb[84].mxu1 %v13732_v30  ;;  %v497_v30 = vld [vmem:[%s15348_s0 + $0xda8] sm:$0xff] }
 0x38f   :  { %6083 = vmatmul.mubr.bf16.gmra.mrb[32].mxu0 %v14240_v23  ;;  %7380 = vmatprep.mubr.bf16.mxu1 %v13734_v20  ;;  %v14262_v20 = vpack.c.bf16 %v497_v30, %v477_v10  ;;  %v11633_v10 = vld [vmem:[#allocation2 + $0x1008] ss:$16 sps:$4 sm:$0xff]   ;;  %v11638_v30 = vld [vmem:[#allocation2 + $0x102c] ss:$16 sps:$4 sm:$0xff]  }
 0x390   :  { %6092 = vmatprep.mubr.bf16.mxu0 %v14242_v22 }
 0x396   :  { %7381 = vmatmul.mubr.bf16.gmra.mrb[88].mxu1 %v13752_v9  ;;  %v537_v9 = vld [vmem:[%s15348_s0 + $0xee8] sm:$0xff] }
 0x397   :  { %6093 = vmatmul.mubr.bf16.gmra.mrb[36].mxu0 %v14260_v48  ;;  %7390 = vmatprep.mubr.bf16.mxu1 %v13754_v42  ;;  %v14282_v13 = vpack.c.bf16 %v537_v9, %v517_v58  ;;  %v516_v42 = vld [vmem:[%s15348_s0 + $0xe40] sm:$0xff]  ;;  %v138_v58 = vld [vmem:[%s15348_s0 + $0x270] sm:$0xff]  ;;  %v11641_v9 = vld [vmem:[#allocation2 + $0x104c] ss:$16 sps:$4 sm:$0xff]  }
 0x398   :  { %6102 = vmatprep.mubr.bf16.mxu0 %v14262_v20  ;;  %v14297_v17 = vpack.c.bf16 %v536_v62, %v516_v42  ;;  %v179_v42 = vld [vmem:[%s15348_s0 + $0x3b8] sm:$0xff]  ;;  %v14354_v62 = vpack.c.bf16 %v138_v58, %v118_v6  ;;  %v218_v6 = vld [vmem:[%s15348_s0 + $0x4f0] sm:$0xff] }
 0x399   :  { %v239_v58 = vld [vmem:[%s15348_s0 + $0x598] sm:$0xff] }
 0x39e   :  { %7391 = vmatmul.mubr.bf16.gmra.mrb[92].mxu1 %v13772_v44  ;;  %v556_v44 = vld [vmem:[%s15348_s0 + $0xf80] sm:$0xff] }
 0x39f   :  { %6103 = vmatmul.mubr.bf16.gmra.mrb[40].mxu0 %v14280_v59  ;;  %7400 = vmatprep.mubr.bf16.mxu1 %v13774_v46  ;;  %v79_v46 = vld [vmem:[%s15348_s0 + $0x98] sm:$0xff]  ;;  %v14314_v21 = vpack.c.bf16 %v556_v44, %v556_v44 }
 0x3a0   :  { %6112 = vmatprep.mubr.bf16.mxu0 %v14282_v13  ;;  %v14316_v18 = vpack.c.bf16 %v99_v11, %v79_v46  ;;  %v11644_v46 = vld [vmem:[#allocation2 + $0x106c] ss:$16 sps:$4 sm:$0xff]   ;;  %v178_v11 = vld [vmem:[%s15348_s0 + $0x3b0] sm:$0xff] }
 0x3a6   :  { %7401 = vmatmul.mubr.bf16.gmra.mrb[96].mxu1 %v13789_v25  ;;  %v78_v25 = vld [vmem:[%s15348_s0 + $0x90] sm:$0xff] }
 0x3a7   :  { %6113 = vmatmul.mubr.bf16.gmra.mrb[44].mxu0 %v14297_v17  ;;  %7410 = vmatprep.mubr.bf16.mxu1 %v13791_v61  ;;  %v98_v61 = vld [vmem:[%s15348_s0 + $0x130] sm:$0xff] }
 0x3a8   :  { %6122 = vmatprep.mubr.bf16.mxu0 %v14299_v36  ;;  %v14334_v14 = vpack.c.bf16 %v98_v61, %v78_v25  ;;  %v11642_v25 = vld [vmem:[#allocation2 + $0x1068] ss:$16 sps:$4 sm:$0xff]  }
 0x3a9   :  { %v199_v61 = vld [vmem:[%s15348_s0 + $0x458] sm:$0xff] }
 0x3ae   :  { %7411 = vmatmul.mubr.bf16.gmra.mrb[100].mxu1 %v13806_v54  ;;  %v139_v54 = vld [vmem:[%s15348_s0 + $0x278] sm:$0xff] }
 0x3af   :  { %6123 = vmatmul.mubr.bf16.gmra.mrb[48].mxu0 %v14314_v21  ;;  %7451 = vmatprep.mubr.bf16.mxu1 %v13808_v38  ;;  %v14336_v38 = vpack.c.bf16 %v139_v54, %v119_v63  ;;  %v11647_v63 = vld [vmem:[#allocation2 + $0x108c] ss:$16 sps:$4 sm:$0xff]  }
 0x3b0   :  { %6163 = vmatprep.mubr.bf16.mxu0 %v14316_v18 }
 0x3b6   :  { %7452 = vmatmul.mubr.bf16.vlgmr.msra.gmra.mrb[52].mxu1 %v13826_v40  ;;  %v159_v40 = vld [vmem:[%s15348_s0 + $0x318] sm:$0xff] }
 0x3b7   :  { %6164 = vmatmul.mubr.bf16.vlgmr.msra.gmra.mrb[0].mxu0 %v14334_v14  ;;  %7581 = vmatpush1.bf16.msra.mxu1 %v11633_v10  ;;  %v14356_v44 = vpack.c.bf16 %v179_v42, %v159_v40 }
 0x3b8   :  { %6173 = vmatprep.mubr.bf16.mxu0 %v14336_v38  ;;  %7461 = vmatprep.mubr.bf16.mxu1 %v13828_v57  ;;  %v158_v57 = vld [vmem:[%s15348_s0 + $0x310] sm:$0xff] }
 0x3b9   :  { %7582 = vmatprep.subr.bf16.mxu1 %v11638_v30  ;;  %v14374_v54 = vpack.c.bf16 %v178_v11, %v158_v57  ;;  %v11645_v30 = vld [vmem:[#allocation2 + $0x1088] ss:$16 sps:$4 sm:$0xff]  }
 0x3ba   :  { %v15471_v57 = vld [vmem:[#allocation13_spill] sm:$0xff] }
 0x3bb   :  { %7583 = vmatpush1.bf16.msra.mxu1 %v11636_v15  ;;  %v11650_v15 = vld [vmem:[#allocation2 + $0x10ac] ss:$16 sps:$4 sm:$0xff]   ;;  %v11708_v11 = vld [vmem:[%s15351_s3] ss:$8 sps:$4 sm:$0xff]  }
 0x3bc   :  { %7584 = vmatprep.subr.bf16.mxu1 %v11641_v9  ;;  %v11648_v9 = vld [vmem:[#allocation2 + $0x10a8] ss:$16 sps:$4 sm:$0xff]  }
 0x3be   :  { %7462 = vmatmul.mubr.bf16.gmra.mrb[56].mxu1 %v13846_v26  ;;  %v219_v26 = vld [vmem:[%s15348_s0 + $0x4f8] sm:$0xff] }
 0x3bf   :  { %6174 = vmatmul.mubr.bf16.gmra.mrb[4].mxu0 %v14354_v62  ;;  %7585 = vmatpush1.bf16.msra.mxu1 %v11639_v0  ;;  %v14376_v10 = vpack.c.bf16 %v219_v26, %v199_v61  ;;  %v11651_v0 = vld [vmem:[#allocation2 + $0x10c8] ss:$16 sps:$4 sm:$0xff]   ;;  %v238_v61 = vld [vmem:[%s15348_s0 + $0x590] sm:$0xff] }
 0x3c0   :  { %6183 = vmatprep.mubr.bf16.mxu0 %v14356_v44  ;;  %7471 = vmatprep.mubr.bf16.mxu1 %v13848_v2  ;;  %v198_v2 = vld [vmem:[%s15348_s0 + $0x450] sm:$0xff] }
 0x3c1   :  { %7586 = vmatprep.subr.bf16.mxu1 %v11644_v46  ;;  %v14394_v40 = vpack.c.bf16 %v218_v6, %v198_v2  ;;  %v11656_v46 = vld [vmem:[#allocation2 + $0x10ec] ss:$16 sps:$4 sm:$0xff]   ;;  %v258_v26 = vld [vmem:[%s15348_s0 + $0x630] sm:$0xff]  ;;  %v11654_v2 = vld [vmem:[#allocation2 + $0x10e8] ss:$16 sps:$4 sm:$0xff]  }
 0x3c2   :  { %v11659_v6 = vld [vmem:[#allocation2 + $0x110c] ss:$16 sps:$4 sm:$0xff]  }
 0x3c3   :  { %7587 = vmatpush1.bf16.msra.mxu1 %v11642_v25  ;;  %v15472_v25 = vld [vmem:[#allocation14_spill] sm:$0xff] }
 0x3c4   :  { %7588 = vmatprep.subr.bf16.mxu1 %v11647_v63  ;;  %v11710_v63 = vld [vmem:[%s15351_s3 + $0x4] ss:$8 sps:$4 sm:$0xff]  }
 0x3c5   :  { %8438 = vmatprep.subr.bf16.mxu0 %v11710_v63  ;;  %v11717_v63 = vld [vmem:[%s15351_s3 + $0x20] ss:$8 sps:$4 sm:$0xff]  }
 0x3c6   :  { %7472 = vmatmul.mubr.bf16.gmra.mrb[60].mxu1 %v13866_v27  ;;  %v259_v27 = vld [vmem:[%s15348_s0 + $0x638] sm:$0xff]  ;;  %8439 = vmatpush1.bf16.msra.mxu0 %v11708_v11  ;;  %v11719_v11 = vld [vmem:[%s15351_s3 + $0x24] ss:$8 sps:$4 sm:$0xff]  }
 0x3c7   :  { %6184 = vmatmul.mubr.bf16.gmra.mrb[8].mxu0 %v14374_v54  ;;  %7481 = vmatprep.mubr.bf16.mxu1 %v13868_v8  ;;  %v11653_v8 = vld [vmem:[#allocation2 + $0x10cc] ss:$16 sps:$4 sm:$0xff]   ;;  %v14396_v42 = vpack.c.bf16 %v259_v27, %v239_v58  ;;  %v14420_v58 = vpack.c.bf16 %v258_v26, %v238_v61  ;;  %v11660_v61 = vld [vmem:[#allocation2 + $0x1128] ss:$16 sps:$4 sm:$0xff]  }
 0x3c8   :  { %6193 = vmatprep.mubr.bf16.mxu0 %v14376_v10  ;;  %7589 = vmatpush1.bf16.msra.mxu1 %v11645_v30  ;;  %v279_v30 = vld [vmem:[%s15348_s0 + $0x6d8] sm:$0xff] }
 0x3c9   :  { %7590 = vmatprep.subr.bf16.mxu1 %v11650_v15  ;;  %v299_v15 = vld [vmem:[%s15348_s0 + $0x778] sm:$0xff] }
 0x3ca   :  { %v14422_v27 = vpack.c.bf16 %v299_v15, %v279_v30  ;;  %v11665_v26 = vld [vmem:[#allocation2 + $0x114c] ss:$16 sps:$4 sm:$0xff]  }
 0x3cc   :  { %7591 = vmatpush1.bf16.msra.mxu1 %v11648_v9  ;;  %v11657_v9 = vld [vmem:[#allocation2 + $0x1108] ss:$16 sps:$4 sm:$0xff]  }
 0x3cd   :  { %7592 = vmatprep.subr.bf16.mxu1 %v11653_v8  ;;  %v11662_v8 = vld [vmem:[#allocation2 + $0x112c] ss:$16 sps:$4 sm:$0xff]  }
 0x3ce   :  { %7482 = vmatmul.mubr.bf16.gmra.mrb[64].mxu1 %v15471_v57  ;;  %v278_v57 = vld [vmem:[%s15348_s0 + $0x6d0] sm:$0xff] }
 0x3cf   :  { %6194 = vmatmul.mubr.bf16.gmra.mrb[12].mxu0 %v14394_v40  ;;  %7491 = vmatprep.mubr.bf16.mxu1 %v15472_v25  ;;  %v319_v25 = vld [vmem:[%s15348_s0 + $0x818] sm:$0xff] }
 0x3d0   :  { %6203 = vmatprep.mubr.bf16.mxu0 %v14396_v42  ;;  %7593 = vmatpush1.bf16.msra.mxu1 %v11651_v0  ;;  %v11711_v0 = vld [vmem:[%s15351_s3 + $0x10] ss:$8 sps:$4 sm:$0xff]  }
 0x3d1   :  { %7594 = vmatprep.subr.bf16.mxu1 %v11656_v46  ;;  %v11713_v46 = vld [vmem:[%s15351_s3 + $0x14] ss:$8 sps:$4 sm:$0xff]  }
 0x3d2   :  { %8440 = vmatprep.subr.bf16.mxu0 %v11713_v46  ;;  %v11728_v46 = vld [vmem:[%s15351_s3 + $0x44] ss:$8 sps:$4 sm:$0xff]  }
 0x3d3   :  { %8441 = vmatpush1.bf16.msra.mxu0 %v11711_v0  ;;  %v338_v0 = vld [vmem:[%s15348_s0 + $0x8b0] sm:$0xff] }
 0x3d4   :  { %7595 = vmatpush1.bf16.msra.mxu1 %v11654_v2  ;;  %8442 = vmatprep.subr.bf16.mxu0 %v11719_v11  ;;  %v11663_v2 = vld [vmem:[#allocation2 + $0x1148] ss:$16 sps:$4 sm:$0xff]   ;;  %v11671_v11 = vld [vmem:[#allocation2 + $0x118c] ss:$16 sps:$4 sm:$0xff]  }
 0x3d5   :  { %7596 = vmatprep.subr.bf16.mxu1 %v11659_v6  ;;  %v11668_v6 = vld [vmem:[#allocation2 + $0x116c] ss:$16 sps:$4 sm:$0xff]  }
 0x3d6   :  { %7492 = vmatmul.mubr.bf16.gmra.mrb[68].mxu1 %v13906_v43  ;;  %v298_v43 = vld [vmem:[%s15348_s0 + $0x770] sm:$0xff] }
 0x3d7   :  { %6204 = vmatmul.mubr.bf16.gmra.mrb[16].mxu0 %v14420_v58  ;;  %7501 = vmatprep.mubr.bf16.mxu1 %v13908_v41  ;;  %v339_v41 = vld [vmem:[%s15348_s0 + $0x8b8] sm:$0xff]  ;;  %v14452_v30 = vpack.c.bf16 %v298_v43, %v278_v57 }
 0x3d8   :  { %6213 = vmatprep.mubr.bf16.mxu0 %v14422_v27  ;;  %7597 = vmatpush1.bf16.msra.mxu1 %v11657_v9  ;;  %v14454_v15 = vpack.c.bf16 %v339_v41, %v319_v25  ;;  %v318_v9 = vld [vmem:[%s15348_s0 + $0x810] sm:$0xff]  ;;  %v359_v57 = vld [vmem:[%s15348_s0 + $0x958] sm:$0xff] }
 0x3d9   :  { %7598 = vmatprep.subr.bf16.mxu1 %v11662_v8  ;;  %8443 = vmatpush1.bf16.msra.mxu0 %v11717_v63  ;;  %v11723_v8 = vld [vmem:[%s15351_s3 + $0x30] ss:$8 sps:$4 sm:$0xff]   ;;  %v14481_v25 = vpack.c.bf16 %v338_v0, %v318_v9  ;;  %v11674_v63 = vld [vmem:[#allocation2 + $0x11ac] ss:$16 sps:$4 sm:$0xff]  }
 0x3da   :  { %v11666_v43 = vld [vmem:[#allocation2 + $0x1168] ss:$16 sps:$4 sm:$0xff]  }
 0x3db   :  { %v399_v9 = vld [vmem:[%s15348_s0 + $0xa98] sm:$0xff] }
 0x3dc   :  { %7599 = vmatpush1.bf16.msra.mxu1 %v11660_v61  ;;  %v11669_v61 = vld [vmem:[#allocation2 + $0x1188] ss:$16 sps:$4 sm:$0xff]  }
 0x3dd   :  { %7600 = vmatprep.subr.bf16.mxu1 %v11665_v26  ;;  %v11726_v26 = vld [vmem:[%s15351_s3 + $0x40] ss:$8 sps:$4 sm:$0xff]  }
 0x3de   :  { %7502 = vmatmul.mubr.bf16.gmra.mrb[72].mxu1 %v13926_v1  ;;  %v11725_v1 = vld [vmem:[%s15351_s3 + $0x34] ss:$8 sps:$4 sm:$0xff]   ;;  %v11672_v0 = vld [vmem:[#allocation2 + $0x11a8] ss:$16 sps:$4 sm:$0xff]  }
 0x3df   :  { %6214 = vmatmul.mubr.bf16.gmra.mrb[20].mxu0 %v14452_v30  ;;  %7511 = vmatprep.mubr.bf16.mxu1 %v13928_v31  ;;  %v379_v31 = vld [vmem:[%s15348_s0 + $0x9f8] sm:$0xff] }
 0x3e0   :  { %6223 = vmatprep.mubr.bf16.mxu0 %v14454_v15  ;;  %7601 = vmatpush1.bf16.msra.mxu1 %v11663_v2  ;;  %v14483_v41 = vpack.c.bf16 %v379_v31, %v359_v57  ;;  %v358_v2 = vld [vmem:[%s15348_s0 + $0x950] sm:$0xff] }
 0x3e1   :  { %7602 = vmatprep.subr.bf16.mxu1 %v11668_v6  ;;  %8444 = vmatprep.subr.bf16.mxu0 %v11725_v1  ;;  %v378_v6 = vld [vmem:[%s15348_s0 + $0x9f0] sm:$0xff]  ;;  %v11677_v1 = vld [vmem:[#allocation2 + $0x11cc] ss:$16 sps:$4 sm:$0xff]  }
 0x3e2   :  { %8445 = vmatpush1.bf16.msra.mxu0 %v11723_v8  ;;  %v419_v8 = vld [vmem:[%s15348_s0 + $0xb38] sm:$0xff]  ;;  %v14513_v57 = vpack.c.bf16 %v378_v6, %v358_v2  ;;  %v418_v2 = vld [vmem:[%s15348_s0 + $0xb30] sm:$0xff] }
 0x3e3   :  { %8446 = vmatprep.subr.bf16.mxu0 %v11728_v46  ;;  %v11740_v46 = vld [vmem:[%s15351_s3 + $0x64] ss:$8 sps:$4 sm:$0xff]   ;;  %v14515_v31 = vpack.c.bf16 %v419_v8, %v399_v9  ;;  %v459_v6 = vld [vmem:[%s15348_s0 + $0xc78] sm:$0xff] }
 0x3e4   :  { %7603 = vmatpush1.bf16.msra.mxu1 %v11666_v43  ;;  %v11675_v43 = vld [vmem:[#allocation2 + $0x11c8] ss:$16 sps:$4 sm:$0xff]   ;;  %v11749_v8 = vld [vmem:[%s15351_s3 + $0x84] ss:$8 sps:$4 sm:$0xff]  }
 0x3e5   :  { %7604 = vmatprep.subr.bf16.mxu1 %v11671_v11  ;;  %v11738_v11 = vld [vmem:[%s15351_s3 + $0x60] ss:$8 sps:$4 sm:$0xff]  }
 0x3e6   :  { %7512 = vmatmul.mubr.bf16.gmra.mrb[76].mxu1 %v13946_v4  ;;  %v11734_v4 = vld [vmem:[%s15351_s3 + $0x54] ss:$8 sps:$4 sm:$0xff]   ;;  %8447 = vmatpush1.bf16.msra.mxu0 %v11726_v26  ;;  %v11678_v9 = vld [vmem:[#allocation2 + $0x11e8] ss:$16 sps:$4 sm:$0xff]  }
 0x3e7   :  { %6224 = vmatmul.mubr.bf16.gmra.mrb[24].mxu0 %v14481_v25  ;;  %7521 = vmatprep.mubr.bf16.mxu1 %v13948_v28  ;;  %v11732_v28 = vld [vmem:[%s15351_s3 + $0x50] ss:$8 sps:$4 sm:$0xff]   ;;  %v11743_v26 = vld [vmem:[%s15351_s3 + $0x74] ss:$8 sps:$4 sm:$0xff]  }
 0x3e8   :  { %6233 = vmatprep.mubr.bf16.mxu0 %v14483_v41  ;;  %7605 = vmatpush1.bf16.msra.mxu1 %v11669_v61  ;;  %v11680_v61 = vld [vmem:[#allocation2 + $0x11ec] ss:$16 sps:$4 sm:$0xff]  }
 0x3e9   :  { %7606 = vmatprep.subr.bf16.mxu1 %v11674_v63  ;;  %8448 = vmatprep.subr.bf16.mxu0 %v11734_v4  ;;  %v398_v63 = vld [vmem:[%s15348_s0 + $0xa90] sm:$0xff]  ;;  %v11683_v4 = vld [vmem:[#allocation2 + $0x120c] ss:$16 sps:$4 sm:$0xff]  }
 0x3ea   :  { %8449 = vmatpush1.bf16.msra.mxu0 %v11732_v28 }
 0x3eb   :  { %8450 = vmatprep.subr.bf16.mxu0 %v11740_v46  ;;  %v11752_v46 = vld [vmem:[%s15351_s3 + $0x94] ss:$8 sps:$4 sm:$0xff]  }
 0x3ec   :  { %7607 = vmatpush1.bf16.msra.mxu1 %v11672_v0  ;;  %v14545_v0 = vpack.c.bf16 %v418_v2, %v398_v63 }
 0x3ed   :  { %7608 = vmatprep.subr.bf16.mxu1 %v11677_v1  ;;  %v11747_v1 = vld [vmem:[%s15351_s3 + $0x80] ss:$8 sps:$4 sm:$0xff]  }
 0x3ee   :  { %7522 = vmatmul.mubr.bf16.gmra.mrb[80].mxu1 %v13966_v39  ;;  %v439_v39 = vld [vmem:[%s15348_s0 + $0xbd8] sm:$0xff]  ;;  %8451 = vmatpush1.bf16.msra.mxu0 %v11738_v11  ;;  %v458_v11 = vld [vmem:[%s15348_s0 + $0xc70] sm:$0xff] }
 0x3ef   :  { %6234 = vmatmul.mubr.bf16.gmra.mrb[28].mxu0 %v14513_v57  ;;  %7531 = vmatprep.mubr.bf16.mxu1 %v13968_v60  ;;  %v11741_v60 = vld [vmem:[%s15351_s3 + $0x70] ss:$8 sps:$4 sm:$0xff]   ;;  %v14547_v28 = vpack.c.bf16 %v459_v6, %v439_v39  ;;  %v11756_v39 = vld [vmem:[%s15351_s3 + $0xa0] ss:$8 sps:$4 sm:$0xff]  }
 0x3f0   :  { %6243 = vmatprep.mubr.bf16.mxu0 %v14515_v31  ;;  %7609 = vmatpush1.bf16.msra.mxu1 %v11675_v43  ;;  %v438_v43 = vld [vmem:[%s15348_s0 + $0xbd0] sm:$0xff] }
 0x3f1   :  { %7610 = vmatprep.subr.bf16.mxu1 %v11680_v61  ;;  %8452 = vmatprep.subr.bf16.mxu0 %v11743_v26  ;;  %v499_v61 = vld [vmem:[%s15348_s0 + $0xdb8] sm:$0xff]  ;;  %v11758_v26 = vld [vmem:[%s15351_s3 + $0xa4] ss:$8 sps:$4 sm:$0xff]   ;;  %v14577_v63 = vpack.c.bf16 %v458_v11, %v438_v43  ;;  %v478_v6 = vld [vmem:[%s15348_s0 + $0xd10] sm:$0xff] }
 0x3f2   :  { %8453 = vmatpush1.bf16.msra.mxu0 %v11741_v60  ;;  %v11764_v60 = vld [vmem:[%s15351_s3 + $0xb4] ss:$8 sps:$4 sm:$0xff]   ;;  %v11765_v43 = vld [vmem:[%s15351_s3 + $0xc0] ss:$8 sps:$4 sm:$0xff]  }
 0x3f3   :  { %8454 = vmatprep.subr.bf16.mxu0 %v11749_v8  ;;  %v11767_v8 = vld [vmem:[%s15351_s3 + $0xc4] ss:$8 sps:$4 sm:$0xff]   ;;  %v11770_v11 = vld [vmem:[%s15351_s3 + $0xd4] ss:$8 sps:$4 sm:$0xff]  }
 0x3f4   :  { %7611 = vmatpush1.bf16.msra.mxu1 %v11678_v9  ;;  %v498_v9 = vld [vmem:[%s15348_s0 + $0xdb0] sm:$0xff] }
 0x3f5   :  { %7741 = vmatprep.subr.bf16.mxu1 %v11683_v4  ;;  %v11762_v4 = vld [vmem:[%s15351_s3 + $0xb0] ss:$8 sps:$4 sm:$0xff]  }
 0x3f6   :  { %7532 = vmatmul.mubr.bf16.gmra.mrb[84].mxu1 %v13986_v50  ;;  %v479_v50 = vld [vmem:[%s15348_s0 + $0xd18] sm:$0xff]  ;;  %8455 = vmatpush1.bf16.msra.mxu0 %v11747_v1  ;;  %v14609_v1 = vpack.c.bf16 %v498_v9, %v478_v6  ;;  %v11771_v6 = vld [vmem:[%s15351_s3 + $0xe0] ss:$8 sps:$4 sm:$0xff]  }
 0x3f7   :  { %6244 = vmatmul.mubr.bf16.gmra.mrb[32].mxu0 %v14545_v0  ;;  %7541 = vmatprep.mubr.bf16.mxu1 %v13988_v32  ;;  %v11750_v32 = vld [vmem:[%s15351_s3 + $0x90] ss:$8 sps:$4 sm:$0xff]   ;;  %v14579_v2 = vpack.c.bf16 %v499_v61, %v479_v50  ;;  %v11776_v9 = vld [vmem:[%s15351_s3 + $0xf4] ss:$8 sps:$4 sm:$0xff]  }
 0x3f8   :  { %6253 = vmatprep.mubr.bf16.mxu0 %v14547_v28  ;;  %8456 = vmatprep.subr.bf16.mxu0 %v11752_v46  ;;  %v518_v50 = vld [vmem:[%s15348_s0 + $0xe50] sm:$0xff] }
 0x3f9   :  { %v538_v61 = vld [vmem:[%s15348_s0 + $0xef0] sm:$0xff] }
 0x3fa   :  { %8457 = vmatpush1.bf16.msra.mxu0 %v11750_v32  ;;  %v11768_v32 = vld [vmem:[%s15351_s3 + $0xd0] ss:$8 sps:$4 sm:$0xff]  }
 0x3fb   :  { %8458 = vmatprep.subr.bf16.mxu0 %v11758_v26  ;;  %v14635_v26 = vpack.c.bf16 %v538_v61, %v518_v50  ;;  %v11698_v50 = vld [vmem:[#allocation2 + $0x12ac] ss:$16 sps:$4 sm:$0xff]  }
 0x3fc   :  { %v15474_v61 = vld [vmem:[#allocation66_spill] sm:$0xff] }
 0x3fe   :  { %7542 = vmatmul.mubr.bf16.gmra.mrb[88].mxu1 %v14006_v5  ;;  %v519_v5 = vld [vmem:[%s15348_s0 + $0xe58] sm:$0xff]  ;;  %8459 = vmatpush1.bf16.msra.mxu0 %v11756_v39 }
 0x3ff   :  { %6254 = vmatmul.mubr.bf16.gmra.mrb[36].mxu0 %v14577_v63  ;;  %7551 = vmatprep.mubr.bf16.mxu1 %v14008_v19  ;;  %v539_v19 = vld [vmem:[%s15348_s0 + $0xef8] sm:$0xff] }
 0x400   :  { %6263 = vmatprep.mubr.bf16.mxu0 %v14579_v2  ;;  %8460 = vmatprep.subr.bf16.mxu0 %v11764_v60  ;;  %v14611_v46 = vpack.c.bf16 %v539_v19, %v519_v5  ;;  %v558_v60 = vld [vmem:[%s15348_s0 + $0xf90] sm:$0xff] }
 0x401   :  { %v11774_v5 = vld [vmem:[%s15351_s3 + $0xf0] ss:$8 sps:$4 sm:$0xff]   ;;  %v14658_v19 = vpack.c.bf16 %v558_v60, %v558_v60  ;;  %v11707_v60 = vld [vmem:[#allocation2 + $0x130c] ss:$16 sps:$4 sm:$0xff]  }
 0x402   :  { %8461 = vmatpush1.bf16.msra.mxu0 %v11762_v4  ;;  %v11684_v4 = vld [vmem:[#allocation2 + $0x1228] ss:$16 sps:$4 sm:$0xff]  }
 0x403   :  { %8462 = vmatprep.subr.bf16.mxu0 %v11767_v8  ;;  %v11689_v8 = vld [vmem:[#allocation2 + $0x124c] ss:$16 sps:$4 sm:$0xff]  }
 0x406   :  { %7552 = vmatmul.mubr.bf16.gmra.mrb[92].mxu1 %v14026_v49  ;;  %v559_v49 = vld [vmem:[%s15348_s0 + $0xf98] sm:$0xff]  ;;  %8463 = vmatpush1.bf16.msra.mxu0 %v11765_v43 }
 0x407   :  { %6264 = vmatmul.mubr.bf16.gmra.mrb[40].mxu0 %v14609_v1  ;;  %7561 = vmatprep.mubr.bf16.mxu1 %v14028_v51  ;;  %v11773_v51 = vld [vmem:[%s15351_s3 + $0xe4] ss:$8 sps:$4 sm:$0xff]   ;;  %v14640_v39 = vpack.c.bf16 %v559_v49, %v559_v49  ;;  %v11687_v43 = vld [vmem:[#allocation2 + $0x1248] ss:$16 sps:$4 sm:$0xff]  }
 0x408   :  { %6273 = vmatprep.mubr.bf16.mxu0 %v14611_v46  ;;  %8464 = vmatprep.subr.bf16.mxu0 %v11770_v11  ;;  %v11692_v11 = vld [vmem:[#allocation2 + $0x126c] ss:$16 sps:$4 sm:$0xff]   ;;  %v11696_v49 = vld [vmem:[#allocation2 + $0x12a8] ss:$16 sps:$4 sm:$0xff]  }
 0x40a   :  { %8465 = vmatpush1.bf16.msra.mxu0 %v11768_v32  ;;  %v11701_v32 = vld [vmem:[#allocation2 + $0x12cc] ss:$16 sps:$4 sm:$0xff]  }
 0x40b   :  { %8466 = vmatprep.subr.bf16.mxu0 %v11773_v51  ;;  %v11704_v51 = vld [vmem:[#allocation2 + $0x12ec] ss:$16 sps:$4 sm:$0xff]  }
 0x40e   :  { %7562 = vmatmul.mubr.bf16.gmra.mrb[96].mxu1 %v14043_v45  ;;  %8467 = vmatpush1.bf16.msra.mxu0 %v11771_v6  ;;  %v11681_v45 = vld [vmem:[#allocation2 + $0x1208] ss:$16 sps:$4 sm:$0xff]   ;;  %v15476_v6 = vld [vmem:[#allocation10_spill] sm:$0xff] }
 0x40f   :  { %6274 = vmatmul.mubr.bf16.gmra.mrb[44].mxu0 %v14635_v26  ;;  %7571 = vmatprep.mubr.bf16.mxu1 %v14045_v53  ;;  %v11686_v53 = vld [vmem:[#allocation2 + $0x122c] ss:$16 sps:$4 sm:$0xff]  }
 0x410   :  { %6283 = vmatprep.mubr.bf16.mxu0 %v14640_v39  ;;  %8468 = vmatprep.subr.bf16.mxu0 %v11776_v9  ;;  %v11702_v9 = vld [vmem:[#allocation2 + $0x12e8] ss:$16 sps:$4 sm:$0xff]  }
 0x412   :  { %8469 = vmatpush1.bf16.msra.mxu0 %v11774_v5  ;;  %v11705_v5 = vld [vmem:[#allocation2 + $0x1308] ss:$16 sps:$4 sm:$0xff]  }
 0x416   :  { %7572 = vmatmul.mubr.bf16.gmra.mrb[100].mxu1 %v14060_v7  ;;  %v11690_v7 = vld [vmem:[#allocation2 + $0x1268] ss:$16 sps:$4 sm:$0xff]  }
 0x417   :  { %6284 = vmatmul.mubr.bf16.gmra.mrb[48].mxu0 %v14658_v19  ;;  %7612 = vmatprep.mubr.bf16.mxu1 %v14062_v52  ;;  %v11695_v52 = vld [vmem:[#allocation2 + $0x128c] ss:$16 sps:$4 sm:$0xff]  }
 0x41e   :  { %7613 = vmatmul.mubr.bf16.vlgmr.msra.gmra.mrb[52].mxu1 %v14080_v55  ;;  %v11693_v55 = vld [vmem:[#allocation2 + $0x1288] ss:$16 sps:$4 sm:$0xff]  }
 0x41f   :  { %7742 = vmatpush1.bf16.msra.mxu1 %v11681_v45  ;;  %7622 = vmatprep.mubr.bf16.mxu1 %v14082_v56  ;;  %v15473_v56 = vld [vmem:[#allocation15_spill] sm:$0xff] }
 0x420   :  { %7743 = vmatprep.subr.bf16.mxu1 %v11686_v53  ;;  %v11716_v45 = vld [vmem:[#allocation2 + $0x132c] ss:$16 sps:$4 sm:$0xff]   ;;  %v11714_v53 = vld [vmem:[#allocation2 + $0x1328] ss:$16 sps:$4 sm:$0xff]  }
 0x423   :  { %7744 = vmatpush1.bf16.msra.mxu1 %v11684_v4  ;;  %v11722_v4 = vld [vmem:[#allocation2 + $0x134c] ss:$16 sps:$4 sm:$0xff]  }
 0x424   :  { %7745 = vmatprep.subr.bf16.mxu1 %v11689_v8  ;;  %v11720_v8 = vld [vmem:[#allocation2 + $0x1348] ss:$16 sps:$4 sm:$0xff]  }
 0x426   :  { %7623 = vmatmul.mubr.bf16.gmra.mrb[56].mxu1 %v14100_v29  ;;  %v11699_v29 = vld [vmem:[#allocation2 + $0x12c8] ss:$16 sps:$4 sm:$0xff]  }
 0x427   :  { %7746 = vmatpush1.bf16.msra.mxu1 %v11687_v43  ;;  %7632 = vmatprep.mubr.bf16.mxu1 %v14102_v12  ;;  %v15475_v12 = vld [vmem:[#allocation16_spill] sm:$0xff] }
 0x428   :  { %7747 = vmatprep.subr.bf16.mxu1 %v11692_v11  ;;  %v11731_v43 = vld [vmem:[#allocation2 + $0x136c] ss:$16 sps:$4 sm:$0xff]   ;;  %v11729_v11 = vld [vmem:[#allocation2 + $0x1368] ss:$16 sps:$4 sm:$0xff]  }
 0x42b   :  { %7748 = vmatpush1.bf16.msra.mxu1 %v11690_v7  ;;  %v11737_v7 = vld [vmem:[#allocation2 + $0x138c] ss:$16 sps:$4 sm:$0xff]  }
 0x42c   :  { %7749 = vmatprep.subr.bf16.mxu1 %v11695_v52  ;;  %v11744_v52 = vld [vmem:[#allocation2 + $0x13a8] ss:$16 sps:$4 sm:$0xff]  }
 0x42e   :  { %7633 = vmatmul.mubr.bf16.gmra.mrb[60].mxu1 %v15473_v56 }
 0x42f   :  { %7642 = vmatprep.mubr.bf16.mxu1 %v15474_v61  ;;  %7750 = vmatpush1.bf16.msra.mxu1 %v11693_v55  ;;  %v11755_v55 = vld [vmem:[#allocation2 + $0x13cc] ss:$16 sps:$4 sm:$0xff]  }
 0x430   :  { %7751 = vmatprep.subr.bf16.mxu1 %v11698_v50  ;;  %v11759_v50 = vld [vmem:[#allocation2 + $0x13e8] ss:$16 sps:$4 sm:$0xff]  }
 0x433   :  { %7752 = vmatpush1.bf16.msra.mxu1 %v11696_v49 }
 0x434   :  { %7753 = vmatprep.subr.bf16.mxu1 %v11701_v32  ;;  %v15480_v32 = vld [vmem:[#allocation20_spill] sm:$0xff] }
 0x436   :  { %7643 = vmatmul.mubr.bf16.gmra.mrb[64].mxu1 %v15475_v12 }
 0x437   :  { %7652 = vmatprep.mubr.bf16.mxu1 %v15476_v6  ;;  %7754 = vmatpush1.bf16.msra.mxu1 %v11699_v29 }
 0x438   :  { %7755 = vmatprep.subr.bf16.mxu1 %v11704_v51 }
 0x43b   :  { %7756 = vmatpush1.bf16.msra.mxu1 %v11702_v9 }
 0x43c   :  { %7757 = vmatprep.subr.bf16.mxu1 %v11707_v60 }
 0x43e   :  { %7653 = vmatmul.mubr.bf16.gmra.mrb[68].mxu1 %v14160_v16  ;;  %v11735_v16 = vld [vmem:[#allocation2 + $0x1388] ss:$16 sps:$4 sm:$0xff]  }
 0x43f   :  { %7662 = vmatprep.mubr.bf16.mxu1 %v14162_v33  ;;  %7758 = vmatpush1.bf16.msra.mxu1 %v11705_v5  ;;  %v11746_v33 = vld [vmem:[#allocation2 + $0x13ac] ss:$16 sps:$4 sm:$0xff]  }
 0x440   :  { %7759 = vmatprep.subr.bf16.mxu1 %v11716_v45 }
 0x443   :  { %7760 = vmatpush1.bf16.msra.mxu1 %v11714_v53  ;;  %v15481_v53 = vld [vmem:[#allocation21_spill] sm:$0xff] }
 0x444   :  { %7761 = vmatprep.subr.bf16.mxu1 %v11722_v4 }
 0x446   :  { %7663 = vmatmul.mubr.bf16.gmra.mrb[72].mxu1 %v14180_v37  ;;  %v11753_v37 = vld [vmem:[#allocation2 + $0x13c8] ss:$16 sps:$4 sm:$0xff]  }
 0x447   :  { %7672 = vmatprep.mubr.bf16.mxu1 %v14182_v35  ;;  %7762 = vmatpush1.bf16.msra.mxu1 %v11720_v8  ;;  %v11761_v35 = vld [vmem:[#allocation2 + $0x13ec] ss:$16 sps:$4 sm:$0xff]  }
 0x448   :  { %7763 = vmatprep.subr.bf16.mxu1 %v11731_v43  ;;  %v15482_v43 = vld [vmem:[#allocation22_spill] sm:$0xff] }
 0x44b   :  { %7764 = vmatpush1.bf16.msra.mxu1 %v11729_v11 }
 0x44c   :  { %7765 = vmatprep.subr.bf16.mxu1 %v11737_v7 }
 0x44e   :  { %7673 = vmatmul.mubr.bf16.gmra.mrb[76].mxu1 %v14200_v34  ;;  %v11779_v34 = vld [vmem:[%s15351_s3 + $0x104] ss:$8 sps:$4 sm:$0xff]  }
 0x44f   :  { %7682 = vmatprep.mubr.bf16.mxu1 %v14202_v3  ;;  %7766 = vmatpush1.bf16.msra.mxu1 %v11735_v16  ;;  %v1462_v3 = vlaneseq }
 0x450   :  { %7767 = vmatprep.subr.bf16.mxu1 %v11746_v33  ;;  %8599 = vmatprep.subr.bf16.mxu0 %v11779_v34  ;;  %v11777_v33 = vld [vmem:[%s15351_s3 + $0x100] ss:$8 sps:$4 sm:$0xff]  }
 0x453   :  { %7768 = vmatpush1.bf16.msra.mxu1 %v11744_v52  ;;  %v15483_v52 = vld [vmem:[#allocation23_spill] sm:$0xff] }
 0x454   :  { %7769 = vmatprep.subr.bf16.mxu1 %v11755_v55 }
 0x456   :  { %7683 = vmatmul.mubr.bf16.gmra.mrb[80].mxu1 %v14220_v24  ;;  %v14690_v24 = vshrl.u32 %v1462_v3, 7 }
 0x457   :  { %7692 = vmatprep.mubr.bf16.mxu1 %v14222_v47  ;;  %7770 = vmatpush1.bf16.msra.mxu1 %v11753_v37 }
 0x458   :  { %7771 = vmatprep.subr.bf16.mxu1 %v11761_v35  ;;  %v1464_v47 = vsub.s32 0, %v14690_v24  ;;  %v15484_v35 = vld [vmem:[#allocation24_spill] sm:$0xff] }
 0x45b   :  { %7772 = vmatpush1.bf16.msra.mxu1 %v11759_v50 }
 0x45e   :  { %7693 = vmatmul.mubr.bf16.gmra.mrb[84].mxu1 %v14240_v23  ;;  %v14695_v23 = vld [vmem:[#allocation4] sm:$0xf] }
 0x45f   :  { %7702 = vmatprep.mubr.bf16.mxu1 %v14242_v22  ;;  %v1468_v22 = vsub.s32 1, %v14690_v24 }
 0x466   :  { %7703 = vmatmul.mubr.bf16.gmra.mrb[88].mxu1 %v14260_v48  ;;  %v14701_v48 = vrot.slane %v14695_v23, %v1464_v47 }
 0x467   :  { %7712 = vmatprep.mubr.bf16.mxu1 %v14262_v20  ;;  %v14706_v20 = vrot.slane %v14695_v23, %v1468_v22 }
 0x468   :  { %v4727_v4 = vadd.f32 %v15481_v53, %v14701_v48  ;;  %v15488_v53 = vld [vmem:[#allocation28_spill] sm:$0xff] }
 0x469   :  { %v4723_v29 = vadd.f32 %v15480_v32, %v14706_v20  ;;  %v4729_v11 = vadd.f32 %v15482_v43, %v14706_v20  ;;  %v4733_v50 = vadd.f32 %v15484_v35, %v14706_v20  ;;  %v15485_v32 = vld [vmem:[#allocation25_spill] sm:$0xff] }
 0x46a   :  { %v15489_v35 = vld [vmem:[#allocation29_spill] sm:$0xff] }
 0x46e   :  { %7713 = vmatmul.mubr.bf16.gmra.mrb[92].mxu1 %v14280_v59  ;;  %v15477_v59 = vld [vmem:[#allocation17_spill] sm:$0xff] }
 0x46f   :  { %7722 = vmatprep.mubr.bf16.mxu1 %v14282_v13  ;;  %v4717_v13 = vadd.f32 %v15477_v59, %v14701_v48 }
 0x476   :  { %7723 = vmatmul.mubr.bf16.gmra.mrb[96].mxu1 %v14297_v17  ;;  %v15478_v17 = vld [vmem:[#allocation18_spill] sm:$0xff] }
 0x477   :  { %7732 = vmatprep.mubr.bf16.mxu1 %v14299_v36  ;;  %v4719_v36 = vadd.f32 %v15478_v17, %v14706_v20 }
 0x47e   :  { %7733 = vmatmul.mubr.bf16.gmra.mrb[100].mxu1 %v14314_v21 }
 0x47f   :  { %7773 = vmatprep.mubr.bf16.mxu1 %v14316_v18  ;;  %v15479_v18 = vld [vmem:[#allocation19_spill] sm:$0xff] }
 0x480   :  { %v4721_v56 = vadd.f32 %v15479_v18, %v14701_v48 }
 0x486   :  { %7774 = vmatmul.mubr.bf16.vlgmr.msra.gmra.mrb[52].mxu1 %v14334_v14 }
 0x487   :  { %7783 = vmatprep.mubr.bf16.mxu1 %v14336_v38 }
 0x48a   :  { %v6165_v21 = vpop.f32.mrb[0].mxu0 }
 0x48b   :  { %v9683_v61 = vadd.f32 %v6165_v21, %v4717_v13  ;;  %v6167_v49 = vpop.f32.mrb[1].mxu0 }
 0x48c   :  { %v9685_v51 = vadd.f32 %v6167_v49, %v4719_v36  ;;  %v6169_v12 = vpop.f32.mrb[2].mxu0  ;;  %v11780_v36 = vld [vmem:[%s15351_s3 + $0x110] ss:$8 sps:$4 sm:$0xff]  }
 0x48d   :  { %v9687_v14 = vadd.f32 %v6169_v12, %v4721_v56  ;;  %v6171_v6 = vpop.f32.mrb[3].mxu0  ;;  %v7902_v9 = vmax.f32 %v9683_v61, 0.0  ;;  %v11785_v56 = vld [vmem:[%s15351_s3 + $0x124] ss:$8 sps:$4 sm:$0xff]  }
 0x48e   :  { %v9689_v38 = vadd.f32 %v6171_v6, %v4723_v29  ;;  %7784 = vmatmul.mubr.bf16.gmra.mrb[56].mxu1 %v14354_v62  ;;  %v7903_v5 = vmax.f32 %v9685_v51, 0.0  ;;  %v4731_v62 = vadd.f32 %v15483_v52, %v14701_v48  ;;  %v4737_v29 = vadd.f32 %v15485_v32, %v14701_v48  ;;  %v15486_v12 = vld [vmem:[#allocation26_spill] sm:$0xff] }
 0x48f   :  { %v7906_v60 = vmax.f32 %v9687_v14, 0.0  ;;  %7793 = vmatprep.mubr.bf16.mxu1 %v14356_v44  ;;  %v11782_v44 = vld [vmem:[%s15351_s3 + $0x114] ss:$8 sps:$4 sm:$0xff]   ;;  %v4739_v14 = vadd.f32 %v15486_v12, %v14706_v20 }
 0x490   :  { %v7907_v45 = vmax.f32 %v9689_v38, 0.0 }
 0x491   :  { %v8002_v8 = vpack.c.bf16 %v7906_v60, %v7902_v9  ;;  %v15487_v9 = vld [vmem:[#allocation27_spill] sm:$0xff] }
 0x492   :  { %v8003_v7 = vpack.c.bf16 %v7907_v45, %v7903_v5  ;;  %v6175_v16 = vpop.f32.mrb[4].mxu0  ;;  %v4741_v60 = vadd.f32 %v15487_v9, %v14701_v48  ;;  %v11797_v9 = vld [vmem:[%s15351_s3 + $0x164] ss:$8 sps:$4 sm:$0xff]  }
 0x493   :  { %v9691_v55 = vadd.f32 %v6175_v16, %v4727_v4  ;;  %v6177_v37 = vpop.f32.mrb[5].mxu0  ;;  %v4743_v4 = vadd.f32 %v15488_v53, %v14706_v20 }
 0x494   :  { %v9693_v34 = vadd.f32 %v6177_v37, %v4729_v11  ;;  %v6179_v3 = vpop.f32.mrb[6].mxu0  ;;  %8470 = vmatprep.mubr.bf16.mxu0 %v8003_v7 }
 0x495   :  { %v9695_v59 = vadd.f32 %v6179_v3, %v4731_v62  ;;  %v6181_v13 = vpop.f32.mrb[7].mxu0  ;;  %8471 = vmatmul.mubr.bf16.vlgmr.msra.gmra.mrb[52].mxu0 %v8002_v8  ;;  %v7910_v21 = vmax.f32 %v9691_v55, 0.0  ;;  %v11791_v55 = vld [vmem:[%s15351_s3 + $0x144] ss:$8 sps:$4 sm:$0xff]  }
 0x496   :  { %v9697_v17 = vadd.f32 %v6181_v13, %v4733_v50  ;;  %8600 = vmatpush1.bf16.msra.mxu0 %v11777_v33  ;;  %7794 = vmatmul.mubr.bf16.gmra.mrb[60].mxu1 %v14374_v54  ;;  %v7911_v61 = vmax.f32 %v9693_v34, 0.0  ;;  %v11783_v54 = vld [vmem:[%s15351_s3 + $0x120] ss:$8 sps:$4 sm:$0xff]   ;;  %v11786_v33 = vld [vmem:[%s15351_s3 + $0x130] ss:$8 sps:$4 sm:$0xff]   ;;  %v4747_v50 = vadd.f32 %v15489_v35, %v14701_v48 }
 0x497   :  { %v7914_v18 = vmax.f32 %v9695_v59, 0.0  ;;  %8601 = vmatprep.subr.bf16.mxu0 %v11782_v44  ;;  %7803 = vmatprep.mubr.bf16.mxu1 %v14376_v10  ;;  %v11788_v10 = vld [vmem:[%s15351_s3 + $0x134] ss:$8 sps:$4 sm:$0xff]  }
 0x498   :  { %v7915_v49 = vmax.f32 %v9697_v17, 0.0  ;;  %v15490_v3 = vld [vmem:[#allocation30_spill] sm:$0xff] }
 0x499   :  { %v8006_v51 = vpack.c.bf16 %v7914_v18, %v7910_v21  ;;  %v4749_v59 = vadd.f32 %v15490_v3, %v14706_v20  ;;  %v11798_v3 = vld [vmem:[%s15351_s3 + $0x170] ss:$8 sps:$4 sm:$0xff]  }
 0x49a   :  { %v8007_v6 = vpack.c.bf16 %v7915_v49, %v7911_v61  ;;  %v6185_v38 = vpop.f32.mrb[8].mxu0  ;;  %8602 = vmatpush1.bf16.msra.mxu0 %v11780_v36  ;;  %v15491_v36 = vld [vmem:[#allocation31_spill] sm:$0xff]  ;;  %v15492_v61 = vld [vmem:[#allocation32_spill] sm:$0xff] }
 0x49b   :  { %v9699_v5 = vadd.f32 %v6185_v38, %v4737_v29  ;;  %v6187_v45 = vpop.f32.mrb[9].mxu0  ;;  %8603 = vmatprep.subr.bf16.mxu0 %v11785_v56  ;;  %v4751_v21 = vadd.f32 %v15491_v36, %v14701_v48  ;;  %v4753_v49 = vadd.f32 %v15492_v61, %v14706_v20 }
 0x49c   :  { %v9701_v8 = vadd.f32 %v6187_v45, %v4739_v14  ;;  %v6189_v43 = vpop.f32.mrb[10].mxu0  ;;  %8480 = vmatprep.mubr.bf16.mxu0 %v8007_v6  ;;  %v11792_v6 = vld [vmem:[%s15351_s3 + $0x150] ss:$8 sps:$4 sm:$0xff]   ;;  %v15493_v45 = vld [vmem:[#allocation33_spill] sm:$0xff] }
 0x49d   :  { %v9703_v11 = vadd.f32 %v6189_v43, %v4741_v60  ;;  %v6191_v7 = vpop.f32.mrb[11].mxu0  ;;  %8481 = vmatmul.mubr.bf16.gmra.mrb[56].mxu0 %v8006_v51  ;;  %v7918_v52 = vmax.f32 %v9699_v5, 0.0 }
 0x49e   :  { %v9705_v16 = vadd.f32 %v6191_v7, %v4743_v4  ;;  %8604 = vmatpush1.bf16.msra.mxu0 %v11783_v54  ;;  %7804 = vmatmul.mubr.bf16.gmra.mrb[64].mxu1 %v14394_v40  ;;  %v7919_v37 = vmax.f32 %v9701_v8, 0.0  ;;  %v11789_v40 = vld [vmem:[%s15351_s3 + $0x140] ss:$8 sps:$4 sm:$0xff]   ;;  %v15494_v4 = vld [vmem:[#allocation34_spill] sm:$0xff]  ;;  %v15495_v7 = vld [vmem:[#allocation35_spill] sm:$0xff] }
 0x49f   :  { %v7922_v62 = vmax.f32 %v9703_v11, 0.0  ;;  %8605 = vmatprep.subr.bf16.mxu0 %v11788_v10  ;;  %7813 = vmatprep.mubr.bf16.mxu1 %v14396_v42  ;;  %v11794_v42 = vld [vmem:[%s15351_s3 + $0x154] ss:$8 sps:$4 sm:$0xff]   ;;  %v4757_v10 = vadd.f32 %v15493_v45, %v14701_v48  ;;  %v4759_v8 = vadd.f32 %v15494_v4, %v14706_v20 }
 0x4a0   :  { %v7923_v44 = vmax.f32 %v9705_v16, 0.0  ;;  %v4761_v16 = vadd.f32 %v15495_v7, %v14701_v48 }
 0x4a1   :  { %v8010_v34 = vpack.c.bf16 %v7922_v62, %v7918_v52  ;;  %v15496_v62 = vld [vmem:[#allocation36_spill] sm:$0xff] }
 0x4a2   :  { %v8011_v13 = vpack.c.bf16 %v7923_v44, %v7919_v37  ;;  %v6195_v17 = vpop.f32.mrb[12].mxu0  ;;  %8606 = vmatpush1.bf16.msra.mxu0 %v11786_v33 }
 0x4a3   :  { %v9707_v18 = vadd.f32 %v6195_v17, %v4747_v50  ;;  %v6197_v56 = vpop.f32.mrb[13].mxu0  ;;  %8607 = vmatprep.subr.bf16.mxu0 %v11791_v55  ;;  %v4763_v55 = vadd.f32 %v15496_v62, %v14706_v20  ;;  %v11803_v17 = vld [vmem:[%s15351_s3 + $0x184] ss:$8 sps:$4 sm:$0xff]  }
 0x4a4   :  { %v9709_v32 = vadd.f32 %v6197_v56, %v4749_v59  ;;  %v6199_v29 = vpop.f32.mrb[14].mxu0  ;;  %8490 = vmatprep.mubr.bf16.mxu0 %v8011_v13 }
 0x4a5   :  { %v9711_v51 = vadd.f32 %v6199_v29, %v4751_v21  ;;  %v6201_v12 = vpop.f32.mrb[15].mxu0  ;;  %8491 = vmatmul.mubr.bf16.gmra.mrb[60].mxu0 %v8010_v34  ;;  %v7926_v38 = vmax.f32 %v9707_v18, 0.0  ;;  %v15497_v21 = vld [vmem:[#allocation37_spill] sm:$0xff]  ;;  %v15499_v29 = vld [vmem:[#allocation39_spill] sm:$0xff] }
 0x4a6   :  { %v9713_v14 = vadd.f32 %v6201_v12, %v4753_v49  ;;  %8608 = vmatpush1.bf16.msra.mxu0 %v11789_v40  ;;  %7814 = vmatmul.mubr.bf16.gmra.mrb[68].mxu1 %v14420_v58  ;;  %v7927_v60 = vmax.f32 %v9709_v32, 0.0  ;;  %v11795_v58 = vld [vmem:[%s15351_s3 + $0x160] ss:$8 sps:$4 sm:$0xff]   ;;  %v4767_v18 = vadd.f32 %v15497_v21, %v14701_v48 }
 0x4a7   :  { %v7930_v54 = vmax.f32 %v9711_v51, 0.0  ;;  %8609 = vmatprep.subr.bf16.mxu0 %v11794_v42  ;;  %7823 = vmatprep.mubr.bf16.mxu1 %v14422_v27  ;;  %v11800_v27 = vld [vmem:[%s15351_s3 + $0x174] ss:$8 sps:$4 sm:$0xff]   ;;  %v4771_v51 = vadd.f32 %v15499_v29, %v14701_v48 }
 0x4a8   :  { %v7931_v5 = vmax.f32 %v9713_v14, 0.0  ;;  %v15498_v42 = vld [vmem:[#allocation38_spill] sm:$0xff] }
 0x4a9   :  { %v8014_v53 = vpack.c.bf16 %v7930_v54, %v7926_v38  ;;  %v4769_v61 = vadd.f32 %v15498_v42, %v14706_v20  ;;  %v15506_v29 = vld [vmem:[#allocation46_spill] sm:$0xff] }
 0x4aa   :  { %v8015_v43 = vpack.c.bf16 %v7931_v5, %v7927_v60  ;;  %v6205_v11 = vpop.f32.mrb[16].mxu0  ;;  %8610 = vmatpush1.bf16.msra.mxu0 %v11792_v6  ;;  %v15500_v6 = vld [vmem:[#allocation40_spill] sm:$0xff] }
 0x4ab   :  { %v9715_v33 = vadd.f32 %v6205_v11, %v4757_v10  ;;  %v6207_v52 = vpop.f32.mrb[17].mxu0  ;;  %8611 = vmatprep.subr.bf16.mxu0 %v11797_v9  ;;  %v4773_v38 = vadd.f32 %v15500_v6, %v14706_v20  ;;  %v11804_v10 = vld [vmem:[%s15351_s3 + $0x190] ss:$8 sps:$4 sm:$0xff]  }
 0x4ac   :  { %v9717_v37 = vadd.f32 %v6207_v52, %v4759_v8  ;;  %v6209_v44 = vpop.f32.mrb[18].mxu0  ;;  %8500 = vmatprep.mubr.bf16.mxu0 %v8015_v43  ;;  %v11809_v8 = vld [vmem:[%s15351_s3 + $0x1a4] ss:$8 sps:$4 sm:$0xff]  }
 0x4ad   :  { %v9719_v35 = vadd.f32 %v6209_v44, %v4761_v16  ;;  %v6211_v50 = vpop.f32.mrb[19].mxu0  ;;  %8501 = vmatmul.mubr.bf16.gmra.mrb[64].mxu0 %v8014_v53  ;;  %v7934_v59 = vmax.f32 %v9715_v33, 0.0  ;;  %v15502_v33 = vld [vmem:[#allocation42_spill] sm:$0xff] }
 0x4ae   :  { %v9721_v34 = vadd.f32 %v6211_v50, %v4763_v55  ;;  %8612 = vmatpush1.bf16.msra.mxu0 %v11795_v58  ;;  %7824 = vmatmul.mubr.bf16.gmra.mrb[72].mxu1 %v14452_v30  ;;  %v7935_v40 = vmax.f32 %v9717_v37, 0.0  ;;  %v11801_v30 = vld [vmem:[%s15351_s3 + $0x180] ss:$8 sps:$4 sm:$0xff]   ;;  %v4779_v52 = vadd.f32 %v15502_v33, %v14706_v20  ;;  %v15503_v55 = vld [vmem:[#allocation43_spill] sm:$0xff] }
 0x4af   :  { %v7938_v13 = vmax.f32 %v9719_v35, 0.0  ;;  %8613 = vmatprep.subr.bf16.mxu0 %v11800_v27  ;;  %7833 = vmatprep.mubr.bf16.mxu1 %v14454_v15  ;;  %v11806_v15 = vld [vmem:[%s15351_s3 + $0x194] ss:$8 sps:$4 sm:$0xff]   ;;  %v15501_v58 = vld [vmem:[#allocation41_spill] sm:$0xff]  ;;  %v4781_v37 = vadd.f32 %v15503_v55, %v14701_v48 }
 0x4b0   :  { %v7939_v36 = vmax.f32 %v9721_v34, 0.0  ;;  %v4777_v7 = vadd.f32 %v15501_v58, %v14701_v48  ;;  %v15504_v50 = vld [vmem:[#allocation44_spill] sm:$0xff]  ;;  %v15509_v33 = vld [vmem:[#allocation49_spill] sm:$0xff] }
 0x4b1   :  { %v8018_v56 = vpack.c.bf16 %v7938_v13, %v7934_v59  ;;  %v4783_v34 = vadd.f32 %v15504_v50, %v14706_v20  ;;  %v11821_v58 = vld [vmem:[%s15351_s3 + $0x1e4] ss:$8 sps:$4 sm:$0xff]  }
 0x4b2   :  { %v8019_v49 = vpack.c.bf16 %v7939_v36, %v7935_v40  ;;  %v6215_v32 = vpop.f32.mrb[20].mxu0  ;;  %8614 = vmatpush1.bf16.msra.mxu0 %v11798_v3  ;;  %v11810_v36 = vld [vmem:[%s15351_s3 + $0x1b0] ss:$8 sps:$4 sm:$0xff]  }
 0x4b3   :  { %v9723_v12 = vadd.f32 %v6215_v32, %v4767_v18  ;;  %v6217_v14 = vpop.f32.mrb[21].mxu0  ;;  %8615 = vmatprep.subr.bf16.mxu0 %v11803_v17 }
 0x4b4   :  { %v9725_v54 = vadd.f32 %v6217_v14, %v4769_v61  ;;  %v6219_v9 = vpop.f32.mrb[22].mxu0  ;;  %8510 = vmatprep.mubr.bf16.mxu0 %v8019_v49  ;;  %v15505_v49 = vld [vmem:[#allocation45_spill] sm:$0xff] }
 0x4b5   :  { %v9727_v60 = vadd.f32 %v6219_v9, %v4771_v51  ;;  %v6221_v5 = vpop.f32.mrb[23].mxu0  ;;  %8511 = vmatmul.mubr.bf16.gmra.mrb[68].mxu0 %v8018_v56  ;;  %v7942_v53 = vmax.f32 %v9723_v12, 0.0  ;;  %v11815_v56 = vld [vmem:[%s15351_s3 + $0x1c4] ss:$8 sps:$4 sm:$0xff]   ;;  %v4787_v32 = vadd.f32 %v15505_v49, %v14701_v48  ;;  %v4789_v51 = vadd.f32 %v15506_v29, %v14706_v20 }
 0x4b6   :  { %v9729_v45 = vadd.f32 %v6221_v5, %v4773_v38  ;;  %8616 = vmatpush1.bf16.msra.mxu0 %v11801_v30  ;;  %7834 = vmatmul.mubr.bf16.gmra.mrb[76].mxu1 %v14481_v25  ;;  %v7943_v43 = vmax.f32 %v9725_v54, 0.0  ;;  %v11807_v25 = vld [vmem:[%s15351_s3 + $0x1a0] ss:$8 sps:$4 sm:$0xff]  }
 0x4b7   :  { %v7946_v4 = vmax.f32 %v9727_v60, 0.0  ;;  %8617 = vmatprep.subr.bf16.mxu0 %v11806_v15  ;;  %7843 = vmatprep.mubr.bf16.mxu1 %v14483_v41  ;;  %v11812_v41 = vld [vmem:[%s15351_s3 + $0x1b4] ss:$8 sps:$4 sm:$0xff]  }
 0x4b8   :  { %v7947_v11 = vmax.f32 %v9729_v45, 0.0  ;;  %v15507_v15 = vld [vmem:[#allocation47_spill] sm:$0xff]  ;;  %v15508_v9 = vld [vmem:[#allocation48_spill] sm:$0xff] }
 0x4b9   :  { %v8022_v16 = vpack.c.bf16 %v7946_v4, %v7942_v53  ;;  %v4791_v6 = vadd.f32 %v15507_v15, %v14701_v48  ;;  %v4793_v60 = vadd.f32 %v15508_v9, %v14706_v20 }
 0x4ba   :  { %v8023_v27 = vpack.c.bf16 %v7947_v11, %v7943_v43  ;;  %v6225_v62 = vpop.f32.mrb[24].mxu0  ;;  %8618 = vmatpush1.bf16.msra.mxu0 %v11804_v10 }
 0x4bb   :  { %v9731_v44 = vadd.f32 %v6225_v62, %v4777_v7  ;;  %v6227_v35 = vpop.f32.mrb[25].mxu0  ;;  %8619 = vmatprep.subr.bf16.mxu0 %v11809_v8  ;;  %v11816_v8 = vld [vmem:[%s15351_s3 + $0x1d0] ss:$8 sps:$4 sm:$0xff]  }
 0x4bc   :  { %v9733_v3 = vadd.f32 %v6227_v35, %v4779_v52  ;;  %v6229_v59 = vpop.f32.mrb[26].mxu0  ;;  %8520 = vmatprep.mubr.bf16.mxu0 %v8023_v27  ;;  %v4797_v52 = vadd.f32 %v15509_v33, %v14701_v48  ;;  %v15510_v62 = vld [vmem:[#allocation50_spill] sm:$0xff] }
 0x4bd   :  { %v9735_v13 = vadd.f32 %v6229_v59, %v4781_v37  ;;  %v6231_v17 = vpop.f32.mrb[27].mxu0  ;;  %8521 = vmatmul.mubr.bf16.gmra.mrb[72].mxu0 %v8022_v16  ;;  %v7950_v21 = vmax.f32 %v9731_v44, 0.0  ;;  %v15511_v44 = vld [vmem:[#allocation51_spill] sm:$0xff] }
 0x4be   :  { %v9737_v40 = vadd.f32 %v6231_v17, %v4783_v34  ;;  %8620 = vmatpush1.bf16.msra.mxu0 %v11807_v25  ;;  %7844 = vmatmul.mubr.bf16.gmra.mrb[80].mxu1 %v14513_v57  ;;  %v7951_v42 = vmax.f32 %v9733_v3, 0.0  ;;  %v11813_v57 = vld [vmem:[%s15351_s3 + $0x1c0] ss:$8 sps:$4 sm:$0xff]   ;;  %v4799_v25 = vadd.f32 %v15510_v62, %v14706_v20  ;;  %v4801_v35 = vadd.f32 %v15511_v44, %v14701_v48 }
 0x4bf   :  { %v7954_v18 = vmax.f32 %v9735_v13, 0.0  ;;  %8621 = vmatprep.subr.bf16.mxu0 %v11812_v41  ;;  %7853 = vmatprep.mubr.bf16.mxu1 %v14515_v31  ;;  %v11818_v31 = vld [vmem:[%s15351_s3 + $0x1d4] ss:$8 sps:$4 sm:$0xff]  }
 0x4c0   :  { %v7955_v61 = vmax.f32 %v9737_v40, 0.0 }
 0x4c1   :  { %v8026_v30 = vpack.c.bf16 %v7954_v18, %v7950_v21 }
 0x4c2   :  { %v8027_v12 = vpack.c.bf16 %v7955_v61, %v7951_v42  ;;  %v6235_v14 = vpop.f32.mrb[28].mxu0  ;;  %8622 = vmatpush1.bf16.msra.mxu0 %v11810_v36  ;;  %v15513_v42 = vld [vmem:[#allocation53_spill] sm:$0xff] }
 0x4c3   :  { %v9739_v38 = vadd.f32 %v6235_v14, %v4787_v32  ;;  %v6237_v54 = vpop.f32.mrb[29].mxu0  ;;  %8623 = vmatprep.subr.bf16.mxu0 %v11815_v56  ;;  %v4807_v61 = vadd.f32 %v15513_v42, %v14701_v48  ;;  %v15514_v32 = vld [vmem:[#allocation54_spill] sm:$0xff]  ;;  %v15524_v42 = vld [vmem:[#allocation64_spill] sm:$0xff] }
 0x4c4   :  { %v9741_v5 = vadd.f32 %v6237_v54, %v4789_v51  ;;  %v6239_v45 = vpop.f32.mrb[30].mxu0  ;;  %8530 = vmatprep.mubr.bf16.mxu0 %v8027_v12  ;;  %v15515_v12 = vld [vmem:[#allocation55_spill] sm:$0xff] }
 0x4c5   :  { %v9743_v10 = vadd.f32 %v6239_v45, %v4791_v6  ;;  %v6241_v53 = vpop.f32.mrb[31].mxu0  ;;  %8531 = vmatmul.mubr.bf16.gmra.mrb[76].mxu0 %v8026_v30  ;;  %v7958_v43 = vmax.f32 %v9739_v38, 0.0  ;;  %v4809_v30 = vadd.f32 %v15514_v32, %v14706_v20  ;;  %v4811_v14 = vadd.f32 %v15515_v12, %v14701_v48 }
 0x4c6   :  { %v9745_v4 = vadd.f32 %v6241_v53, %v4793_v60  ;;  %8624 = vmatpush1.bf16.msra.mxu0 %v11813_v57  ;;  %7854 = vmatmul.mubr.bf16.gmra.mrb[84].mxu1 %v14545_v0  ;;  %v7959_v7 = vmax.f32 %v9741_v5, 0.0  ;;  %v11819_v0 = vld [vmem:[%s15351_s3 + $0x1e0] ss:$8 sps:$4 sm:$0xff]  }
 0x4c7   :  { %v7962_v11 = vmax.f32 %v9743_v10, 0.0  ;;  %8625 = vmatprep.subr.bf16.mxu0 %v11818_v31  ;;  %7863 = vmatprep.mubr.bf16.mxu1 %v14547_v28  ;;  %v15512_v28 = vld [vmem:[#allocation52_spill] sm:$0xff]  ;;  %v15517_v53 = vld [vmem:[#allocation57_spill] sm:$0xff] }
 0x4c8   :  { %v7963_v16 = vmax.f32 %v9745_v4, 0.0  ;;  %v4803_v34 = vadd.f32 %v15512_v28, %v14706_v20  ;;  %v4817_v4 = vadd.f32 %v15517_v53, %v14701_v48 }
 0x4c9   :  { %v8030_v27 = vpack.c.bf16 %v7962_v11, %v7958_v43  ;;  %v15518_v43 = vld [vmem:[#allocation58_spill] sm:$0xff] }
 0x4ca   :  { %v8031_v55 = vpack.c.bf16 %v7963_v16, %v7959_v7  ;;  %v6245_v37 = vpop.f32.mrb[32].mxu0  ;;  %8626 = vmatpush1.bf16.msra.mxu0 %v11816_v8  ;;  %v4819_v11 = vadd.f32 %v15518_v43, %v14706_v20  ;;  %v15519_v16 = vld [vmem:[#allocation59_spill] sm:$0xff] }
 0x4cb   :  { %v9747_v41 = vadd.f32 %v6245_v37, %v4797_v52  ;;  %v6247_v50 = vpop.f32.mrb[33].mxu0  ;;  %8627 = vmatprep.subr.bf16.mxu0 %v11821_v58  ;;  %v4821_v33 = vadd.f32 %v15519_v16, %v14701_v48 }
 0x4cc   :  { %v9749_v3 = vadd.f32 %v6247_v50, %v4799_v25  ;;  %v6249_v59 = vpop.f32.mrb[34].mxu0  ;;  %8540 = vmatprep.mubr.bf16.mxu0 %v8031_v55 }
 0x4cd   :  { %v9751_v13 = vadd.f32 %v6249_v59, %v4801_v35  ;;  %v6251_v17 = vpop.f32.mrb[35].mxu0  ;;  %8541 = vmatmul.mubr.bf16.gmra.mrb[80].mxu0 %v8030_v27  ;;  %v7966_v36 = vmax.f32 %v9747_v41, 0.0  ;;  %v11824_v41 = vld [vmem:[%s15351_s3 + $0x1f4] ss:$8 sps:$4 sm:$0xff]  }
 0x4ce   :  { %v9753_v40 = vadd.f32 %v6251_v17, %v4803_v34  ;;  %8628 = vmatpush1.bf16.msra.mxu0 %v11819_v0  ;;  %7864 = vmatmul.mubr.bf16.gmra.mrb[88].mxu1 %v14577_v63  ;;  %v7967_v18 = vmax.f32 %v9749_v3, 0.0  ;;  %v15516_v63 = vld [vmem:[#allocation56_spill] sm:$0xff]  ;;  %v11822_v34 = vld [vmem:[%s15351_s3 + $0x1f0] ss:$8 sps:$4 sm:$0xff]   ;;  %v15521_v3 = vld [vmem:[#allocation61_spill] sm:$0xff] }
 0x4cf   :  { %v7970_v21 = vmax.f32 %v9751_v13, 0.0  ;;  %7873 = vmatprep.mubr.bf16.mxu1 %v14579_v2  ;;  %v4813_v6 = vadd.f32 %v15516_v63, %v14706_v20  ;;  %v4827_v59 = vadd.f32 %v15521_v3, %v14701_v48  ;;  %8629 = vmatprep.subr.bf16.mxu0 %v11824_v41  ;;  %v15522_v17 = vld [vmem:[#allocation62_spill] sm:$0xff]  ;;  %v15525_v63 = vld [vmem:[#allocation9_spill] sm:$0xff] }
 0x4d0   :  { %v7971_v56 = vmax.f32 %v9753_v40, 0.0 }
 0x4d1   :  { %v8034_v49 = vpack.c.bf16 %v7970_v21, %v7966_v36  ;;  %v15523_v21 = vld [vmem:[#allocation63_spill] sm:$0xff] }
 0x4d2   :  { %v8035_v29 = vpack.c.bf16 %v7971_v56, %v7967_v18  ;;  %v6255_v51 = vpop.f32.mrb[36].mxu0  ;;  %8630 = vmatpush1.bf16.msra.mxu0 %v11822_v34  ;;  %v4831_v18 = vadd.f32 %v15523_v21, %v14701_v48 }
 0x4d3   :  { %v9755_v57 = vadd.f32 %v6255_v51, %v4807_v61  ;;  %v6257_v15 = vpop.f32.mrb[37].mxu0  ;;  %v4833_v61 = vadd.f32 %v15524_v42, %v14706_v20 }
 0x4d4   :  { %v9757_v38 = vadd.f32 %v6257_v15, %v4809_v30  ;;  %v6259_v54 = vpop.f32.mrb[38].mxu0  ;;  %8550 = vmatprep.mubr.bf16.mxu0 %v8035_v29 }
 0x4d5   :  { %v9759_v2 = vadd.f32 %v6259_v54, %v4811_v14  ;;  %v6261_v31 = vpop.f32.mrb[39].mxu0  ;;  %8551 = vmatmul.mubr.bf16.gmra.mrb[84].mxu0 %v8034_v49  ;;  %v7974_v60 = vmax.f32 %v9755_v57, 0.0  ;;  %v15526_v54 = vld [vmem:[#allocation65_spill] sm:$0xff] }
 0x4d6   :  { %v9761_v9 = vadd.f32 %v6261_v31, %v4813_v6  ;;  %7874 = vmatmul.mubr.bf16.gmra.mrb[92].mxu1 %v14609_v1  ;;  %v7975_v45 = vmax.f32 %v9757_v38, 0.0  ;;  %v15520_v1 = vld [vmem:[#allocation60_spill] sm:$0xff]  ;;  %v4837_v6 = vadd.f32 %v15525_v63, %v14701_v48  ;;  %v1472_v48 = vsub.s32 2, %v14690_v24 }
 0x4d7   :  { %v7978_v5 = vmax.f32 %v9759_v2, 0.0  ;;  %7883 = vmatprep.mubr.bf16.mxu1 %v14611_v46  ;;  %v4823_v62 = vadd.f32 %v15520_v1, %v14706_v20  ;;  %v4839_v2 = vadd.f32 %v15526_v54, %v14706_v20 }
 0x4d8   :  { %v7979_v10 = vmax.f32 %v9761_v9, 0.0 }
 0x4d9   :  { %v8038_v8 = vpack.c.bf16 %v7978_v5, %v7974_v60 }
 0x4da   :  { %v8039_v58 = vpack.c.bf16 %v7979_v10, %v7975_v45  ;;  %v6265_v7 = vpop.f32.mrb[40].mxu0 }
 0x4db   :  { %v9763_v52 = vadd.f32 %v6265_v7, %v4817_v4  ;;  %v6267_v27 = vpop.f32.mrb[41].mxu0 }
 0x4dc   :  { %v9765_v25 = vadd.f32 %v6267_v27, %v4819_v11  ;;  %v6269_v55 = vpop.f32.mrb[42].mxu0  ;;  %8560 = vmatprep.mubr.bf16.mxu0 %v8039_v58  ;;  %v1476_v11 = vsub.s32 3, %v14690_v24 }
 0x4dd   :  { %v9767_v46 = vadd.f32 %v6269_v55, %v4821_v33  ;;  %v6271_v37 = vpop.f32.mrb[43].mxu0  ;;  %8561 = vmatmul.mubr.bf16.gmra.mrb[88].mxu0 %v8038_v8  ;;  %v7982_v44 = vmax.f32 %v9763_v52, 0.0 }
 0x4de   :  { %v9769_v0 = vadd.f32 %v6271_v37, %v4823_v62  ;;  %7884 = vmatmul.mubr.bf16.gmra.mrb[96].mxu1 %v14635_v26  ;;  %v7983_v50 = vmax.f32 %v9765_v25, 0.0  ;;  %v4829_v26 = vadd.f32 %v15522_v17, %v14706_v20  ;;  %v14929_v20 = vrot.slane %v14695_v23, %v1472_v48 }
 0x4df   :  { %v7986_v35 = vmax.f32 %v9767_v46, 0.0  ;;  %7893 = vmatprep.mubr.bf16.mxu1 %v14640_v39  ;;  %v14932_v58 = vrot.slane %v14695_v23, %v1476_v11 }
 0x4e0   :  { %v7987_v28 = vmax.f32 %v9769_v0, 0.0 }
 0x4e1   :  { %v8042_v13 = vpack.c.bf16 %v7986_v35, %v7982_v44 }
 0x4e2   :  { %v8043_v40 = vpack.c.bf16 %v7987_v28, %v7983_v50  ;;  %v6275_v36 = vpop.f32.mrb[44].mxu0 }
 0x4e3   :  { %v9771_v56 = vadd.f32 %v6275_v36, %v4827_v59  ;;  %v6277_v39 = vpop.f32.mrb[45].mxu0 }
 0x4e4   :  { %v9773_v49 = vadd.f32 %v6277_v39, %v4829_v26  ;;  %v6279_v32 = vpop.f32.mrb[46].mxu0  ;;  %8570 = vmatprep.mubr.bf16.mxu0 %v8043_v40 }
 0x4e5   :  { %v9775_v30 = vadd.f32 %v6279_v32, %v4831_v18  ;;  %v6281_v29 = vpop.f32.mrb[47].mxu0  ;;  %8571 = vmatmul.mubr.bf16.gmra.mrb[92].mxu0 %v8042_v13  ;;  %v7990_v12 = vmax.f32 %v9771_v56, 0.0 }
 0x4e6   :  { %v9777_v51 = vadd.f32 %v6281_v29, %v4833_v61  ;;  %7894 = vmatmul.mubr.bf16.gmra.mrb[100].mxu1 %v14658_v19  ;;  %v7991_v57 = vmax.f32 %v9773_v49, 0.0 }
 0x4e7   :  { %v7994_v14 = vmax.f32 %v9775_v30, 0.0 }
 0x4e8   :  { %v7995_v15 = vmax.f32 %v9777_v51, 0.0 }
 0x4e9   :  { %v8046_v38 = vpack.c.bf16 %v7994_v14, %v7990_v12 }
 0x4ea   :  { %v8047_v31 = vpack.c.bf16 %v7995_v15, %v7991_v57  ;;  %v6285_v9 = vpop.f32.mrb[48].mxu0 }
 0x4eb   :  { %v9779_v60 = vadd.f32 %v6285_v9, %v4837_v6  ;;  %v6287_v5 = vpop.f32.mrb[49].mxu0 }
 0x4ec   :  { %v9781_v45 = vadd.f32 %v6287_v5, %v4839_v2  ;;  %v6289_v10 = vpop.f32.mrb[50].mxu0  ;;  %8580 = vmatprep.mubr.bf16.mxu0 %v8047_v31 }
 0x4ed   :  { %v6290_v53 = vpop.f32.mrb[51].mxu0  ;;  %8581 = vmatmul.mubr.bf16.gmra.mrb[96].mxu0 %v8046_v38  ;;  %v7998_v19 = vmax.f32 %v9779_v60, 0.0 }
 0x4ee   :  { %v7999_v4 = vmax.f32 %v9781_v45, 0.0 }
 0x4ef   :  { %v8050_v43 = vpack.c.bf16 %v7998_v19, %v7998_v19 }
 0x4f0   :  { %v8051_v8 = vpack.c.bf16 %v7999_v4, %v7999_v4 }
 0x4f2   :  { %8590 = vmatprep.mubr.bf16.mxu0 %v8051_v8 }
 0x4f5   :  { %8591 = vmatmul.mubr.bf16.gmra.mrb[100].mxu0 %v8050_v43 }
 0x559   :  { %v7775_v7 = vpop.f32.mrb[52].mxu1 }
 0x55a   :  { %v9782_v16 = vadd.f32 %v7775_v7, %v14929_v20  ;;  %v7777_v33 = vpop.f32.mrb[53].mxu1 }
 0x55b   :  { %v9783_v52 = vadd.f32 %v7777_v33, %v14932_v58  ;;  %v7779_v27 = vpop.f32.mrb[54].mxu1 }
 0x55c   :  { %v9784_v1 = vadd.f32 %v7779_v27, %v14929_v20  ;;  %v7781_v62 = vpop.f32.mrb[55].mxu1  ;;  %v7904_v55 = vmax.f32 %v9782_v16, 0.0 }
 0x55d   :  { %v9785_v25 = vadd.f32 %v7781_v62, %v14932_v58  ;;  %v7905_v37 = vmax.f32 %v9783_v52, 0.0 }
 0x55e   :  { %v7908_v46 = vmax.f32 %v9784_v1, 0.0 }
 0x55f   :  { %v7909_v0 = vmax.f32 %v9785_v25, 0.0 }
 0x560   :  { %v8004_v44 = vpack.c.bf16 %v7908_v46, %v7904_v55 }
 0x561   :  { %v8005_v35 = vpack.c.bf16 %v7909_v0, %v7905_v37  ;;  %v7785_v23 = vpop.f32.mrb[56].mxu1 }
 0x562   :  { %v9786_v41 = vadd.f32 %v7785_v23, %v14929_v20  ;;  %v7787_v50 = vpop.f32.mrb[57].mxu1 }
 0x563   :  { %v9787_v28 = vadd.f32 %v7787_v50, %v14932_v58  ;;  %v7789_v34 = vpop.f32.mrb[58].mxu1  ;;  %8631 = vmatprep.mubr.bf16.mxu0 %v8005_v35 }
 0x564   :  { %v9788_v3 = vadd.f32 %v7789_v34, %v14929_v20  ;;  %v7791_v59 = vpop.f32.mrb[59].mxu1  ;;  %8632 = vmatmul.mubr.bf16.vlgmr.msra.gmra.mrb[52].mxu0 %v8004_v44  ;;  %v7912_v17 = vmax.f32 %v9786_v41, 0.0 }
 0x565   :  { %v9789_v13 = vadd.f32 %v7791_v59, %v14932_v58  ;;  %v7913_v40 = vmax.f32 %v9787_v28, 0.0 }
 0x566   :  { %v7916_v26 = vmax.f32 %v9788_v3, 0.0 }
 0x567   :  { %v7917_v36 = vmax.f32 %v9789_v13, 0.0 }
 0x568   :  { %v8008_v21 = vpack.c.bf16 %v7916_v26, %v7912_v17 }
 0x569   :  { %v8009_v18 = vpack.c.bf16 %v7917_v36, %v7913_v40  ;;  %v7795_v56 = vpop.f32.mrb[60].mxu1 }
 0x56a   :  { %v9790_v39 = vadd.f32 %v7795_v56, %v14929_v20  ;;  %v7797_v42 = vpop.f32.mrb[61].mxu1 }
 0x56b   :  { %v9791_v61 = vadd.f32 %v7797_v42, %v14932_v58  ;;  %v7799_v49 = vpop.f32.mrb[62].mxu1  ;;  %8641 = vmatprep.mubr.bf16.mxu0 %v8009_v18 }
 0x56c   :  { %v9792_v32 = vadd.f32 %v7799_v49, %v14929_v20  ;;  %v7801_v30 = vpop.f32.mrb[63].mxu1  ;;  %8642 = vmatmul.mubr.bf16.gmra.mrb[56].mxu0 %v8008_v21  ;;  %v7920_v51 = vmax.f32 %v9790_v39, 0.0 }
 0x56d   :  { %v9793_v29 = vadd.f32 %v7801_v30, %v14932_v58  ;;  %v7921_v14 = vmax.f32 %v9791_v61, 0.0 }
 0x56e   :  { %v7924_v12 = vmax.f32 %v9792_v32, 0.0 }
 0x56f   :  { %v7925_v57 = vmax.f32 %v9793_v29, 0.0 }
 0x570   :  { %v8012_v15 = vpack.c.bf16 %v7924_v12, %v7920_v51 }
 0x571   :  { %v8013_v63 = vpack.c.bf16 %v7925_v57, %v7921_v14  ;;  %v7805_v6 = vpop.f32.mrb[64].mxu1 }
 0x572   :  { %v9794_v38 = vadd.f32 %v7805_v6, %v14929_v20  ;;  %v7807_v54 = vpop.f32.mrb[65].mxu1 }
 0x573   :  { %v9795_v2 = vadd.f32 %v7807_v54, %v14932_v58  ;;  %v7809_v31 = vpop.f32.mrb[66].mxu1  ;;  %8651 = vmatprep.mubr.bf16.mxu0 %v8013_v63 }
 0x574   :  { %v9796_v9 = vadd.f32 %v7809_v31, %v14929_v20  ;;  %v7811_v60 = vpop.f32.mrb[67].mxu1  ;;  %8652 = vmatmul.mubr.bf16.gmra.mrb[60].mxu0 %v8012_v15  ;;  %v7928_v45 = vmax.f32 %v9794_v38, 0.0 }
 0x575   :  { %v9797_v5 = vadd.f32 %v7811_v60, %v14932_v58  ;;  %v7929_v53 = vmax.f32 %v9795_v2, 0.0 }
 0x576   :  { %v7932_v10 = vmax.f32 %v9796_v9, 0.0 }
 0x577   :  { %v7933_v4 = vmax.f32 %v9797_v5, 0.0 }
 0x578   :  { %v8016_v19 = vpack.c.bf16 %v7932_v10, %v7928_v45 }
 0x579   :  { %v8017_v8 = vpack.c.bf16 %v7933_v4, %v7929_v53  ;;  %v7815_v43 = vpop.f32.mrb[68].mxu1 }
 0x57a   :  { %v9798_v48 = vadd.f32 %v7815_v43, %v14929_v20  ;;  %v7817_v11 = vpop.f32.mrb[69].mxu1 }
 0x57b   :  { %v9799_v7 = vadd.f32 %v7817_v11, %v14932_v58  ;;  %v7819_v16 = vpop.f32.mrb[70].mxu1  ;;  %8661 = vmatprep.mubr.bf16.mxu0 %v8017_v8 }
 0x57c   :  { %v9800_v33 = vadd.f32 %v7819_v16, %v14929_v20  ;;  %v7821_v52 = vpop.f32.mrb[71].mxu1  ;;  %8662 = vmatmul.mubr.bf16.gmra.mrb[64].mxu0 %v8016_v19  ;;  %v7936_v1 = vmax.f32 %v9798_v48, 0.0 }
 0x57d   :  { %v9801_v27 = vadd.f32 %v7821_v52, %v14932_v58  ;;  %v7937_v25 = vmax.f32 %v9799_v7, 0.0 }
 0x57e   :  { %v7940_v62 = vmax.f32 %v9800_v33, 0.0 }
 0x57f   :  { %v7941_v55 = vmax.f32 %v9801_v27, 0.0 }
 0x580   :  { %v8020_v46 = vpack.c.bf16 %v7940_v62, %v7936_v1 }
 0x581   :  { %v8021_v37 = vpack.c.bf16 %v7941_v55, %v7937_v25  ;;  %v7825_v0 = vpop.f32.mrb[72].mxu1 }
 0x582   :  { %v9802_v44 = vadd.f32 %v7825_v0, %v14929_v20  ;;  %v7827_v35 = vpop.f32.mrb[73].mxu1 }
 0x583   :  { %v9803_v23 = vadd.f32 %v7827_v35, %v14932_v58  ;;  %v7829_v41 = vpop.f32.mrb[74].mxu1  ;;  %8671 = vmatprep.mubr.bf16.mxu0 %v8021_v37 }
 0x584   :  { %v9804_v50 = vadd.f32 %v7829_v41, %v14929_v20  ;;  %v7831_v28 = vpop.f32.mrb[75].mxu1  ;;  %8672 = vmatmul.mubr.bf16.gmra.mrb[68].mxu0 %v8020_v46  ;;  %v7944_v3 = vmax.f32 %v9802_v44, 0.0 }
 0x585   :  { %v9805_v34 = vadd.f32 %v7831_v28, %v14932_v58  ;;  %v7945_v13 = vmax.f32 %v9803_v23, 0.0 }
 0x586   :  { %v7948_v59 = vmax.f32 %v9804_v50, 0.0 }
 0x587   :  { %v7949_v17 = vmax.f32 %v9805_v34, 0.0 }
 0x588   :  { %v8024_v26 = vpack.c.bf16 %v7948_v59, %v7944_v3 }
 0x589   :  { %v8025_v40 = vpack.c.bf16 %v7949_v17, %v7945_v13  ;;  %v7835_v36 = vpop.f32.mrb[76].mxu1 }
 0x58a   :  { %v9806_v21 = vadd.f32 %v7835_v36, %v14929_v20  ;;  %v7837_v18 = vpop.f32.mrb[77].mxu1 }
 0x58b   :  { %v9807_v56 = vadd.f32 %v7837_v18, %v14932_v58  ;;  %v7839_v39 = vpop.f32.mrb[78].mxu1  ;;  %8681 = vmatprep.mubr.bf16.mxu0 %v8025_v40 }
 0x58c   :  { %v9808_v42 = vadd.f32 %v7839_v39, %v14929_v20  ;;  %v7841_v61 = vpop.f32.mrb[79].mxu1  ;;  %8682 = vmatmul.mubr.bf16.gmra.mrb[72].mxu0 %v8024_v26  ;;  %v7952_v32 = vmax.f32 %v9806_v21, 0.0 }
 0x58d   :  { %v9809_v49 = vadd.f32 %v7841_v61, %v14932_v58  ;;  %v7953_v29 = vmax.f32 %v9807_v56, 0.0 }
 0x58e   :  { %v7956_v30 = vmax.f32 %v9808_v42, 0.0 }
 0x58f   :  { %v7957_v51 = vmax.f32 %v9809_v49, 0.0 }
 0x590   :  { %v8028_v12 = vpack.c.bf16 %v7956_v30, %v7952_v32 }
 0x591   :  { %v8029_v14 = vpack.c.bf16 %v7957_v51, %v7953_v29  ;;  %v7845_v57 = vpop.f32.mrb[80].mxu1 }
 0x592   :  { %v9810_v15 = vadd.f32 %v7845_v57, %v14929_v20  ;;  %v7847_v63 = vpop.f32.mrb[81].mxu1 }
 0x593   :  { %v9811_v6 = vadd.f32 %v7847_v63, %v14932_v58  ;;  %v7849_v38 = vpop.f32.mrb[82].mxu1  ;;  %8691 = vmatprep.mubr.bf16.mxu0 %v8029_v14 }
 0x594   :  { %v9812_v54 = vadd.f32 %v7849_v38, %v14929_v20  ;;  %v7851_v2 = vpop.f32.mrb[83].mxu1  ;;  %8692 = vmatmul.mubr.bf16.gmra.mrb[76].mxu0 %v8028_v12  ;;  %v7960_v9 = vmax.f32 %v9810_v15, 0.0 }
 0x595   :  { %v9813_v31 = vadd.f32 %v7851_v2, %v14932_v58  ;;  %v7961_v5 = vmax.f32 %v9811_v6, 0.0 }
 0x596   :  { %v7964_v60 = vmax.f32 %v9812_v54, 0.0 }
 0x597   :  { %v7965_v45 = vmax.f32 %v9813_v31, 0.0 }
 0x598   :  { %v8032_v10 = vpack.c.bf16 %v7964_v60, %v7960_v9 }
 0x599   :  { %v8033_v53 = vpack.c.bf16 %v7965_v45, %v7961_v5  ;;  %v7855_v4 = vpop.f32.mrb[84].mxu1 }
 0x59a   :  { %v9814_v19 = vadd.f32 %v7855_v4, %v14929_v20  ;;  %v7857_v8 = vpop.f32.mrb[85].mxu1 }
 0x59b   :  { %v9815_v43 = vadd.f32 %v7857_v8, %v14932_v58  ;;  %v7859_v48 = vpop.f32.mrb[86].mxu1  ;;  %8701 = vmatprep.mubr.bf16.mxu0 %v8033_v53 }
 0x59c   :  { %v9816_v11 = vadd.f32 %v7859_v48, %v14929_v20  ;;  %v7861_v7 = vpop.f32.mrb[87].mxu1  ;;  %8702 = vmatmul.mubr.bf16.gmra.mrb[80].mxu0 %v8032_v10  ;;  %v7968_v33 = vmax.f32 %v9814_v19, 0.0 }
 0x59d   :  { %v9817_v16 = vadd.f32 %v7861_v7, %v14932_v58  ;;  %v7969_v27 = vmax.f32 %v9815_v43, 0.0 }
 0x59e   :  { %v7972_v52 = vmax.f32 %v9816_v11, 0.0 }
 0x59f   :  { %v7973_v1 = vmax.f32 %v9817_v16, 0.0 }
 0x5a0   :  { %v8036_v62 = vpack.c.bf16 %v7972_v52, %v7968_v33 }
 0x5a1   :  { %v8037_v25 = vpack.c.bf16 %v7973_v1, %v7969_v27  ;;  %v7865_v55 = vpop.f32.mrb[88].mxu1 }
 0x5a2   :  { %v9818_v46 = vadd.f32 %v7865_v55, %v14929_v20  ;;  %v7867_v37 = vpop.f32.mrb[89].mxu1 }
 0x5a3   :  { %v9819_v0 = vadd.f32 %v7867_v37, %v14932_v58  ;;  %v7869_v44 = vpop.f32.mrb[90].mxu1  ;;  %8711 = vmatprep.mubr.bf16.mxu0 %v8037_v25 }
 0x5a4   :  { %v9820_v35 = vadd.f32 %v7869_v44, %v14929_v20  ;;  %v7871_v23 = vpop.f32.mrb[91].mxu1  ;;  %8712 = vmatmul.mubr.bf16.gmra.mrb[84].mxu0 %v8036_v62  ;;  %v7976_v50 = vmax.f32 %v9818_v46, 0.0  ;;  %v8761_v62 = vld [vmem:[%s15353_s5 + $0x8] sm:$0xff]  ;;  %v8762_v46 = vld [vmem:[%s15353_s5 + $0x10] sm:$0xff] }
 0x5a5   :  { %v9821_v41 = vadd.f32 %v7871_v23, %v14932_v58  ;;  %v7977_v34 = vmax.f32 %v9819_v0, 0.0 }
 0x5a6   :  { %v7980_v28 = vmax.f32 %v9820_v35, 0.0 }
 0x5a7   :  { %v7981_v3 = vmax.f32 %v9821_v41, 0.0 }
 0x5a8   :  { %v8040_v59 = vpack.c.bf16 %v7980_v28, %v7976_v50 }
 0x5a9   :  { %v8041_v13 = vpack.c.bf16 %v7981_v3, %v7977_v34  ;;  %v7875_v17 = vpop.f32.mrb[92].mxu1 }
 0x5aa   :  { %v9822_v26 = vadd.f32 %v7875_v17, %v14929_v20  ;;  %v7877_v40 = vpop.f32.mrb[93].mxu1 }
 0x5ab   :  { %v9823_v36 = vadd.f32 %v7877_v40, %v14932_v58  ;;  %v7879_v21 = vpop.f32.mrb[94].mxu1  ;;  %8721 = vmatprep.mubr.bf16.mxu0 %v8041_v13 }
 0x5ac   :  { %v9824_v18 = vadd.f32 %v7879_v21, %v14929_v20  ;;  %v7881_v56 = vpop.f32.mrb[95].mxu1  ;;  %8722 = vmatmul.mubr.bf16.gmra.mrb[88].mxu0 %v8040_v59  ;;  %v7984_v42 = vmax.f32 %v9822_v26, 0.0 }
 0x5ad   :  { %v9825_v39 = vadd.f32 %v7881_v56, %v14932_v58  ;;  %v7985_v49 = vmax.f32 %v9823_v36, 0.0 }
 0x5ae   :  { %v7988_v61 = vmax.f32 %v9824_v18, 0.0 }
 0x5af   :  { %v7989_v32 = vmax.f32 %v9825_v39, 0.0 }
 0x5b0   :  { %v8044_v30 = vpack.c.bf16 %v7988_v61, %v7984_v42 }
 0x5b1   :  { %v8045_v29 = vpack.c.bf16 %v7989_v32, %v7985_v49  ;;  %v7885_v51 = vpop.f32.mrb[96].mxu1 }
 0x5b2   :  { %v9826_v12 = vadd.f32 %v7885_v51, %v14929_v20  ;;  %v7887_v14 = vpop.f32.mrb[97].mxu1 }
 0x5b3   :  { %v9827_v57 = vadd.f32 %v7887_v14, %v14932_v58  ;;  %v7889_v15 = vpop.f32.mrb[98].mxu1  ;;  %8731 = vmatprep.mubr.bf16.mxu0 %v8045_v29 }
 0x5b4   :  { %v9828_v63 = vadd.f32 %v7889_v15, %v14929_v20  ;;  %v7891_v6 = vpop.f32.mrb[99].mxu1  ;;  %8732 = vmatmul.mubr.bf16.gmra.mrb[92].mxu0 %v8044_v30  ;;  %v7992_v54 = vmax.f32 %v9826_v12, 0.0 }
 0x5b5   :  { %v9829_v38 = vadd.f32 %v7891_v6, %v14932_v58  ;;  %v7993_v31 = vmax.f32 %v9827_v57, 0.0 }
 0x5b6   :  { %v7996_v2 = vmax.f32 %v9828_v63, 0.0 }
 0x5b7   :  { %v7997_v9 = vmax.f32 %v9829_v38, 0.0 }
 0x5b8   :  { %v8048_v60 = vpack.c.bf16 %v7996_v2, %v7992_v54 }
 0x5b9   :  { %v8049_v5 = vpack.c.bf16 %v7997_v9, %v7993_v31  ;;  %v7895_v45 = vpop.f32.mrb[100].mxu1 }
 0x5ba   :  { %v9830_v10 = vadd.f32 %v7895_v45, %v14929_v20  ;;  %v7897_v53 = vpop.f32.mrb[101].mxu1  ;;  %v8860_v20 = vld [vmem:[#allocation6] sm:$0x3] }
 0x5bb   :  { %v9831_v4 = vadd.f32 %v7897_v53, %v14932_v58  ;;  %v7899_v19 = vpop.f32.mrb[102].mxu1  ;;  %8741 = vmatprep.mubr.bf16.mxu0 %v8049_v5  ;;  %v8760_v58 = vld [vmem:[%s15353_s5] sm:$0xff]  ;;  %v14993_v1 = vrot.slane %v8860_v20, %v1464_v47  ;;  %v15000_v55 = vrot.slane %v8860_v20, %v1468_v22  ;;  %v8763_v47 = vld [vmem:[%s15353_s5 + $0x18] sm:$0xff] }
 0x5bc   :  { %v7900_v8 = vpop.f32.mrb[103].mxu1  ;;  %8742 = vmatmul.mubr.bf16.gmra.mrb[96].mxu0 %v8048_v60  ;;  %v8000_v48 = vmax.f32 %v9830_v10, 0.0 }
 0x5bd   :  { %v8001_v43 = vmax.f32 %v9831_v4, 0.0 }
 0x5be   :  { %v8052_v7 = vpack.c.bf16 %v8000_v48, %v8000_v48 }
 0x5bf   :  { %v8053_v11 = vpack.c.bf16 %v8001_v43, %v8001_v43 }
 0x5c1   :  { %8751 = vmatprep.mubr.bf16.mxu0 %v8053_v11 }
 0x5c4   :  { %8752 = vmatmul.mubr.bf16.gmra.mrb[104].mxu0 %v8052_v7 }
 0x5c8   :  { %v14984_v16 = vpop.f32.mrb[100].mxu0 }
 0x5c9   :  { %v14986_v33 = vpop.f32.mrb[101].mxu0 }
 0x5ca   :  { %v8596_v52 = vpop.f32.mrb[102].mxu0 }
 0x5cb   :  { %v8597_v27 = vpop.f32.mrb[103].mxu0 }
 0x637   :  { %v8633_v25 = vpop.f32.mrb[52].mxu0 }
 0x638   :  { %v8810_v37 = vadd.f32 %v8760_v58, %v8633_v25  ;;  %v8635_v0 = vpop.f32.mrb[53].mxu0 }
 0x639   :  { %v8811_v44 = vadd.f32 %v8761_v62, %v8635_v0  ;;  %v8637_v35 = vpop.f32.mrb[54].mxu0 }
 0x63a   :  { %v8872_v23 = vadd.f32 %v14993_v1, %v8810_v37  ;;  %v8812_v41 = vadd.f32 %v8762_v46, %v8637_v35  ;;  %v8639_v50 = vpop.f32.mrb[55].mxu0 }
 0x63b   :  { %v8873_v24 = vadd.f32 %v15000_v55, %v8811_v44  ;;  %v8813_v22 = vadd.f32 %v8763_v47, %v8639_v50 }
 0x63c   :  { %8922 = vst [vmem:[%s15354_s6] sm:$0xff] %v8872_v23  ;;  %v8874_v28 = vadd.f32 %v14993_v1, %v8812_v41 }
 0x63d   :  { %8923 = vst [vmem:[%s15354_s6 + $0x8] sm:$0xff] %v8873_v24  ;;  %v8875_v34 = vadd.f32 %v15000_v55, %v8813_v22 }
 0x63f   :  { %v8643_v13 = vpop.f32.mrb[56].mxu0 }
 0x640   :  { %v8645_v40 = vpop.f32.mrb[57].mxu0 }
 0x641   :  { %v8647_v18 = vpop.f32.mrb[58].mxu0 }
 0x642   :  { %v8649_v42 = vpop.f32.mrb[59].mxu0 }
 0x644   :  { %v8764_v3 = vld [vmem:[%s15353_s5 + $0x20] sm:$0xff] }
 0x645   :  { %8924 = vst [vmem:[%s15354_s6 + $0x10] sm:$0xff] %v8874_v28  ;;  %v8814_v26 = vadd.f32 %v8764_v3, %v8643_v13 }
 0x647   :  { %v8876_v56 = vadd.f32 %v14993_v1, %v8814_v26  ;;  %v8653_v12 = vpop.f32.mrb[60].mxu0 }
 0x648   :  { %v8655_v15 = vpop.f32.mrb[61].mxu0 }
 0x649   :  { %v8657_v38 = vpop.f32.mrb[62].mxu0 }
 0x64a   :  { %v8659_v31 = vpop.f32.mrb[63].mxu0 }
 0x64c   :  { %v8765_v59 = vld [vmem:[%s15353_s5 + $0x28] sm:$0xff] }
 0x64d   :  { %8925 = vst [vmem:[%s15354_s6 + $0x18] sm:$0xff] %v8875_v34  ;;  %v8815_v21 = vadd.f32 %v8765_v59, %v8645_v40 }
 0x64f   :  { %v8877_v61 = vadd.f32 %v15000_v55, %v8815_v21  ;;  %v8663_v4 = vpop.f32.mrb[64].mxu0 }
 0x650   :  { %v8665_v43 = vpop.f32.mrb[65].mxu0 }
 0x651   :  { %v8667_v7 = vpop.f32.mrb[66].mxu0 }
 0x652   :  { %v8669_v20 = vpop.f32.mrb[67].mxu0 }
 0x654   :  { %v8766_v17 = vld [vmem:[%s15353_s5 + $0x30] sm:$0xff]  ;;  %v8767_v36 = vld [vmem:[%s15353_s5 + $0x38] sm:$0xff] }
 0x655   :  { %v8816_v39 = vadd.f32 %v8766_v17, %v8647_v18  ;;  %v8817_v49 = vadd.f32 %v8767_v36, %v8649_v42  ;;  %8926 = vst [vmem:[%s15354_s6 + $0x20] sm:$0xff] %v8876_v56  ;;  %8927 = vst [vmem:[%s15354_s6 + $0x28] sm:$0xff] %v8877_v61 }
 0x657   :  { %v8878_v32 = vadd.f32 %v14993_v1, %v8816_v39  ;;  %v8879_v30 = vadd.f32 %v15000_v55, %v8817_v49  ;;  %v8673_v47 = vpop.f32.mrb[68].mxu0 }
 0x658   :  { %v8675_v23 = vpop.f32.mrb[69].mxu0 }
 0x659   :  { %v8677_v24 = vpop.f32.mrb[70].mxu0 }
 0x65a   :  { %v8679_v34 = vpop.f32.mrb[71].mxu0 }
 0x65c   :  { %v8768_v29 = vld [vmem:[%s15353_s5 + $0x40] sm:$0xff] }
 0x65d   :  { %8928 = vst [vmem:[%s15354_s6 + $0x30] sm:$0xff] %v8878_v32  ;;  %v8818_v57 = vadd.f32 %v8768_v29, %v8653_v12 }
 0x65f   :  { %v8880_v54 = vadd.f32 %v14993_v1, %v8818_v57  ;;  %v8683_v36 = vpop.f32.mrb[72].mxu0 }
 0x660   :  { %v8685_v56 = vpop.f32.mrb[73].mxu0 }
 0x661   :  { %v8687_v61 = vpop.f32.mrb[74].mxu0 }
 0x664   :  { %v8769_v51 = vld [vmem:[%s15353_s5 + $0x48] sm:$0xff] }
 0x665   :  { %8929 = vst [vmem:[%s15354_s6 + $0x38] sm:$0xff] %v8879_v30  ;;  %v8819_v6 = vadd.f32 %v8769_v51, %v8655_v15  ;;  %v8689_v30 = vpop.f32.mrb[75].mxu0 }
 0x667   :  { %v8881_v9 = vadd.f32 %v15000_v55, %v8819_v6 }
 0x66c   :  { %v8770_v14 = vld [vmem:[%s15353_s5 + $0x50] sm:$0xff]  ;;  %v8771_v63 = vld [vmem:[%s15353_s5 + $0x58] sm:$0xff] }
 0x66d   :  { %v8820_v2 = vadd.f32 %v8770_v14, %v8657_v38  ;;  %v8821_v60 = vadd.f32 %v8771_v63, %v8659_v31  ;;  %8930 = vst [vmem:[%s15354_s6 + $0x40] sm:$0xff] %v8880_v54  ;;  %8931 = vst [vmem:[%s15354_s6 + $0x48] sm:$0xff] %v8881_v9  ;;  %v8693_v63 = vpop.f32.mrb[76].mxu0 }
 0x66e   :  { %v8695_v54 = vpop.f32.mrb[77].mxu0 }
 0x66f   :  { %v8882_v5 = vadd.f32 %v14993_v1, %v8820_v2  ;;  %v8883_v45 = vadd.f32 %v15000_v55, %v8821_v60  ;;  %v8697_v9 = vpop.f32.mrb[78].mxu0 }
 0x674   :  { %v8772_v10 = vld [vmem:[%s15353_s5 + $0x60] sm:$0xff] }
 0x675   :  { %8932 = vst [vmem:[%s15354_s6 + $0x50] sm:$0xff] %v8882_v5  ;;  %v8822_v8 = vadd.f32 %v8772_v10, %v8663_v4 }
 0x677   :  { %v8884_v52 = vadd.f32 %v14993_v1, %v8822_v8 }
 0x67c   :  { %v8773_v53 = vld [vmem:[%s15353_s5 + $0x68] sm:$0xff] }
 0x67d   :  { %8933 = vst [vmem:[%s15354_s6 + $0x58] sm:$0xff] %v8883_v45  ;;  %v8823_v11 = vadd.f32 %v8773_v53, %v8665_v43  ;;  %v8699_v45 = vpop.f32.mrb[79].mxu0 }
 0x67f   :  { %v8885_v58 = vadd.f32 %v15000_v55, %v8823_v11 }
 0x684   :  { %v8774_v19 = vld [vmem:[%s15353_s5 + $0x70] sm:$0xff]  ;;  %v8775_v48 = vld [vmem:[%s15353_s5 + $0x78] sm:$0xff] }
 0x685   :  { %v8824_v27 = vadd.f32 %v8774_v19, %v8667_v7  ;;  %v8825_v62 = vadd.f32 %v8775_v48, %v8669_v20  ;;  %8934 = vst [vmem:[%s15354_s6 + $0x60] sm:$0xff] %v8884_v52  ;;  %8935 = vst [vmem:[%s15354_s6 + $0x68] sm:$0xff] %v8885_v58  ;;  %v8703_v48 = vpop.f32.mrb[80].mxu0 }
 0x686   :  { %v8705_v52 = vpop.f32.mrb[81].mxu0 }
 0x687   :  { %v8886_v25 = vadd.f32 %v14993_v1, %v8824_v27  ;;  %v8887_v46 = vadd.f32 %v15000_v55, %v8825_v62  ;;  %v8707_v58 = vpop.f32.mrb[82].mxu0 }
 0x68c   :  { %v8776_v37 = vld [vmem:[%s15353_s5 + $0x80] sm:$0xff] }
 0x68d   :  { %8936 = vst [vmem:[%s15354_s6 + $0x70] sm:$0xff] %v8886_v25  ;;  %v8826_v35 = vadd.f32 %v8776_v37, %v8673_v47 }
 0x68f   :  { %v8888_v22 = vadd.f32 %v14993_v1, %v8826_v35 }
 0x694   :  { %v8777_v0 = vld [vmem:[%s15353_s5 + $0x88] sm:$0xff] }
 0x695   :  { %8937 = vst [vmem:[%s15354_s6 + $0x78] sm:$0xff] %v8887_v46  ;;  %v8827_v50 = vadd.f32 %v8777_v0, %v8675_v23  ;;  %v8709_v46 = vpop.f32.mrb[83].mxu0 }
 0x697   :  { %v8889_v3 = vadd.f32 %v15000_v55, %v8827_v50 }
 0x69c   :  { %v8778_v44 = vld [vmem:[%s15353_s5 + $0x90] sm:$0xff]  ;;  %v8779_v41 = vld [vmem:[%s15353_s5 + $0x98] sm:$0xff] }
 0x69d   :  { %v8828_v28 = vadd.f32 %v8778_v44, %v8677_v24  ;;  %v8829_v59 = vadd.f32 %v8779_v41, %v8679_v34  ;;  %8938 = vst [vmem:[%s15354_s6 + $0x80] sm:$0xff] %v8888_v22  ;;  %8939 = vst [vmem:[%s15354_s6 + $0x88] sm:$0xff] %v8889_v3  ;;  %v8713_v41 = vpop.f32.mrb[84].mxu0 }
 0x69e   :  { %v8715_v22 = vpop.f32.mrb[85].mxu0 }
 0x69f   :  { %v8890_v13 = vadd.f32 %v14993_v1, %v8828_v28  ;;  %v8891_v17 = vadd.f32 %v15000_v55, %v8829_v59  ;;  %v8717_v3 = vpop.f32.mrb[86].mxu0 }
 0x6a4   :  { %v8780_v26 = vld [vmem:[%s15353_s5 + $0xa0] sm:$0xff] }
 0x6a5   :  { %8940 = vst [vmem:[%s15354_s6 + $0x90] sm:$0xff] %v8890_v13  ;;  %v8830_v18 = vadd.f32 %v8780_v26, %v8683_v36 }
 0x6a7   :  { %v8892_v49 = vadd.f32 %v14993_v1, %v8830_v18 }
 0x6ac   :  { %v8781_v40 = vld [vmem:[%s15353_s5 + $0xa8] sm:$0xff] }
 0x6ad   :  { %8941 = vst [vmem:[%s15354_s6 + $0x98] sm:$0xff] %v8891_v17  ;;  %v8831_v42 = vadd.f32 %v8781_v40, %v8685_v56  ;;  %v8719_v17 = vpop.f32.mrb[87].mxu0 }
 0x6af   :  { %v8893_v29 = vadd.f32 %v15000_v55, %v8831_v42 }
 0x6b4   :  { %v8782_v21 = vld [vmem:[%s15353_s5 + $0xb0] sm:$0xff]  ;;  %v8783_v39 = vld [vmem:[%s15353_s5 + $0xb8] sm:$0xff] }
 0x6b5   :  { %v8832_v32 = vadd.f32 %v8782_v21, %v8687_v61  ;;  %v8833_v51 = vadd.f32 %v8783_v39, %v8689_v30  ;;  %8942 = vst [vmem:[%s15354_s6 + $0xa0] sm:$0xff] %v8892_v49  ;;  %8943 = vst [vmem:[%s15354_s6 + $0xa8] sm:$0xff] %v8893_v29  ;;  %v8723_v39 = vpop.f32.mrb[88].mxu0 }
 0x6b6   :  { %v8725_v49 = vpop.f32.mrb[89].mxu0 }
 0x6b7   :  { %v8894_v12 = vadd.f32 %v14993_v1, %v8832_v32  ;;  %v8895_v14 = vadd.f32 %v15000_v55, %v8833_v51  ;;  %v8727_v29 = vpop.f32.mrb[90].mxu0 }
 0x6bc   :  { %v8784_v57 = vld [vmem:[%s15353_s5 + $0xc0] sm:$0xff] }
 0x6bd   :  { %8944 = vst [vmem:[%s15354_s6 + $0xb0] sm:$0xff] %v8894_v12  ;;  %v8834_v38 = vadd.f32 %v8784_v57, %v8693_v63 }
 0x6bf   :  { %v8896_v60 = vadd.f32 %v14993_v1, %v8834_v38 }
 0x6c4   :  { %v8785_v15 = vld [vmem:[%s15353_s5 + $0xc8] sm:$0xff] }
 0x6c5   :  { %8945 = vst [vmem:[%s15354_s6 + $0xb8] sm:$0xff] %v8895_v14  ;;  %v8835_v31 = vadd.f32 %v8785_v15, %v8695_v54  ;;  %v8729_v14 = vpop.f32.mrb[91].mxu0 }
 0x6c7   :  { %v8897_v10 = vadd.f32 %v15000_v55, %v8835_v31 }
 0x6cc   :  { %v8786_v6 = vld [vmem:[%s15353_s5 + $0xd0] sm:$0xff]  ;;  %v8787_v2 = vld [vmem:[%s15353_s5 + $0xd8] sm:$0xff] }
 0x6cd   :  { %v8836_v5 = vadd.f32 %v8786_v6, %v8697_v9  ;;  %v8837_v53 = vadd.f32 %v8787_v2, %v8699_v45  ;;  %8946 = vst [vmem:[%s15354_s6 + $0xc0] sm:$0xff] %v8896_v60  ;;  %8947 = vst [vmem:[%s15354_s6 + $0xc8] sm:$0xff] %v8897_v10  ;;  %v8733_v2 = vpop.f32.mrb[92].mxu0 }
 0x6ce   :  { %v8735_v60 = vpop.f32.mrb[93].mxu0 }
 0x6cf   :  { %v8898_v4 = vadd.f32 %v14993_v1, %v8836_v5  ;;  %v8899_v19 = vadd.f32 %v15000_v55, %v8837_v53  ;;  %v8737_v10 = vpop.f32.mrb[94].mxu0 }
 0x6d4   :  { %v8788_v8 = vld [vmem:[%s15353_s5 + $0xe0] sm:$0xff] }
 0x6d5   :  { %8948 = vst [vmem:[%s15354_s6 + $0xd0] sm:$0xff] %v8898_v4  ;;  %v8838_v7 = vadd.f32 %v8788_v8, %v8703_v48 }
 0x6d7   :  { %v8900_v62 = vadd.f32 %v14993_v1, %v8838_v7 }
 0x6dc   :  { %v8789_v43 = vld [vmem:[%s15353_s5 + $0xe8] sm:$0xff] }
 0x6dd   :  { %8949 = vst [vmem:[%s15354_s6 + $0xd8] sm:$0xff] %v8899_v19  ;;  %v8839_v20 = vadd.f32 %v8789_v43, %v8705_v52  ;;  %v8739_v19 = vpop.f32.mrb[95].mxu0 }
 0x6df   :  { %v8901_v37 = vadd.f32 %v15000_v55, %v8839_v20 }
 0x6e4   :  { %v8790_v11 = vld [vmem:[%s15353_s5 + $0xf0] sm:$0xff]  ;;  %v8791_v27 = vld [vmem:[%s15353_s5 + $0xf8] sm:$0xff] }
 0x6e5   :  { %v8840_v25 = vadd.f32 %v8790_v11, %v8707_v58  ;;  %v8841_v0 = vadd.f32 %v8791_v27, %v8709_v46  ;;  %8950 = vst [vmem:[%s15354_s6 + $0xe0] sm:$0xff] %v8900_v62  ;;  %8951 = vst [vmem:[%s15354_s6 + $0xe8] sm:$0xff] %v8901_v37  ;;  %v8743_v27 = vpop.f32.mrb[96].mxu0 }
 0x6e6   :  { %v8745_v62 = vpop.f32.mrb[97].mxu0 }
 0x6e7   :  { %v8902_v47 = vadd.f32 %v14993_v1, %v8840_v25  ;;  %v8903_v44 = vadd.f32 %v15000_v55, %v8841_v0  ;;  %v8747_v37 = vpop.f32.mrb[98].mxu0 }
 0x6ec   :  { %v8792_v35 = vld [vmem:[%s15353_s5 + $0x100] sm:$0xff] }
 0x6ed   :  { %8952 = vst [vmem:[%s15354_s6 + $0xf0] sm:$0xff] %v8902_v47  ;;  %v8842_v24 = vadd.f32 %v8792_v35, %v8713_v41 }
 0x6ef   :  { %v8904_v59 = vadd.f32 %v14993_v1, %v8842_v24 }
 0x6f4   :  { %v8793_v23 = vld [vmem:[%s15353_s5 + $0x108] sm:$0xff] }
 0x6f5   :  { %8953 = vst [vmem:[%s15354_s6 + $0xf8] sm:$0xff] %v8903_v44  ;;  %v8843_v34 = vadd.f32 %v8793_v23, %v8715_v22  ;;  %v8749_v44 = vpop.f32.mrb[99].mxu0 }
 0x6f6   :  { %v8753_v24 = vpop.f32.mrb[104].mxu0 }
 0x6f7   :  { %v8905_v26 = vadd.f32 %v15000_v55, %v8843_v34  ;;  %v8755_v34 = vpop.f32.mrb[105].mxu0 }
 0x6fc   :  { %v8794_v50 = vld [vmem:[%s15353_s5 + $0x110] sm:$0xff]  ;;  %v8795_v28 = vld [vmem:[%s15353_s5 + $0x118] sm:$0xff] }
 0x6fd   :  { %v8844_v13 = vadd.f32 %v8794_v50, %v8717_v3  ;;  %v8845_v40 = vadd.f32 %v8795_v28, %v8719_v17  ;;  %8954 = vst [vmem:[%s15354_s6 + $0x100] sm:$0xff] %v8904_v59  ;;  %8955 = vst [vmem:[%s15354_s6 + $0x108] sm:$0xff] %v8905_v26  ;;  %v8754_v28 = vadd.f32 %v8753_v24, %v14984_v16 }
 0x6fe   :  { %v8756_v59 = vadd.f32 %v8755_v34, %v14986_v33 }
 0x6ff   :  { %v8906_v36 = vadd.f32 %v14993_v1, %v8844_v13  ;;  %v8907_v21 = vadd.f32 %v15000_v55, %v8845_v40  ;;  %v8757_v13 = vpop.f32.mrb[106].mxu0 }
 0x700   :  { %v8758_v26 = vpop.f32.mrb[107].mxu0 }
 0x704   :  { %v8796_v18 = vld [vmem:[%s15353_s5 + $0x120] sm:$0xff] }
 0x705   :  { %8956 = vst [vmem:[%s15354_s6 + $0x110] sm:$0xff] %v8906_v36  ;;  %v8846_v61 = vadd.f32 %v8796_v18, %v8723_v39 }
 0x707   :  { %v8908_v51 = vadd.f32 %v14993_v1, %v8846_v61 }
 0x70c   :  { %v8797_v56 = vld [vmem:[%s15353_s5 + $0x128] sm:$0xff] }
 0x70d   :  { %8957 = vst [vmem:[%s15354_s6 + $0x118] sm:$0xff] %v8907_v21  ;;  %v8847_v30 = vadd.f32 %v8797_v56, %v8725_v49 }
 0x70f   :  { %v8909_v57 = vadd.f32 %v15000_v55, %v8847_v30 }
 0x714   :  { %v8798_v42 = vld [vmem:[%s15353_s5 + $0x130] sm:$0xff]  ;;  %v8799_v32 = vld [vmem:[%s15353_s5 + $0x138] sm:$0xff] }
 0x715   :  { %v8848_v12 = vadd.f32 %v8798_v42, %v8727_v29  ;;  %v8849_v15 = vadd.f32 %v8799_v32, %v8729_v14  ;;  %8958 = vst [vmem:[%s15354_s6 + $0x120] sm:$0xff] %v8908_v51  ;;  %8959 = vst [vmem:[%s15354_s6 + $0x128] sm:$0xff] %v8909_v57 }
 0x717   :  { %v8910_v63 = vadd.f32 %v14993_v1, %v8848_v12  ;;  %v8911_v6 = vadd.f32 %v15000_v55, %v8849_v15 }
 0x71c   :  { %v8800_v38 = vld [vmem:[%s15353_s5 + $0x140] sm:$0xff] }
 0x71d   :  { %8960 = vst [vmem:[%s15354_s6 + $0x130] sm:$0xff] %v8910_v63  ;;  %v8850_v9 = vadd.f32 %v8800_v38, %v8733_v2 }
 0x71f   :  { %v8912_v53 = vadd.f32 %v14993_v1, %v8850_v9 }
 0x724   :  { %v8801_v54 = vld [vmem:[%s15353_s5 + $0x148] sm:$0xff] }
 0x725   :  { %8961 = vst [vmem:[%s15354_s6 + $0x138] sm:$0xff] %v8911_v6  ;;  %v8851_v45 = vadd.f32 %v8801_v54, %v8735_v60 }
 0x727   :  { %v8913_v8 = vadd.f32 %v15000_v55, %v8851_v45 }
 0x72c   :  { %v8802_v31 = vld [vmem:[%s15353_s5 + $0x150] sm:$0xff]  ;;  %v8803_v5 = vld [vmem:[%s15353_s5 + $0x158] sm:$0xff] }
 0x72d   :  { %v8852_v4 = vadd.f32 %v8802_v31, %v8737_v10  ;;  %v8853_v43 = vadd.f32 %v8803_v5, %v8739_v19  ;;  %8962 = vst [vmem:[%s15354_s6 + $0x140] sm:$0xff] %v8912_v53  ;;  %8963 = vst [vmem:[%s15354_s6 + $0x148] sm:$0xff] %v8913_v8 }
 0x72f   :  { %v8914_v48 = vadd.f32 %v14993_v1, %v8852_v4  ;;  %v8915_v11 = vadd.f32 %v15000_v55, %v8853_v43 }
 0x734   :  { %v8804_v7 = vld [vmem:[%s15353_s5 + $0x160] sm:$0xff] }
 0x735   :  { %8964 = vst [vmem:[%s15354_s6 + $0x150] sm:$0xff] %v8914_v48  ;;  %v8854_v58 = vadd.f32 %v8804_v7, %v8743_v27 }
 0x737   :  { %v8916_v0 = vadd.f32 %v14993_v1, %v8854_v58 }
 0x73c   :  { %v8805_v52 = vld [vmem:[%s15353_s5 + $0x168] sm:$0xff] }
 0x73d   :  { %8965 = vst [vmem:[%s15354_s6 + $0x158] sm:$0xff] %v8915_v11  ;;  %v8855_v46 = vadd.f32 %v8805_v52, %v8745_v62 }
 0x73f   :  { %v8917_v35 = vadd.f32 %v15000_v55, %v8855_v46 }
 0x744   :  { %v8806_v20 = vld [vmem:[%s15353_s5 + $0x170] sm:$0xff]  ;;  %v8807_v25 = vld [vmem:[%s15353_s5 + $0x178] sm:$0xff] }
 0x745   :  { %v8856_v47 = vadd.f32 %v8806_v20, %v8747_v37  ;;  %v8857_v23 = vadd.f32 %v8807_v25, %v8749_v44  ;;  %8966 = vst [vmem:[%s15354_s6 + $0x160] sm:$0xff] %v8916_v0  ;;  %8967 = vst [vmem:[%s15354_s6 + $0x168] sm:$0xff] %v8917_v35 }
 0x747   :  { %v8918_v41 = vadd.f32 %v14993_v1, %v8856_v47  ;;  %v8919_v50 = vadd.f32 %v15000_v55, %v8857_v23 }
 0x749   :  { %8968 = vst [vmem:[%s15354_s6 + $0x170] sm:$0xff] %v8918_v41  ;;  %8969 = vst [vmem:[%s15354_s6 + $0x178] sm:$0xff] %v8919_v50 }
 0x750   :  { %v8808_v22 = vld [vmem:[%s15353_s5 + $0x180] sm:$0xff]  ;;  %v8809_v3 = vld [vmem:[%s15353_s5 + $0x188] sm:$0xff] }
 0x751   :  { %v8858_v17 = vadd.f32 %v8808_v22, %v8754_v28  ;;  %v8859_v40 = vadd.f32 %v8809_v3, %v8756_v59 }
 0x753   :  { %v8920_v36 = vadd.f32 %v14993_v1, %v8858_v17  ;;  %v8921_v21 = vadd.f32 %v15000_v55, %v8859_v40 }
 0x755   :  { %8970 = vst [vmem:[%s15354_s6 + $0x180] sm:$0xff] %v8920_v36  ;;  %8971 = vst [vmem:[%s15354_s6 + $0x188] sm:$0xff] %v8921_v21 }
 0x756   :  { %8976 = vsyncpa [#allocation3], 1 }
 0x757   :  { %8977 = vsyncpa [#allocation5], 1 }

</bundles_post_ra>
